<compile_context>
chip_gen: v7x
topology: tpu7x:2x2x1
jax: 0.10.0
libtpu: 0.0.40
codegen_flags: <defaults>
</compile_context>

<pallas_src>
import functools
import math

import jax
import jax.numpy as jnp
from jax.experimental import pallas as pl
from jax.experimental.pallas import tpu as pltpu

_TM = 512                       # row-tile size for M-tiled kernels
_VMEM_LIMIT = 32 * 1024 * 1024  # explicit scoped-VMEM budget (safe on v5e/v6e/v7x)


def _cparams(*sem):
    return pltpu.CompilerParams(dimension_semantics=sem,
                                vmem_limit_bytes=_VMEM_LIMIT)


def _row_tiles(M):
    tm = M if M <= _TM else _TM
    return tm, pl.cdiv(M, tm)


def _layernorm(x, g, b, eps):
    mu = jnp.mean(x, axis=-1, keepdims=True)
    xc = x - mu
    var = jnp.mean(xc * xc, axis=-1, keepdims=True)
    return xc * jax.lax.rsqrt(var + eps) * g + b


# ----------------------------------------------------------------------------
# Pallas kernels
# ----------------------------------------------------------------------------
def _linear_kernel(x_ref, w_ref, b_ref, o_ref, *, act):
    """y = act(x @ w + b); bf16 operands, f32 accumulation.  Used for conv1."""
    y = jnp.dot(x_ref[...].astype(jnp.bfloat16), w_ref[...],
                preferred_element_type=jnp.float32) + b_ref[...]
    if act == "relu":
        y = jnp.maximum(y, 0.0)
    elif act == "swish":
        y = y * jax.nn.sigmoid(y)
    o_ref[...] = y.astype(o_ref.dtype)


def pallas_linear(x, w, b, act=None, out_dtype=jnp.float32):
    M, K = x.shape
    N = w.shape[1]
    tm, gm = _row_tiles(M)
    return pl.pallas_call(
        functools.partial(_linear_kernel, act=act),
        out_shape=jax.ShapeDtypeStruct((M, N), out_dtype),
        grid=(gm,),
        in_specs=[
            pl.BlockSpec((tm, K), lambda i: (i, 0)),
            pl.BlockSpec((K, N), lambda i: (0, 0)),
            pl.BlockSpec((1, N), lambda i: (0, 0)),
        ],
        out_specs=pl.BlockSpec((tm, N), lambda i: (i, 0)),
        compiler_params=_cparams("parallel"),
    )(x, w, b)


def _conv2_embed_kernel(h1e_ref, h1o_ref, w2_ref, b2_ref, wout_ref, bout_ref,
                        pe_ref, o_ref, *, t2, f2, d, xscale):
    """Per batch element:
       Conv2d(d, d, 3, stride=2) + ReLU + out-Linear + *sqrt(d) + abs pos-enc,
       all on the resident h1 tile (no im2col blow-up of h1 in HBM).

    h1e_ref: (1, t2+1, f1*d) even time rows of h1 (bf16)
    h1o_ref: (1, t2,   f1*d) odd  time rows of h1 (bf16)
    """
    srcs = (h1e_ref[0, 0:t2],        # kernel row offset i=0 -> times 0,2,...
            h1o_ref[0, 0:t2],        # i=1 -> times 1,3,...
            h1e_ref[0, 1:t2 + 1])    # i=2 -> times 2,4,...
    w2 = w2_ref[...]                 # (9*d, d)   bf16, rows (i*3+j)*d + c_in
    wout = wout_ref[...]             # (f2*d, dm) bf16, rows f*d + c
    dm = wout.shape[1]
    bias2 = jnp.zeros((t2, d), jnp.float32) + b2_ref[...]   # hoisted broadcast
    y = jnp.zeros((t2, dm), jnp.float32)
    for f in range(f2):
        acc = bias2
        for i in range(3):
            src = srcs[i]
            for j in range(3):
                col = 2 * f + j                               # static
                xin = src[:, col * d:(col + 1) * d]           # (t2, d) bf16
                wij = w2[(i * 3 + j) * d:(i * 3 + j + 1) * d, :]
                acc = acc + jnp.dot(xin, wij, preferred_element_type=jnp.float32)
        h2f = jnp.maximum(acc, 0.0).astype(jnp.bfloat16)      # ReLU
        y = y + jnp.dot(h2f, wout[f * d:(f + 1) * d, :],
                        preferred_element_type=jnp.float32)
    # PositionalEncoding: (linear_out + bias) * sqrt(d_model) + pe
    o_ref[0] = (y + bout_ref[...]) * xscale + pe_ref[...]


def pallas_conv2_embed(h1e, h1o, w2, b2, wout, bout, pe, *, f2, d, xscale):
    B, t2p1, f1d = h1e.shape
    t2 = t2p1 - 1
    dm = wout.shape[1]
    return pl.pallas_call(
        functools.partial(_conv2_embed_kernel, t2=t2, f2=f2, d=d, xscale=xscale),
        out_shape=jax.ShapeDtypeStruct((B, t2, dm), jnp.float32),
        grid=(B,),
        in_specs=[
            pl.BlockSpec((1, t2 + 1, f1d), lambda b: (b, 0, 0)),
            pl.BlockSpec((1, t2, f1d), lambda b: (b, 0, 0)),
            pl.BlockSpec((9 * d, d), lambda b: (0, 0)),
            pl.BlockSpec((1, d), lambda b: (0, 0)),
            pl.BlockSpec((f2 * d, dm), lambda b: (0, 0)),
            pl.BlockSpec((1, dm), lambda b: (0, 0)),
            pl.BlockSpec((t2, dm), lambda b: (0, 0)),
        ],
        out_specs=pl.BlockSpec((1, t2, dm), lambda b: (b, 0, 0)),
        compiler_params=_cparams("parallel"),
    )(h1e, h1o, w2, b2, wout, bout, pe)


def _mha_kernel(x_ref, g_ref, b_ref, wqkv_ref, bqkv_ref, wo_ref, bo_ref,
                bias_ref, maskf_ref, o_ref, *, heads, dk, scale, eps):
    """Whole MHA sub-block for one batch element, fully fused:
       LayerNorm -> QKV projection -> per-head attention -> output projection
       (applied per head slice of wo, accumulated) -> residual add.
       No qkv / ctx HBM round-trips, no per-head concatenate."""
    x = x_ref[0]                                        # (T, d) f32 residual
    xn = _layernorm(x, g_ref[...], b_ref[...], eps)
    qkv = (jnp.dot(xn.astype(jnp.bfloat16), wqkv_ref[...],
                   preferred_element_type=jnp.float32)
           + bqkv_ref[...]).astype(jnp.bfloat16)        # (T, 3d)
    wo = wo_ref[...]                                    # (d, d) bf16
    bias = bias_ref[0]                                  # (1, T) additive 0/-1e30
    mf = maskf_ref[0]                                   # (1, T) multiplicative 1/0
    d = heads * dk
    acc = x + bo_ref[...]                               # residual + out-proj bias
    for h in range(heads):
        q = qkv[:, h * dk:(h + 1) * dk]
        k = qkv[:, d + h * dk:d + (h + 1) * dk]
        v = qkv[:, 2 * d + h * dk:2 * d + (h + 1) * dk]
        s = jax.lax.dot_general(q, k, (((1,), (1,)), ((), ())),
                                preferred_element_type=jnp.float32) * scale
        s = s + bias
        s = s - jnp.max(s, axis=-1, keepdims=True)
        e = jnp.exp(s)
        p = e * pl.reciprocal(jnp.sum(e, axis=-1, keepdims=True), approx=True)
        p = (p * mf).astype(jnp.bfloat16)               # espnet masked_fill(mask, 0)
        ctx_h = jnp.dot(p, v, preferred_element_type=jnp.float32)   # (T, dk)
        acc = acc + jnp.dot(ctx_h.astype(jnp.bfloat16),
                            wo[h * dk:(h + 1) * dk, :],
                            preferred_element_type=jnp.float32)
    o_ref[0] = acc


def pallas_mha(x, g, b, wqkv, bqkv, wo, bo, mask_bias, mask_f, *, heads, dk,
               eps=1e-12):
    B, T, d = x.shape
    scale = 1.0 / math.sqrt(dk)
    return pl.pallas_call(
        functools.partial(_mha_kernel, heads=heads, dk=dk, scale=scale, eps=eps),
        out_shape=jax.ShapeDtypeStruct((B, T, d), jnp.float32),
        grid=(B,),
        in_specs=[
            pl.BlockSpec((1, T, d), lambda bi: (bi, 0, 0)),
            pl.BlockSpec((1, d), lambda bi: (0, 0)),
            pl.BlockSpec((1, d), lambda bi: (0, 0)),
            pl.BlockSpec((d, 3 * d), lambda bi: (0, 0)),
            pl.BlockSpec((1, 3 * d), lambda bi: (0, 0)),
            pl.BlockSpec((d, d), lambda bi: (0, 0)),
            pl.BlockSpec((1, d), lambda bi: (0, 0)),
            pl.BlockSpec((1, 1, T), lambda bi: (bi, 0, 0)),
            pl.BlockSpec((1, 1, T), lambda bi: (bi, 0, 0)),
        ],
        out_specs=pl.BlockSpec((1, T, d), lambda bi: (bi, 0, 0)),
        compiler_params=_cparams("parallel"),
    )(x, g, b, wqkv, bqkv, wo, bo, mask_bias, mask_f)


def _ffn_kernel(x_ref, g_ref, b_ref, w1_ref, b1_ref, w2_ref, b2_ref, o_ref, *, eps):
    """Fused: LayerNorm + FF1(swish) + FF2 + residual add (ff_scale = 1.0)."""
    x = x_ref[...]
    xn = _layernorm(x, g_ref[...], b_ref[...], eps)
    h = jnp.dot(xn.astype(jnp.bfloat16), w1_ref[...],
                preferred_element_type=jnp.float32) + b1_ref[...]
    h = h * jax.nn.sigmoid(h)           # swish
    y = jnp.dot(h.astype(jnp.bfloat16), w2_ref[...],
                preferred_element_type=jnp.float32) + b2_ref[...]
    o_ref[...] = x + y


def pallas_ffn(x, g, b, w1, b1, w2, b2, eps=1e-12):
    M, D = x.shape
    U = w1.shape[1]
    tm, gm = _row_tiles(M)
    return pl.pallas_call(
        functools.partial(_ffn_kernel, eps=eps),
        out_shape=jax.ShapeDtypeStruct((M, D), jnp.float32),
        grid=(gm,),
        in_specs=[
            pl.BlockSpec((tm, D), lambda i: (i, 0)),
            pl.BlockSpec((1, D), lambda i: (0, 0)),
            pl.BlockSpec((1, D), lambda i: (0, 0)),
            pl.BlockSpec((D, U), lambda i: (0, 0)),
            pl.BlockSpec((1, U), lambda i: (0, 0)),
            pl.BlockSpec((U, D), lambda i: (0, 0)),
            pl.BlockSpec((1, D), lambda i: (0, 0)),
        ],
        out_specs=pl.BlockSpec((tm, D), lambda i: (i, 0)),
        compiler_params=_cparams("parallel"),
    )(x, g, b, w1, b1, w2, b2)


def _layernorm_kernel(x_ref, g_ref, b_ref, o_ref, *, eps):
    o_ref[...] = _layernorm(x_ref[...], g_ref[...], b_ref[...], eps)


def pallas_layernorm(x, g, b, eps=1e-12):  # espnet LayerNorm eps=1e-12
    M, D = x.shape
    tm, gm = _row_tiles(M)
    return pl.pallas_call(
        functools.partial(_layernorm_kernel, eps=eps),
        out_shape=jax.ShapeDtypeStruct((M, D), jnp.float32),
        grid=(gm,),
        in_specs=[
            pl.BlockSpec((tm, D), lambda i: (i, 0)),
            pl.BlockSpec((1, D), lambda i: (0, 0)),
            pl.BlockSpec((1, D), lambda i: (0, 0)),
        ],
        out_specs=pl.BlockSpec((tm, D), lambda i: (i, 0)),
        compiler_params=_cparams("parallel"),
    )(x, g, b)


# ----------------------------------------------------------------------------
# Plain-JAX glue (conv1 im2col, positional encoding)
# ----------------------------------------------------------------------------
def im2col_nhwc(x, kh, kw, stride):
    """x: (B, H, W, C) NHWC -> patches (B, Ho, Wo, kh*kw*C), flatten order (i, j, c)."""
    B, H, W, C = x.shape
    Ho = (H - kh) // stride + 1
    Wo = (W - kw) // stride + 1
    cols = []
    for i in range(kh):
        for j in range(kw):
            cols.append(x[:, i:i + stride * Ho:stride, j:j + stride * Wo:stride, :])
    patches = jnp.stack(cols, axis=3)               # (B, Ho, Wo, kh*kw, C)
    return patches.reshape(B, Ho, Wo, kh * kw * C), Ho, Wo


def positional_encoding(length, d_model):
    position = jnp.arange(length, dtype=jnp.float32)[:, None]
    div_term = jnp.exp(jnp.arange(0, d_model, 2, dtype=jnp.float32)
                       * -(math.log(10000.0) / d_model))
    pe = jnp.zeros((length, d_model), jnp.float32)
    pe = pe.at[:, 0::2].set(jnp.sin(position * div_term))
    pe = pe.at[:, 1::2].set(jnp.cos(position * div_term))
    return pe


# ----------------------------------------------------------------------------
# Parameters (torch-layout) and one-time preparation (concat / permute / bf16)
# ----------------------------------------------------------------------------
def init_params(key, idim, d_model, heads, units, num_blocks):
    f1 = (idim - 3) // 2 + 1
    f2 = (f1 - 3) // 2 + 1            # == ((idim - 1)//2 - 1)//2
    params = {}
    keys = iter(jax.random.split(key, 64))

    def nrm(shape, scale=0.02):
        return scale * jax.random.normal(next(keys), shape, jnp.float32)

    # Conv2dSubsampling: Conv2d(1, d, 3, 2) -> ReLU -> Conv2d(d, d, 3, 2) -> ReLU -> Linear
    params["conv1_w"] = nrm((d_model, 1, 3, 3))
    params["conv1_b"] = jnp.zeros((d_model,), jnp.float32)
    params["conv2_w"] = nrm((d_model, d_model, 3, 3))
    params["conv2_b"] = jnp.zeros((d_model,), jnp.float32)
    params["out_w"] = nrm((d_model * f2, d_model))        # stored (in=c*f2+f, out)
    params["out_b"] = jnp.zeros((d_model,), jnp.float32)

    layers = []
    for _ in range(num_blocks):
        lp = {
            "norm_mha_g": jnp.ones((d_model,), jnp.float32),
            "norm_mha_b": jnp.zeros((d_model,), jnp.float32),
            "wq": nrm((d_model, d_model)), "bq": jnp.zeros((d_model,), jnp.float32),
            "wk": nrm((d_model, d_model)), "bk": jnp.zeros((d_model,), jnp.float32),
            "wv": nrm((d_model, d_model)), "bv": jnp.zeros((d_model,), jnp.float32),
            "wo": nrm((d_model, d_model)), "bo": jnp.zeros((d_model,), jnp.float32),
            "norm_ff_g": jnp.ones((d_model,), jnp.float32),
            "norm_ff_b": jnp.zeros((d_model,), jnp.float32),
            "ff_w1": nrm((d_model, units)), "ff_b1": jnp.zeros((units,), jnp.float32),
            "ff_w2": nrm((units, d_model)), "ff_b2": jnp.zeros((d_model,), jnp.float32),
        }
        layers.append(lp)
    params["layers"] = layers
    params["after_norm_g"] = jnp.ones((d_model,), jnp.float32)
    params["after_norm_b"] = jnp.zeros((d_model,), jnp.float32)
    return params


def prepare_params(params, idim, d_model, units):
    """One-time weight relayout: qkv concat, conv weight permutations, bf16 casts."""
    f1 = (idim - 3) // 2 + 1
    f2 = (f1 - 3) // 2 + 1
    prep = {}
    # conv weights -> (kh*kw*in, out); rows (i*3+j)*C_in + c_in
    prep["conv1_w"] = params["conv1_w"].transpose(2, 3, 1, 0).reshape(9, d_model).astype(jnp.bfloat16)
    prep["conv1_b"] = params["conv1_b"].reshape(1, d_model)
    prep["conv2_w"] = params["conv2_w"].transpose(2, 3, 1, 0).reshape(9 * d_model, d_model).astype(jnp.bfloat16)
    prep["conv2_b"] = params["conv2_b"].reshape(1, d_model)
    # out Linear rows permuted (c*f2+f) -> (f*d+c) so the activation relayout is
    # folded into the weight (no per-call transpose of the conv output needed)
    w = params["out_w"].reshape(d_model, f2, d_model).transpose(1, 0, 2)
    prep["out_w"] = w.reshape(f2 * d_model, d_model).astype(jnp.bfloat16)
    prep["out_b"] = params["out_b"].reshape(1, d_model)

    layers = []
    for lp in params["layers"]:
        layers.append({
            "norm_mha_g": lp["norm_mha_g"].reshape(1, d_model),
            "norm_mha_b": lp["norm_mha_b"].reshape(1, d_model),
            "wqkv": jnp.concatenate([lp["wq"], lp["wk"], lp["wv"]], axis=1).astype(jnp.bfloat16),
            "bqkv": jnp.concatenate([lp["bq"], lp["bk"], lp["bv"]]).reshape(1, 3 * d_model),
            "wo": lp["wo"].astype(jnp.bfloat16), "bo": lp["bo"].reshape(1, d_model),
            "norm_ff_g": lp["norm_ff_g"].reshape(1, d_model),
            "norm_ff_b": lp["norm_ff_b"].reshape(1, d_model),
            "ff_w1": lp["ff_w1"].astype(jnp.bfloat16), "ff_b1": lp["ff_b1"].reshape(1, units),
            "ff_w2": lp["ff_w2"].astype(jnp.bfloat16), "ff_b2": lp["ff_b2"].reshape(1, d_model),
        })
    prep["layers"] = layers
    prep["after_norm_g"] = params["after_norm_g"].reshape(1, d_model)
    prep["after_norm_b"] = params["after_norm_b"].reshape(1, d_model)
    return prep


# ----------------------------------------------------------------------------
# Forward pass
# ----------------------------------------------------------------------------
@functools.partial(jax.jit, static_argnames=("d_model", "heads"))
def encoder_forward(xs, masks, prep, *, d_model, heads):
    """xs: (B, T, idim) f32, masks: (B, 1, T) bool -> ((B, T', d), (B, 1, T'))."""
    B, T, idim = xs.shape
    dk = d_model // heads

    # ---- Conv2dSubsampling (x4), NHWC layout -------------------------------
    # conv1 via plain-JAX im2col (C=1, so the patch blow-up is only over the raw
    # input, which is tiny).  TODO(synk): conv1 patch extraction stays in XLA.
    x = xs.astype(jnp.bfloat16)[:, :, :, None]                  # (B, T, idim, 1)
    p1, t1, f1 = im2col_nhwc(x, 3, 3, 2)
    h1 = pallas_linear(p1.reshape(-1, 9), prep["conv1_w"], prep["conv1_b"],
                       act="relu", out_dtype=jnp.bfloat16)
    h1 = h1.reshape(B, t1, f1 * d_model)                         # (B, t1, f1*d)

    t2 = (t1 - 3) // 2 + 1
    f2 = (f1 - 3) // 2 + 1
    # even / odd time-row split (1x of h1, done once) so the conv2 kernel needs
    # only contiguous slices of the resident tile (no 9x im2col in HBM).
    h1e = h1[:, 0:2 * t2 + 1:2]                                  # (B, t2+1, f1*d)
    h1o = h1[:, 1:2 * t2:2]                                      # (B, t2,   f1*d)

    # conv2 + ReLU + out-Linear + PositionalEncoding fused in one kernel.
    pe = positional_encoding(t2, d_model)                        # (t2, d) constant
    x = pallas_conv2_embed(h1e, h1o, prep["conv2_w"], prep["conv2_b"],
                           prep["out_w"], prep["out_b"], pe,
                           f2=f2, d=d_model, xscale=math.sqrt(d_model))  # (B, t2, d)

    # subsample mask like Conv2dSubsampling: mask[:, :, :-2:2][:, :, :-2:2]
    masks2 = masks[:, :, :-2:2][:, :, :-2:2]                     # (B, 1, t2) bool
    mask_f = masks2.astype(jnp.float32)                          # 1 keep / 0 masked
    mask_bias = (mask_f - 1.0) * 1e30                            # 0 / -1e30 additive

    # ---- Conformer encoder layers (pre-norm, no macaron, no conv module) ----
    # 2 pallas_calls per layer: fused MHA block + fused FFN block.
    M = B * t2
    for lp in prep["layers"]:
        x = pallas_mha(x, lp["norm_mha_g"], lp["norm_mha_b"],
                       lp["wqkv"], lp["bqkv"], lp["wo"], lp["bo"],
                       mask_bias, mask_f, heads=heads, dk=dk)    # (B, t2, d)
        x = pallas_ffn(x.reshape(M, d_model),
                       lp["norm_ff_g"], lp["norm_ff_b"],
                       lp["ff_w1"], lp["ff_b1"], lp["ff_w2"], lp["ff_b2"])
        x = x.reshape(B, t2, d_model)

    # ---- after_norm (normalize_before=True) ---------------------------------
    x = pallas_layernorm(x.reshape(M, d_model),
                         prep["after_norm_g"], prep["after_norm_b"])
    # TODO(synk): dropout layers and the debug print() in the reference forward
    # are omitted (identity / side-effect only at inference).
    return x.reshape(B, t2, d_model), masks2


# ----------------------------------------------------------------------------
if __name__ == "__main__":
    B, T, idim = 2, 32, 20
    d_model, heads, units, num_blocks = 32, 4, 64, 2

    key = jax.random.PRNGKey(0)
    kx, kp = jax.random.split(key)
    xs = jax.random.normal(kx, (B, T, idim), jnp.float32)
    masks = jnp.ones((B, 1, T), dtype=bool)
    masks = masks.at[1, 0, 28:].set(False)   # some padding on the 2nd example

    params = init_params(kp, idim, d_model, heads, units, num_blocks)
    prep = prepare_params(params, idim, d_model, units)   # one-time relayout/bf16

    ys, out_masks = encoder_forward(xs, masks, prep, d_model=d_model, heads=heads)
    jax.block_until_ready(ys)
    jax.block_until_ready(out_masks)
    t_out = ((T - 1) // 2 - 1) // 2
    assert ys.shape == (B, t_out, d_model)
    assert out_masks.shape == (B, 1, t_out)
    print("KERNEL_OK")
</pallas_src>

<mosaic_0001>
module attributes {stable_mosaic.version = 11 : i64} {
  func.func @_linear_kernel(%arg0: i32, %arg1: memref<270x9xbf16, #tpu.memory_space<vmem>>, %arg2: memref<9x32xbf16, #tpu.memory_space<vmem>>, %arg3: memref<1x32xf32, #tpu.memory_space<vmem>>, %arg4: memref<270x32xbf16, #tpu.memory_space<vmem>>) attributes {dimension_semantics = [#tpu.dimension_semantics<parallel>], iteration_bounds = array<i64: 1>, scalar_prefetch = 0 : i64, scratch_operands = 0 : i64, tpu.core_type = #tpu.core_type<tc>, window_params = [{transform_indices = @transform_0, window_bounds = array<i64: 270, 9>}, {pipeline_mode = #tpu.pipeline_mode<synchronous>, transform_indices = @transform_1, window_bounds = array<i64: 9, 32>}, {pipeline_mode = #tpu.pipeline_mode<synchronous>, transform_indices = @transform_2, window_bounds = array<i64: 1, 32>}, {transform_indices = @transform_3, window_bounds = array<i64: 270, 32>}]} {
    %c0 = arith.constant 0 : index
    %c0_0 = arith.constant 0 : index
    %0 = vector.load %arg1[%c0, %c0_0] : memref<270x9xbf16, #tpu.memory_space<vmem>>, vector<270x9xbf16>
    %c0_1 = arith.constant 0 : index
    %c0_2 = arith.constant 0 : index
    %1 = vector.load %arg2[%c0_1, %c0_2] : memref<9x32xbf16, #tpu.memory_space<vmem>>, vector<9x32xbf16>
    %cst = arith.constant dense<0.000000e+00> : vector<270x32xf32>
    %2 = tpu.matmul %0, %1, %cst {dimension_numbers = #tpu.dot_dimension_numbers<[1], [0], [0], [1], [0, 0, 1, 1], [], []>} : vector<270x9xbf16>, vector<9x32xbf16>, vector<270x32xf32> -> vector<270x32xf32>
    %c0_3 = arith.constant 0 : index
    %c0_4 = arith.constant 0 : index
    %3 = vector.load %arg3[%c0_3, %c0_4] : memref<1x32xf32, #tpu.memory_space<vmem>>, vector<1x32xf32>
    %4 = vector.broadcast %3 : vector<1x32xf32> to vector<270x32xf32>
    %5 = arith.addf %2, %4 : vector<270x32xf32>
    %cst_5 = arith.constant 0.000000e+00 : f32
    %6 = vector.broadcast %cst_5 : f32 to vector<270x32xf32>
    %7 = arith.maximumf %5, %6 : vector<270x32xf32>
    %8 = arith.truncf %7 : vector<270x32xf32> to vector<270x32xbf16>
    %c0_6 = arith.constant 0 : index
    %c0_7 = arith.constant 0 : index
    %9 = vector.load %arg4[%c0_6, %c0_7] : memref<270x32xbf16, #tpu.memory_space<vmem>>, vector<270x32xbf16>
    tpu.vector_store %arg4[%c0_6, %c0_7], %8 {strides = array<i32>} : memref<270x32xbf16, #tpu.memory_space<vmem>>, vector<270x32xbf16>,
    return
  }
  func.func @transform_0(%arg0: i32) -> (i32, i32) {
    %c0_i32 = arith.constant 0 : i32
    %c0_i32_0 = arith.constant 0 : i32
    return %arg0, %c0_i32 : i32, i32
  }
  func.func @transform_1(%arg0: i32) -> (i32, i32) {
    %c0_i32 = arith.constant 0 : i32
    %c0_i32_0 = arith.constant 0 : i32
    %c0_i32_1 = arith.constant 0 : i32
    return %c0_i32, %c0_i32_0 : i32, i32
  }
  func.func @transform_2(%arg0: i32) -> (i32, i32) {
    %c0_i32 = arith.constant 0 : i32
    %c0_i32_0 = arith.constant 0 : i32
    %c0_i32_1 = arith.constant 0 : i32
    return %c0_i32, %c0_i32_0 : i32, i32
  }
  func.func @transform_3(%arg0: i32) -> (i32, i32) {
    %c0_i32 = arith.constant 0 : i32
    %c0_i32_0 = arith.constant 0 : i32
    return %arg0, %c0_i32 : i32, i32
  }
}

module attributes {stable_mosaic.version = 11 : i64} {
  func.func @_conv2_embed_kernel(%arg0: i32, %arg1: memref<1x8x288xbf16, #tpu.memory_space<vmem>>, %arg2: memref<1x7x288xbf16, #tpu.memory_space<vmem>>, %arg3: memref<288x32xbf16, #tpu.memory_space<vmem>>, %arg4: memref<1x32xf32, #tpu.memory_space<vmem>>, %arg5: memref<128x32xbf16, #tpu.memory_space<vmem>>, %arg6: memref<1x32xf32, #tpu.memory_space<vmem>>, %arg7: memref<7x32xf32, #tpu.memory_space<vmem>>, %arg8: memref<1x7x32xf32, #tpu.memory_space<vmem>>) attributes {dimension_semantics = [#tpu.dimension_semantics<parallel>], iteration_bounds = array<i64: 2>, scalar_prefetch = 0 : i64, scratch_operands = 0 : i64, tpu.core_type = #tpu.core_type<tc>, window_params = [{transform_indices = @transform_0, window_bounds = array<i64: 1, 8, 288>}, {transform_indices = @transform_1, window_bounds = array<i64: 1, 7, 288>}, {pipeline_mode = #tpu.pipeline_mode<synchronous>, transform_indices = @transform_2, window_bounds = array<i64: 288, 32>}, {pipeline_mode = #tpu.pipeline_mode<synchronous>, transform_indices = @transform_3, window_bounds = array<i64: 1, 32>}, {pipeline_mode = #tpu.pipeline_mode<synchronous>, transform_indices = @transform_4, window_bounds = array<i64: 128, 32>}, {pipeline_mode = #tpu.pipeline_mode<synchronous>, transform_indices = @transform_5, window_bounds = array<i64: 1, 32>}, {pipeline_mode = #tpu.pipeline_mode<synchronous>, transform_indices = @transform_6, window_bounds = array<i64: 7, 32>}, {transform_indices = @transform_7, window_bounds = array<i64: 1, 7, 32>}]} {
    %c0 = arith.constant 0 : index
    %c0_0 = arith.constant 0 : index
    %c0_1 = arith.constant 0 : index
    %0 = vector.load %arg1[%c0, %c0_0, %c0_1] : memref<1x8x288xbf16, #tpu.memory_space<vmem>>, vector<1x7x288xbf16>
    %1 = vector.shape_cast %0 : vector<1x7x288xbf16> to vector<7x288xbf16>
    %c0_2 = arith.constant 0 : index
    %c0_3 = arith.constant 0 : index
    %c0_4 = arith.constant 0 : index
    %2 = vector.load %arg2[%c0_2, %c0_3, %c0_4] : memref<1x7x288xbf16, #tpu.memory_space<vmem>>, vector<1x7x288xbf16>
    %3 = vector.shape_cast %2 : vector<1x7x288xbf16> to vector<7x288xbf16>
    %c0_5 = arith.constant 0 : index
    %c1 = arith.constant 1 : index
    %c0_6 = arith.constant 0 : index
    %4 = vector.load %arg1[%c0_5, %c1, %c0_6] : memref<1x8x288xbf16, #tpu.memory_space<vmem>>, vector<1x7x288xbf16>
    %5 = vector.shape_cast %4 : vector<1x7x288xbf16> to vector<7x288xbf16>
    %c0_7 = arith.constant 0 : index
    %c0_8 = arith.constant 0 : index
    %6 = vector.load %arg3[%c0_7, %c0_8] : memref<288x32xbf16, #tpu.memory_space<vmem>>, vector<288x32xbf16>
    %c0_9 = arith.constant 0 : index
    %c0_10 = arith.constant 0 : index
    %7 = vector.load %arg5[%c0_9, %c0_10] : memref<128x32xbf16, #tpu.memory_space<vmem>>, vector<128x32xbf16>
    %cst = arith.constant 0.000000e+00 : f32
    %8 = vector.broadcast %cst : f32 to vector<7x32xf32>
    %c0_11 = arith.constant 0 : index
    %c0_12 = arith.constant 0 : index
    %9 = vector.load %arg4[%c0_11, %c0_12] : memref<1x32xf32, #tpu.memory_space<vmem>>, vector<1x32xf32>
    %10 = vector.broadcast %9 : vector<1x32xf32> to vector<7x32xf32>
    %11 = arith.addf %8, %10 : vector<7x32xf32>
    %cst_13 = arith.constant 0.000000e+00 : f32
    %12 = vector.broadcast %cst_13 : f32 to vector<7x32xf32>
    %13 = vector.extract_strided_slice %1 {offsets = [0, 0], sizes = [7, 32], strides = [1, 1]} : vector<7x288xbf16> to vector<7x32xbf16>
    %14 = vector.extract_strided_slice %6 {offsets = [0, 0], sizes = [32, 32], strides = [1, 1]} : vector<288x32xbf16> to vector<32x32xbf16>
    %cst_14 = arith.constant dense<0.000000e+00> : vector<7x32xf32>
    %15 = tpu.matmul %13, %14, %cst_14 {dimension_numbers = #tpu.dot_dimension_numbers<[1], [0], [0], [1], [0, 0, 1, 1], [], []>} : vector<7x32xbf16>, vector<32x32xbf16>, vector<7x32xf32> -> vector<7x32xf32>
    %16 = arith.addf %11, %15 : vector<7x32xf32>
    %17 = vector.extract_strided_slice %1 {offsets = [0, 32], sizes = [7, 32], strides = [1, 1]} : vector<7x288xbf16> to vector<7x32xbf16>
    %18 = vector.extract_strided_slice %6 {offsets = [32, 0], sizes = [32, 32], strides = [1, 1]} : vector<288x32xbf16> to vector<32x32xbf16>
    %cst_15 = arith.constant dense<0.000000e+00> : vector<7x32xf32>
    %19 = tpu.matmul %17, %18, %cst_15 {dimension_numbers = #tpu.dot_dimension_numbers<[1], [0], [0], [1], [0, 0, 1, 1], [], []>} : vector<7x32xbf16>, vector<32x32xbf16>, vector<7x32xf32> -> vector<7x32xf32>
    %20 = arith.addf %16, %19 : vector<7x32xf32>
    %21 = vector.extract_strided_slice %1 {offsets = [0, 64], sizes = [7, 32], strides = [1, 1]} : vector<7x288xbf16> to vector<7x32xbf16>
    %22 = vector.extract_strided_slice %6 {offsets = [64, 0], sizes = [32, 32], strides = [1, 1]} : vector<288x32xbf16> to vector<32x32xbf16>
    %cst_16 = arith.constant dense<0.000000e+00> : vector<7x32xf32>
    %23 = tpu.matmul %21, %22, %cst_16 {dimension_numbers = #tpu.dot_dimension_numbers<[1], [0], [0], [1], [0, 0, 1, 1], [], []>} : vector<7x32xbf16>, vector<32x32xbf16>, vector<7x32xf32> -> vector<7x32xf32>
    %24 = arith.addf %20, %23 : vector<7x32xf32>
    %25 = vector.extract_strided_slice %3 {offsets = [0, 0], sizes = [7, 32], strides = [1, 1]} : vector<7x288xbf16> to vector<7x32xbf16>
    %26 = vector.extract_strided_slice %6 {offsets = [96, 0], sizes = [32, 32], strides = [1, 1]} : vector<288x32xbf16> to vector<32x32xbf16>
    %cst_17 = arith.constant dense<0.000000e+00> : vector<7x32xf32>
    %27 = tpu.matmul %25, %26, %cst_17 {dimension_numbers = #tpu.dot_dimension_numbers<[1], [0], [0], [1], [0, 0, 1, 1], [], []>} : vector<7x32xbf16>, vector<32x32xbf16>, vector<7x32xf32> -> vector<7x32xf32>
    %28 = arith.addf %24, %27 : vector<7x32xf32>
    %29 = vector.extract_strided_slice %3 {offsets = [0, 32], sizes = [7, 32], strides = [1, 1]} : vector<7x288xbf16> to vector<7x32xbf16>
    %30 = vector.extract_strided_slice %6 {offsets = [128, 0], sizes = [32, 32], strides = [1, 1]} : vector<288x32xbf16> to vector<32x32xbf16>
    %cst_18 = arith.constant dense<0.000000e+00> : vector<7x32xf32>
    %31 = tpu.matmul %29, %30, %cst_18 {dimension_numbers = #tpu.dot_dimension_numbers<[1], [0], [0], [1], [0, 0, 1, 1], [], []>} : vector<7x32xbf16>, vector<32x32xbf16>, vector<7x32xf32> -> vector<7x32xf32>
    %32 = arith.addf %28, %31 : vector<7x32xf32>
    %33 = vector.extract_strided_slice %3 {offsets = [0, 64], sizes = [7, 32], strides = [1, 1]} : vector<7x288xbf16> to vector<7x32xbf16>
    %34 = vector.extract_strided_slice %6 {offsets = [160, 0], sizes = [32, 32], strides = [1, 1]} : vector<288x32xbf16> to vector<32x32xbf16>
    %cst_19 = arith.constant dense<0.000000e+00> : vector<7x32xf32>
    %35 = tpu.matmul %33, %34, %cst_19 {dimension_numbers = #tpu.dot_dimension_numbers<[1], [0], [0], [1], [0, 0, 1, 1], [], []>} : vector<7x32xbf16>, vector<32x32xbf16>, vector<7x32xf32> -> vector<7x32xf32>
    %36 = arith.addf %32, %35 : vector<7x32xf32>
    %37 = vector.extract_strided_slice %5 {offsets = [0, 0], sizes = [7, 32], strides = [1, 1]} : vector<7x288xbf16> to vector<7x32xbf16>
    %38 = vector.extract_strided_slice %6 {offsets = [192, 0], sizes = [32, 32], strides = [1, 1]} : vector<288x32xbf16> to vector<32x32xbf16>
    %cst_20 = arith.constant dense<0.000000e+00> : vector<7x32xf32>
    %39 = tpu.matmul %37, %38, %cst_20 {dimension_numbers = #tpu.dot_dimension_numbers<[1], [0], [0], [1], [0, 0, 1, 1], [], []>} : vector<7x32xbf16>, vector<32x32xbf16>, vector<7x32xf32> -> vector<7x32xf32>
    %40 = arith.addf %36, %39 : vector<7x32xf32>
    %41 = vector.extract_strided_slice %5 {offsets = [0, 32], sizes = [7, 32], strides = [1, 1]} : vector<7x288xbf16> to vector<7x32xbf16>
    %42 = vector.extract_strided_slice %6 {offsets = [224, 0], sizes = [32, 32], strides = [1, 1]} : vector<288x32xbf16> to vector<32x32xbf16>
    %cst_21 = arith.constant dense<0.000000e+00> : vector<7x32xf32>
    %43 = tpu.matmul %41, %42, %cst_21 {dimension_numbers = #tpu.dot_dimension_numbers<[1], [0], [0], [1], [0, 0, 1, 1], [], []>} : vector<7x32xbf16>, vector<32x32xbf16>, vector<7x32xf32> -> vector<7x32xf32>
    %44 = arith.addf %40, %43 : vector<7x32xf32>
    %45 = vector.extract_strided_slice %5 {offsets = [0, 64], sizes = [7, 32], strides = [1, 1]} : vector<7x288xbf16> to vector<7x32xbf16>
    %46 = vector.extract_strided_slice %6 {offsets = [256, 0], sizes = [32, 32], strides = [1, 1]} : vector<288x32xbf16> to vector<32x32xbf16>
    %cst_22 = arith.constant dense<0.000000e+00> : vector<7x32xf32>
    %47 = tpu.matmul %45, %46, %cst_22 {dimension_numbers = #tpu.dot_dimension_numbers<[1], [0], [0], [1], [0, 0, 1, 1], [], []>} : vector<7x32xbf16>, vector<32x32xbf16>, vector<7x32xf32> -> vector<7x32xf32>
    %48 = arith.addf %44, %47 : vector<7x32xf32>
    %cst_23 = arith.constant 0.000000e+00 : f32
    %49 = vector.broadcast %cst_23 : f32 to vector<7x32xf32>
    %50 = arith.maximumf %48, %49 : vector<7x32xf32>
    %51 = arith.truncf %50 : vector<7x32xf32> to vector<7x32xbf16>
    %52 = vector.extract_strided_slice %7 {offsets = [0, 0], sizes = [32, 32], strides = [1, 1]} : vector<128x32xbf16> to vector<32x32xbf16>
    %cst_24 = arith.constant dense<0.000000e+00> : vector<7x32xf32>
    %53 = tpu.matmul %51, %52, %cst_24 {dimension_numbers = #tpu.dot_dimension_numbers<[1], [0], [0], [1], [0, 0, 1, 1], [], []>} : vector<7x32xbf16>, vector<32x32xbf16>, vector<7x32xf32> -> vector<7x32xf32>
    %54 = arith.addf %12, %53 : vector<7x32xf32>
    %55 = vector.extract_strided_slice %1 {offsets = [0, 64], sizes = [7, 32], strides = [1, 1]} : vector<7x288xbf16> to vector<7x32xbf16>
    %56 = vector.extract_strided_slice %6 {offsets = [0, 0], sizes = [32, 32], strides = [1, 1]} : vector<288x32xbf16> to vector<32x32xbf16>
    %cst_25 = arith.constant dense<0.000000e+00> : vector<7x32xf32>
    %57 = tpu.matmul %55, %56, %cst_25 {dimension_numbers = #tpu.dot_dimension_numbers<[1], [0], [0], [1], [0, 0, 1, 1], [], []>} : vector<7x32xbf16>, vector<32x32xbf16>, vector<7x32xf32> -> vector<7x32xf32>
    %58 = arith.addf %11, %57 : vector<7x32xf32>
    %59 = vector.extract_strided_slice %1 {offsets = [0, 96], sizes = [7, 32], strides = [1, 1]} : vector<7x288xbf16> to vector<7x32xbf16>
    %60 = vector.extract_strided_slice %6 {offsets = [32, 0], sizes = [32, 32], strides = [1, 1]} : vector<288x32xbf16> to vector<32x32xbf16>
    %cst_26 = arith.constant dense<0.000000e+00> : vector<7x32xf32>
    %61 = tpu.matmul %59, %60, %cst_26 {dimension_numbers = #tpu.dot_dimension_numbers<[1], [0], [0], [1], [0, 0, 1, 1], [], []>} : vector<7x32xbf16>, vector<32x32xbf16>, vector<7x32xf32> -> vector<7x32xf32>
    %62 = arith.addf %58, %61 : vector<7x32xf32>
    %63 = vector.extract_strided_slice %1 {offsets = [0, 128], sizes = [7, 32], strides = [1, 1]} : vector<7x288xbf16> to vector<7x32xbf16>
    %64 = vector.extract_strided_slice %6 {offsets = [64, 0], sizes = [32, 32], strides = [1, 1]} : vector<288x32xbf16> to vector<32x32xbf16>
    %cst_27 = arith.constant dense<0.000000e+00> : vector<7x32xf32>
    %65 = tpu.matmul %63, %64, %cst_27 {dimension_numbers = #tpu.dot_dimension_numbers<[1], [0], [0], [1], [0, 0, 1, 1], [], []>} : vector<7x32xbf16>, vector<32x32xbf16>, vector<7x32xf32> -> vector<7x32xf32>
    %66 = arith.addf %62, %65 : vector<7x32xf32>
    %67 = vector.extract_strided_slice %3 {offsets = [0, 64], sizes = [7, 32], strides = [1, 1]} : vector<7x288xbf16> to vector<7x32xbf16>
    %68 = vector.extract_strided_slice %6 {offsets = [96, 0], sizes = [32, 32], strides = [1, 1]} : vector<288x32xbf16> to vector<32x32xbf16>
    %cst_28 = arith.constant dense<0.000000e+00> : vector<7x32xf32>
    %69 = tpu.matmul %67, %68, %cst_28 {dimension_numbers = #tpu.dot_dimension_numbers<[1], [0], [0], [1], [0, 0, 1, 1], [], []>} : vector<7x32xbf16>, vector<32x32xbf16>, vector<7x32xf32> -> vector<7x32xf32>
    %70 = arith.addf %66, %69 : vector<7x32xf32>
    %71 = vector.extract_strided_slice %3 {offsets = [0, 96], sizes = [7, 32], strides = [1, 1]} : vector<7x288xbf16> to vector<7x32xbf16>
    %72 = vector.extract_strided_slice %6 {offsets = [128, 0], sizes = [32, 32], strides = [1, 1]} : vector<288x32xbf16> to vector<32x32xbf16>
    %cst_29 = arith.constant dense<0.000000e+00> : vector<7x32xf32>
    %73 = tpu.matmul %71, %72, %cst_29 {dimension_numbers = #tpu.dot_dimension_numbers<[1], [0], [0], [1], [0, 0, 1, 1], [], []>} : vector<7x32xbf16>, vector<32x32xbf16>, vector<7x32xf32> -> vector<7x32xf32>
    %74 = arith.addf %70, %73 : vector<7x32xf32>
    %75 = vector.extract_strided_slice %3 {offsets = [0, 128], sizes = [7, 32], strides = [1, 1]} : vector<7x288xbf16> to vector<7x32xbf16>
    %76 = vector.extract_strided_slice %6 {offsets = [160, 0], sizes = [32, 32], strides = [1, 1]} : vector<288x32xbf16> to vector<32x32xbf16>
    %cst_30 = arith.constant dense<0.000000e+00> : vector<7x32xf32>
    %77 = tpu.matmul %75, %76, %cst_30 {dimension_numbers = #tpu.dot_dimension_numbers<[1], [0], [0], [1], [0, 0, 1, 1], [], []>} : vector<7x32xbf16>, vector<32x32xbf16>, vector<7x32xf32> -> vector<7x32xf32>
    %78 = arith.addf %74, %77 : vector<7x32xf32>
    %79 = vector.extract_strided_slice %5 {offsets = [0, 64], sizes = [7, 32], strides = [1, 1]} : vector<7x288xbf16> to vector<7x32xbf16>
    %80 = vector.extract_strided_slice %6 {offsets = [192, 0], sizes = [32, 32], strides = [1, 1]} : vector<288x32xbf16> to vector<32x32xbf16>
    %cst_31 = arith.constant dense<0.000000e+00> : vector<7x32xf32>
    %81 = tpu.matmul %79, %80, %cst_31 {dimension_numbers = #tpu.dot_dimension_numbers<[1], [0], [0], [1], [0, 0, 1, 1], [], []>} : vector<7x32xbf16>, vector<32x32xbf16>, vector<7x32xf32> -> vector<7x32xf32>
    %82 = arith.addf %78, %81 : vector<7x32xf32>
    %83 = vector.extract_strided_slice %5 {offsets = [0, 96], sizes = [7, 32], strides = [1, 1]} : vector<7x288xbf16> to vector<7x32xbf16>
    %84 = vector.extract_strided_slice %6 {offsets = [224, 0], sizes = [32, 32], strides = [1, 1]} : vector<288x32xbf16> to vector<32x32xbf16>
    %cst_32 = arith.constant dense<0.000000e+00> : vector<7x32xf32>
    %85 = tpu.matmul %83, %84, %cst_32 {dimension_numbers = #tpu.dot_dimension_numbers<[1], [0], [0], [1], [0, 0, 1, 1], [], []>} : vector<7x32xbf16>, vector<32x32xbf16>, vector<7x32xf32> -> vector<7x32xf32>
    %86 = arith.addf %82, %85 : vector<7x32xf32>
    %87 = vector.extract_strided_slice %5 {offsets = [0, 128], sizes = [7, 32], strides = [1, 1]} : vector<7x288xbf16> to vector<7x32xbf16>
    %88 = vector.extract_strided_slice %6 {offsets = [256, 0], sizes = [32, 32], strides = [1, 1]} : vector<288x32xbf16> to vector<32x32xbf16>
    %cst_33 = arith.constant dense<0.000000e+00> : vector<7x32xf32>
    %89 = tpu.matmul %87, %88, %cst_33 {dimension_numbers = #tpu.dot_dimension_numbers<[1], [0], [0], [1], [0, 0, 1, 1], [], []>} : vector<7x32xbf16>, vector<32x32xbf16>, vector<7x32xf32> -> vector<7x32xf32>
    %90 = arith.addf %86, %89 : vector<7x32xf32>
    %cst_34 = arith.constant 0.000000e+00 : f32
    %91 = vector.broadcast %cst_34 : f32 to vector<7x32xf32>
    %92 = arith.maximumf %90, %91 : vector<7x32xf32>
    %93 = arith.truncf %92 : vector<7x32xf32> to vector<7x32xbf16>
    %94 = vector.extract_strided_slice %7 {offsets = [32, 0], sizes = [32, 32], strides = [1, 1]} : vector<128x32xbf16> to vector<32x32xbf16>
    %cst_35 = arith.constant dense<0.000000e+00> : vector<7x32xf32>
    %95 = tpu.matmul %93, %94, %cst_35 {dimension_numbers = #tpu.dot_dimension_numbers<[1], [0], [0], [1], [0, 0, 1, 1], [], []>} : vector<7x32xbf16>, vector<32x32xbf16>, vector<7x32xf32> -> vector<7x32xf32>
    %96 = arith.addf %54, %95 : vector<7x32xf32>
    %97 = vector.extract_strided_slice %1 {offsets = [0, 128], sizes = [7, 32], strides = [1, 1]} : vector<7x288xbf16> to vector<7x32xbf16>
    %98 = vector.extract_strided_slice %6 {offsets = [0, 0], sizes = [32, 32], strides = [1, 1]} : vector<288x32xbf16> to vector<32x32xbf16>
    %cst_36 = arith.constant dense<0.000000e+00> : vector<7x32xf32>
    %99 = tpu.matmul %97, %98, %cst_36 {dimension_numbers = #tpu.dot_dimension_numbers<[1], [0], [0], [1], [0, 0, 1, 1], [], []>} : vector<7x32xbf16>, vector<32x32xbf16>, vector<7x32xf32> -> vector<7x32xf32>
    %100 = arith.addf %11, %99 : vector<7x32xf32>
    %101 = vector.extract_strided_slice %1 {offsets = [0, 160], sizes = [7, 32], strides = [1, 1]} : vector<7x288xbf16> to vector<7x32xbf16>
    %102 = vector.extract_strided_slice %6 {offsets = [32, 0], sizes = [32, 32], strides = [1, 1]} : vector<288x32xbf16> to vector<32x32xbf16>
    %cst_37 = arith.constant dense<0.000000e+00> : vector<7x32xf32>
    %103 = tpu.matmul %101, %102, %cst_37 {dimension_numbers = #tpu.dot_dimension_numbers<[1], [0], [0], [1], [0, 0, 1, 1], [], []>} : vector<7x32xbf16>, vector<32x32xbf16>, vector<7x32xf32> -> vector<7x32xf32>
    %104 = arith.addf %100, %103 : vector<7x32xf32>
    %105 = vector.extract_strided_slice %1 {offsets = [0, 192], sizes = [7, 32], strides = [1, 1]} : vector<7x288xbf16> to vector<7x32xbf16>
    %106 = vector.extract_strided_slice %6 {offsets = [64, 0], sizes = [32, 32], strides = [1, 1]} : vector<288x32xbf16> to vector<32x32xbf16>
    %cst_38 = arith.constant dense<0.000000e+00> : vector<7x32xf32>
    %107 = tpu.matmul %105, %106, %cst_38 {dimension_numbers = #tpu.dot_dimension_numbers<[1], [0], [0], [1], [0, 0, 1, 1], [], []>} : vector<7x32xbf16>, vector<32x32xbf16>, vector<7x32xf32> -> vector<7x32xf32>
    %108 = arith.addf %104, %107 : vector<7x32xf32>
    %109 = vector.extract_strided_slice %3 {offsets = [0, 128], sizes = [7, 32], strides = [1, 1]} : vector<7x288xbf16> to vector<7x32xbf16>
    %110 = vector.extract_strided_slice %6 {offsets = [96, 0], sizes = [32, 32], strides = [1, 1]} : vector<288x32xbf16> to vector<32x32xbf16>
    %cst_39 = arith.constant dense<0.000000e+00> : vector<7x32xf32>
    %111 = tpu.matmul %109, %110, %cst_39 {dimension_numbers = #tpu.dot_dimension_numbers<[1], [0], [0], [1], [0, 0, 1, 1], [], []>} : vector<7x32xbf16>, vector<32x32xbf16>, vector<7x32xf32> -> vector<7x32xf32>
    %112 = arith.addf %108, %111 : vector<7x32xf32>
    %113 = vector.extract_strided_slice %3 {offsets = [0, 160], sizes = [7, 32], strides = [1, 1]} : vector<7x288xbf16> to vector<7x32xbf16>
    %114 = vector.extract_strided_slice %6 {offsets = [128, 0], sizes = [32, 32], strides = [1, 1]} : vector<288x32xbf16> to vector<32x32xbf16>
    %cst_40 = arith.constant dense<0.000000e+00> : vector<7x32xf32>
    %115 = tpu.matmul %113, %114, %cst_40 {dimension_numbers = #tpu.dot_dimension_numbers<[1], [0], [0], [1], [0, 0, 1, 1], [], []>} : vector<7x32xbf16>, vector<32x32xbf16>, vector<7x32xf32> -> vector<7x32xf32>
    %116 = arith.addf %112, %115 : vector<7x32xf32>
    %117 = vector.extract_strided_slice %3 {offsets = [0, 192], sizes = [7, 32], strides = [1, 1]} : vector<7x288xbf16> to vector<7x32xbf16>
    %118 = vector.extract_strided_slice %6 {offsets = [160, 0], sizes = [32, 32], strides = [1, 1]} : vector<288x32xbf16> to vector<32x32xbf16>
    %cst_41 = arith.constant dense<0.000000e+00> : vector<7x32xf32>
    %119 = tpu.matmul %117, %118, %cst_41 {dimension_numbers = #tpu.dot_dimension_numbers<[1], [0], [0], [1], [0, 0, 1, 1], [], []>} : vector<7x32xbf16>, vector<32x32xbf16>, vector<7x32xf32> -> vector<7x32xf32>
    %120 = arith.addf %116, %119 : vector<7x32xf32>
    %121 = vector.extract_strided_slice %5 {offsets = [0, 128], sizes = [7, 32], strides = [1, 1]} : vector<7x288xbf16> to vector<7x32xbf16>
    %122 = vector.extract_strided_slice %6 {offsets = [192, 0], sizes = [32, 32], strides = [1, 1]} : vector<288x32xbf16> to vector<32x32xbf16>
    %cst_42 = arith.constant dense<0.000000e+00> : vector<7x32xf32>
    %123 = tpu.matmul %121, %122, %cst_42 {dimension_numbers = #tpu.dot_dimension_numbers<[1], [0], [0], [1], [0, 0, 1, 1], [], []>} : vector<7x32xbf16>, vector<32x32xbf16>, vector<7x32xf32> -> vector<7x32xf32>
    %124 = arith.addf %120, %123 : vector<7x32xf32>
    %125 = vector.extract_strided_slice %5 {offsets = [0, 160], sizes = [7, 32], strides = [1, 1]} : vector<7x288xbf16> to vector<7x32xbf16>
    %126 = vector.extract_strided_slice %6 {offsets = [224, 0], sizes = [32, 32], strides = [1, 1]} : vector<288x32xbf16> to vector<32x32xbf16>
    %cst_43 = arith.constant dense<0.000000e+00> : vector<7x32xf32>
    %127 = tpu.matmul %125, %126, %cst_43 {dimension_numbers = #tpu.dot_dimension_numbers<[1], [0], [0], [1], [0, 0, 1, 1], [], []>} : vector<7x32xbf16>, vector<32x32xbf16>, vector<7x32xf32> -> vector<7x32xf32>
    %128 = arith.addf %124, %127 : vector<7x32xf32>
    %129 = vector.extract_strided_slice %5 {offsets = [0, 192], sizes = [7, 32], strides = [1, 1]} : vector<7x288xbf16> to vector<7x32xbf16>
    %130 = vector.extract_strided_slice %6 {offsets = [256, 0], sizes = [32, 32], strides = [1, 1]} : vector<288x32xbf16> to vector<32x32xbf16>
    %cst_44 = arith.constant dense<0.000000e+00> : vector<7x32xf32>
    %131 = tpu.matmul %129, %130, %cst_44 {dimension_numbers = #tpu.dot_dimension_numbers<[1], [0], [0], [1], [0, 0, 1, 1], [], []>} : vector<7x32xbf16>, vector<32x32xbf16>, vector<7x32xf32> -> vector<7x32xf32>
    %132 = arith.addf %128, %131 : vector<7x32xf32>
    %cst_45 = arith.constant 0.000000e+00 : f32
    %133 = vector.broadcast %cst_45 : f32 to vector<7x32xf32>
    %134 = arith.maximumf %132, %133 : vector<7x32xf32>
    %135 = arith.truncf %134 : vector<7x32xf32> to vector<7x32xbf16>
    %136 = vector.extract_strided_slice %7 {offsets = [64, 0], sizes = [32, 32], strides = [1, 1]} : vector<128x32xbf16> to vector<32x32xbf16>
    %cst_46 = arith.constant dense<0.000000e+00> : vector<7x32xf32>
    %137 = tpu.matmul %135, %136, %cst_46 {dimension_numbers = #tpu.dot_dimension_numbers<[1], [0], [0], [1], [0, 0, 1, 1], [], []>} : vector<7x32xbf16>, vector<32x32xbf16>, vector<7x32xf32> -> vector<7x32xf32>
    %138 = arith.addf %96, %137 : vector<7x32xf32>
    %139 = vector.extract_strided_slice %1 {offsets = [0, 192], sizes = [7, 32], strides = [1, 1]} : vector<7x288xbf16> to vector<7x32xbf16>
    %140 = vector.extract_strided_slice %6 {offsets = [0, 0], sizes = [32, 32], strides = [1, 1]} : vector<288x32xbf16> to vector<32x32xbf16>
    %cst_47 = arith.constant dense<0.000000e+00> : vector<7x32xf32>
    %141 = tpu.matmul %139, %140, %cst_47 {dimension_numbers = #tpu.dot_dimension_numbers<[1], [0], [0], [1], [0, 0, 1, 1], [], []>} : vector<7x32xbf16>, vector<32x32xbf16>, vector<7x32xf32> -> vector<7x32xf32>
    %142 = arith.addf %11, %141 : vector<7x32xf32>
    %143 = vector.extract_strided_slice %1 {offsets = [0, 224], sizes = [7, 32], strides = [1, 1]} : vector<7x288xbf16> to vector<7x32xbf16>
    %144 = vector.extract_strided_slice %6 {offsets = [32, 0], sizes = [32, 32], strides = [1, 1]} : vector<288x32xbf16> to vector<32x32xbf16>
    %cst_48 = arith.constant dense<0.000000e+00> : vector<7x32xf32>
    %145 = tpu.matmul %143, %144, %cst_48 {dimension_numbers = #tpu.dot_dimension_numbers<[1], [0], [0], [1], [0, 0, 1, 1], [], []>} : vector<7x32xbf16>, vector<32x32xbf16>, vector<7x32xf32> -> vector<7x32xf32>
    %146 = arith.addf %142, %145 : vector<7x32xf32>
    %147 = vector.extract_strided_slice %1 {offsets = [0, 256], sizes = [7, 32], strides = [1, 1]} : vector<7x288xbf16> to vector<7x32xbf16>
    %148 = vector.extract_strided_slice %6 {offsets = [64, 0], sizes = [32, 32], strides = [1, 1]} : vector<288x32xbf16> to vector<32x32xbf16>
    %cst_49 = arith.constant dense<0.000000e+00> : vector<7x32xf32>
    %149 = tpu.matmul %147, %148, %cst_49 {dimension_numbers = #tpu.dot_dimension_numbers<[1], [0], [0], [1], [0, 0, 1, 1], [], []>} : vector<7x32xbf16>, vector<32x32xbf16>, vector<7x32xf32> -> vector<7x32xf32>
    %150 = arith.addf %146, %149 : vector<7x32xf32>
    %151 = vector.extract_strided_slice %3 {offsets = [0, 192], sizes = [7, 32], strides = [1, 1]} : vector<7x288xbf16> to vector<7x32xbf16>
    %152 = vector.extract_strided_slice %6 {offsets = [96, 0], sizes = [32, 32], strides = [1, 1]} : vector<288x32xbf16> to vector<32x32xbf16>
    %cst_50 = arith.constant dense<0.000000e+00> : vector<7x32xf32>
    %153 = tpu.matmul %151, %152, %cst_50 {dimension_numbers = #tpu.dot_dimension_numbers<[1], [0], [0], [1], [0, 0, 1, 1], [], []>} : vector<7x32xbf16>, vector<32x32xbf16>, vector<7x32xf32> -> vector<7x32xf32>
    %154 = arith.addf %150, %153 : vector<7x32xf32>
    %155 = vector.extract_strided_slice %3 {offsets = [0, 224], sizes = [7, 32], strides = [1, 1]} : vector<7x288xbf16> to vector<7x32xbf16>
    %156 = vector.extract_strided_slice %6 {offsets = [128, 0], sizes = [32, 32], strides = [1, 1]} : vector<288x32xbf16> to vector<32x32xbf16>
    %cst_51 = arith.constant dense<0.000000e+00> : vector<7x32xf32>
    %157 = tpu.matmul %155, %156, %cst_51 {dimension_numbers = #tpu.dot_dimension_numbers<[1], [0], [0], [1], [0, 0, 1, 1], [], []>} : vector<7x32xbf16>, vector<32x32xbf16>, vector<7x32xf32> -> vector<7x32xf32>
    %158 = arith.addf %154, %157 : vector<7x32xf32>
    %159 = vector.extract_strided_slice %3 {offsets = [0, 256], sizes = [7, 32], strides = [1, 1]} : vector<7x288xbf16> to vector<7x32xbf16>
    %160 = vector.extract_strided_slice %6 {offsets = [160, 0], sizes = [32, 32], strides = [1, 1]} : vector<288x32xbf16> to vector<32x32xbf16>
    %cst_52 = arith.constant dense<0.000000e+00> : vector<7x32xf32>
    %161 = tpu.matmul %159, %160, %cst_52 {dimension_numbers = #tpu.dot_dimension_numbers<[1], [0], [0], [1], [0, 0, 1, 1], [], []>} : vector<7x32xbf16>, vector<32x32xbf16>, vector<7x32xf32> -> vector<7x32xf32>
    %162 = arith.addf %158, %161 : vector<7x32xf32>
    %163 = vector.extract_strided_slice %5 {offsets = [0, 192], sizes = [7, 32], strides = [1, 1]} : vector<7x288xbf16> to vector<7x32xbf16>
    %164 = vector.extract_strided_slice %6 {offsets = [192, 0], sizes = [32, 32], strides = [1, 1]} : vector<288x32xbf16> to vector<32x32xbf16>
    %cst_53 = arith.constant dense<0.000000e+00> : vector<7x32xf32>
    %165 = tpu.matmul %163, %164, %cst_53 {dimension_numbers = #tpu.dot_dimension_numbers<[1], [0], [0], [1], [0, 0, 1, 1], [], []>} : vector<7x32xbf16>, vector<32x32xbf16>, vector<7x32xf32> -> vector<7x32xf32>
    %166 = arith.addf %162, %165 : vector<7x32xf32>
    %167 = vector.extract_strided_slice %5 {offsets = [0, 224], sizes = [7, 32], strides = [1, 1]} : vector<7x288xbf16> to vector<7x32xbf16>
    %168 = vector.extract_strided_slice %6 {offsets = [224, 0], sizes = [32, 32], strides = [1, 1]} : vector<288x32xbf16> to vector<32x32xbf16>
    %cst_54 = arith.constant dense<0.000000e+00> : vector<7x32xf32>
    %169 = tpu.matmul %167, %168, %cst_54 {dimension_numbers = #tpu.dot_dimension_numbers<[1], [0], [0], [1], [0, 0, 1, 1], [], []>} : vector<7x32xbf16>, vector<32x32xbf16>, vector<7x32xf32> -> vector<7x32xf32>
    %170 = arith.addf %166, %169 : vector<7x32xf32>
    %171 = vector.extract_strided_slice %5 {offsets = [0, 256], sizes = [7, 32], strides = [1, 1]} : vector<7x288xbf16> to vector<7x32xbf16>
    %172 = vector.extract_strided_slice %6 {offsets = [256, 0], sizes = [32, 32], strides = [1, 1]} : vector<288x32xbf16> to vector<32x32xbf16>
    %cst_55 = arith.constant dense<0.000000e+00> : vector<7x32xf32>
    %173 = tpu.matmul %171, %172, %cst_55 {dimension_numbers = #tpu.dot_dimension_numbers<[1], [0], [0], [1], [0, 0, 1, 1], [], []>} : vector<7x32xbf16>, vector<32x32xbf16>, vector<7x32xf32> -> vector<7x32xf32>
    %174 = arith.addf %170, %173 : vector<7x32xf32>
    %cst_56 = arith.constant 0.000000e+00 : f32
    %175 = vector.broadcast %cst_56 : f32 to vector<7x32xf32>
    %176 = arith.maximumf %174, %175 : vector<7x32xf32>
    %177 = arith.truncf %176 : vector<7x32xf32> to vector<7x32xbf16>
    %178 = vector.extract_strided_slice %7 {offsets = [96, 0], sizes = [32, 32], strides = [1, 1]} : vector<128x32xbf16> to vector<32x32xbf16>
    %cst_57 = arith.constant dense<0.000000e+00> : vector<7x32xf32>
    %179 = tpu.matmul %177, %178, %cst_57 {dimension_numbers = #tpu.dot_dimension_numbers<[1], [0], [0], [1], [0, 0, 1, 1], [], []>} : vector<7x32xbf16>, vector<32x32xbf16>, vector<7x32xf32> -> vector<7x32xf32>
    %180 = arith.addf %138, %179 : vector<7x32xf32>
    %c0_58 = arith.constant 0 : index
    %c0_59 = arith.constant 0 : index
    %181 = vector.load %arg6[%c0_58, %c0_59] : memref<1x32xf32, #tpu.memory_space<vmem>>, vector<1x32xf32>
    %182 = vector.broadcast %181 : vector<1x32xf32> to vector<7x32xf32>
    %183 = arith.addf %180, %182 : vector<7x32xf32>
    %cst_60 = arith.constant 5.65685415 : f32
    %184 = vector.broadcast %cst_60 : f32 to vector<7x32xf32>
    %185 = arith.mulf %183, %184 : vector<7x32xf32>
    %c0_61 = arith.constant 0 : index
    %c0_62 = arith.constant 0 : index
    %186 = vector.load %arg7[%c0_61, %c0_62] : memref<7x32xf32, #tpu.memory_space<vmem>>, vector<7x32xf32>
    %187 = arith.addf %185, %186 : vector<7x32xf32>
    %c0_63 = arith.constant 0 : index
    %c0_64 = arith.constant 0 : index
    %c0_65 = arith.constant 0 : index
    %188 = vector.load %arg8[%c0_63, %c0_64, %c0_65] : memref<1x7x32xf32, #tpu.memory_space<vmem>>, vector<1x7x32xf32>
    %189 = vector.shape_cast %188 : vector<1x7x32xf32> to vector<7x32xf32>
    %190 = vector.shape_cast %187 : vector<7x32xf32> to vector<1x7x32xf32>
    tpu.vector_store %arg8[%c0_63, %c0_64, %c0_65], %190 {strides = array<i32>} : memref<1x7x32xf32, #tpu.memory_space<vmem>>, vector<1x7x32xf32>,
    return
  }
  func.func @transform_0(%arg0: i32) -> (i32, i32, i32) {
    %c0_i32 = arith.constant 0 : i32
    %c0_i32_0 = arith.constant 0 : i32
    %c0_i32_1 = arith.constant 0 : i32
    return %arg0, %c0_i32, %c0_i32_0 : i32, i32, i32
  }
  func.func @transform_1(%arg0: i32) -> (i32, i32, i32) {
    %c0_i32 = arith.constant 0 : i32
    %c0_i32_0 = arith.constant 0 : i32
    %c0_i32_1 = arith.constant 0 : i32
    return %arg0, %c0_i32, %c0_i32_0 : i32, i32, i32
  }
  func.func @transform_2(%arg0: i32) -> (i32, i32) {
    %c0_i32 = arith.constant 0 : i32
    %c0_i32_0 = arith.constant 0 : i32
    %c0_i32_1 = arith.constant 0 : i32
    return %c0_i32, %c0_i32_0 : i32, i32
  }
  func.func @transform_3(%arg0: i32) -> (i32, i32) {
    %c0_i32 = arith.constant 0 : i32
    %c0_i32_0 = arith.constant 0 : i32
    %c0_i32_1 = arith.constant 0 : i32
    return %c0_i32, %c0_i32_0 : i32, i32
  }
  func.func @transform_4(%arg0: i32) -> (i32, i32) {
    %c0_i32 = arith.constant 0 : i32
    %c0_i32_0 = arith.constant 0 : i32
    %c0_i32_1 = arith.constant 0 : i32
    return %c0_i32, %c0_i32_0 : i32, i32
  }
  func.func @transform_5(%arg0: i32) -> (i32, i32) {
    %c0_i32 = arith.constant 0 : i32
    %c0_i32_0 = arith.constant 0 : i32
    %c0_i32_1 = arith.constant 0 : i32
    return %c0_i32, %c0_i32_0 : i32, i32
  }
  func.func @transform_6(%arg0: i32) -> (i32, i32) {
    %c0_i32 = arith.constant 0 : i32
    %c0_i32_0 = arith.constant 0 : i32
    %c0_i32_1 = arith.constant 0 : i32
    return %c0_i32, %c0_i32_0 : i32, i32
  }
  func.func @transform_7(%arg0: i32) -> (i32, i32, i32) {
    %c0_i32 = arith.constant 0 : i32
    %c0_i32_0 = arith.constant 0 : i32
    %c0_i32_1 = arith.constant 0 : i32
    return %arg0, %c0_i32, %c0_i32_0 : i32, i32, i32
  }
}

module attributes {stable_mosaic.version = 11 : i64} {
  func.func @_mha_kernel(%arg0: i32, %arg1: memref<1x7x32xf32, #tpu.memory_space<vmem>>, %arg2: memref<1x32xf32, #tpu.memory_space<vmem>>, %arg3: memref<1x32xf32, #tpu.memory_space<vmem>>, %arg4: memref<32x96xbf16, #tpu.memory_space<vmem>>, %arg5: memref<1x96xf32, #tpu.memory_space<vmem>>, %arg6: memref<32x32xbf16, #tpu.memory_space<vmem>>, %arg7: memref<1x32xf32, #tpu.memory_space<vmem>>, %arg8: memref<1x1x7xf32, #tpu.memory_space<vmem>>, %arg9: memref<1x1x7xf32, #tpu.memory_space<vmem>>, %arg10: memref<1x7x32xf32, #tpu.memory_space<vmem>>) attributes {dimension_semantics = [#tpu.dimension_semantics<parallel>], iteration_bounds = array<i64: 2>, scalar_prefetch = 0 : i64, scratch_operands = 0 : i64, tpu.core_type = #tpu.core_type<tc>, window_params = [{transform_indices = @transform_0, window_bounds = array<i64: 1, 7, 32>}, {pipeline_mode = #tpu.pipeline_mode<synchronous>, transform_indices = @transform_1, window_bounds = array<i64: 1, 32>}, {pipeline_mode = #tpu.pipeline_mode<synchronous>, transform_indices = @transform_2, window_bounds = array<i64: 1, 32>}, {pipeline_mode = #tpu.pipeline_mode<synchronous>, transform_indices = @transform_3, window_bounds = array<i64: 32, 96>}, {pipeline_mode = #tpu.pipeline_mode<synchronous>, transform_indices = @transform_4, window_bounds = array<i64: 1, 96>}, {pipeline_mode = #tpu.pipeline_mode<synchronous>, transform_indices = @transform_5, window_bounds = array<i64: 32, 32>}, {pipeline_mode = #tpu.pipeline_mode<synchronous>, transform_indices = @transform_6, window_bounds = array<i64: 1, 32>}, {transform_indices = @transform_7, window_bounds = array<i64: 1, 1, 7>}, {transform_indices = @transform_8, window_bounds = array<i64: 1, 1, 7>}, {transform_indices = @transform_9, window_bounds = array<i64: 1, 7, 32>}]} {
    %c0 = arith.constant 0 : index
    %c0_0 = arith.constant 0 : index
    %c0_1 = arith.constant 0 : index
    %0 = vector.load %arg1[%c0, %c0_0, %c0_1] : memref<1x7x32xf32, #tpu.memory_space<vmem>>, vector<1x7x32xf32>
    %1 = vector.shape_cast %0 : vector<1x7x32xf32> to vector<7x32xf32>
    %c0_2 = arith.constant 0 : index
    %c0_3 = arith.constant 0 : index
    %2 = vector.load %arg2[%c0_2, %c0_3] : memref<1x32xf32, #tpu.memory_space<vmem>>, vector<1x32xf32>
    %c0_4 = arith.constant 0 : index
    %c0_5 = arith.constant 0 : index
    %3 = vector.load %arg3[%c0_4, %c0_5] : memref<1x32xf32, #tpu.memory_space<vmem>>, vector<1x32xf32>
    %cst = arith.constant dense<0.000000e+00> : vector<7xf32>
    %4 = vector.multi_reduction <add>, %1, %cst [1] : vector<7x32xf32> to vector<7xf32>
    %5 = vector.shape_cast %4 : vector<7xf32> to vector<7x1xf32>
    %cst_6 = arith.constant 3.200000e+01 : f32
    %6 = vector.broadcast %cst_6 : f32 to vector<7x1xf32>
    %7 = arith.divf %5, %6 : vector<7x1xf32>
    %8 = vector.broadcast %7 : vector<7x1xf32> to vector<7x32xf32>
    %9 = arith.subf %1, %8 : vector<7x32xf32>
    %10 = arith.mulf %9, %9 : vector<7x32xf32>
    %cst_7 = arith.constant dense<0.000000e+00> : vector<7xf32>
    %11 = vector.multi_reduction <add>, %10, %cst_7 [1] : vector<7x32xf32> to vector<7xf32>
    %12 = vector.shape_cast %11 : vector<7xf32> to vector<7x1xf32>
    %cst_8 = arith.constant 3.200000e+01 : f32
    %13 = vector.broadcast %cst_8 : f32 to vector<7x1xf32>
    %14 = arith.divf %12, %13 : vector<7x1xf32>
    %cst_9 = arith.constant 9.99999996E-13 : f32
    %15 = vector.broadcast %cst_9 : f32 to vector<7x1xf32>
    %16 = arith.addf %14, %15 : vector<7x1xf32>
    %17 = math.rsqrt %16 : vector<7x1xf32>
    %18 = vector.broadcast %17 : vector<7x1xf32> to vector<7x32xf32>
    %19 = arith.mulf %9, %18 : vector<7x32xf32>
    %20 = vector.broadcast %2 : vector<1x32xf32> to vector<7x32xf32>
    %21 = arith.mulf %19, %20 : vector<7x32xf32>
    %22 = vector.broadcast %3 : vector<1x32xf32> to vector<7x32xf32>
    %23 = arith.addf %21, %22 : vector<7x32xf32>
    %24 = arith.truncf %23 : vector<7x32xf32> to vector<7x32xbf16>
    %c0_10 = arith.constant 0 : index
    %c0_11 = arith.constant 0 : index
    %25 = vector.load %arg4[%c0_10, %c0_11] : memref<32x96xbf16, #tpu.memory_space<vmem>>, vector<32x96xbf16>
    %cst_12 = arith.constant dense<0.000000e+00> : vector<7x96xf32>
    %26 = tpu.matmul %24, %25, %cst_12 {dimension_numbers = #tpu.dot_dimension_numbers<[1], [0], [0], [1], [0, 0, 1, 1], [], []>} : vector<7x32xbf16>, vector<32x96xbf16>, vector<7x96xf32> -> vector<7x96xf32>
    %c0_13 = arith.constant 0 : index
    %c0_14 = arith.constant 0 : index
    %27 = vector.load %arg5[%c0_13, %c0_14] : memref<1x96xf32, #tpu.memory_space<vmem>>, vector<1x96xf32>
    %28 = vector.broadcast %27 : vector<1x96xf32> to vector<7x96xf32>
    %29 = arith.addf %26, %28 : vector<7x96xf32>
    %30 = arith.truncf %29 : vector<7x96xf32> to vector<7x96xbf16>
    %c0_15 = arith.constant 0 : index
    %c0_16 = arith.constant 0 : index
    %31 = vector.load %arg6[%c0_15, %c0_16] : memref<32x32xbf16, #tpu.memory_space<vmem>>, vector<32x32xbf16>
    %c0_17 = arith.constant 0 : index
    %c0_18 = arith.constant 0 : index
    %c0_19 = arith.constant 0 : index
    %32 = vector.load %arg8[%c0_17, %c0_18, %c0_19] : memref<1x1x7xf32, #tpu.memory_space<vmem>>, vector<1x1x7xf32>
    %33 = vector.shape_cast %32 : vector<1x1x7xf32> to vector<1x7xf32>
    %c0_20 = arith.constant 0 : index
    %c0_21 = arith.constant 0 : index
    %c0_22 = arith.constant 0 : index
    %34 = vector.load %arg9[%c0_20, %c0_21, %c0_22] : memref<1x1x7xf32, #tpu.memory_space<vmem>>, vector<1x1x7xf32>
    %35 = vector.shape_cast %34 : vector<1x1x7xf32> to vector<1x7xf32>
    %c0_23 = arith.constant 0 : index
    %c0_24 = arith.constant 0 : index
    %36 = vector.load %arg7[%c0_23, %c0_24] : memref<1x32xf32, #tpu.memory_space<vmem>>, vector<1x32xf32>
    %37 = vector.broadcast %36 : vector<1x32xf32> to vector<7x32xf32>
    %38 = arith.addf %1, %37 : vector<7x32xf32>
    %39 = vector.extract_strided_slice %30 {offsets = [0, 0], sizes = [7, 8], strides = [1, 1]} : vector<7x96xbf16> to vector<7x8xbf16>
    %40 = vector.extract_strided_slice %30 {offsets = [0, 32], sizes = [7, 8], strides = [1, 1]} : vector<7x96xbf16> to vector<7x8xbf16>
    %41 = vector.extract_strided_slice %30 {offsets = [0, 64], sizes = [7, 8], strides = [1, 1]} : vector<7x96xbf16> to vector<7x8xbf16>
    %cst_25 = arith.constant dense<0.000000e+00> : vector<7x7xf32>
    %42 = tpu.matmul %39, %40, %cst_25 {dimension_numbers = #tpu.dot_dimension_numbers<[1], [1], [0], [0], [0, 0, 1, 0], [], []>} : vector<7x8xbf16>, vector<7x8xbf16>, vector<7x7xf32> -> vector<7x7xf32>
    %cst_26 = arith.constant 0.353553385 : f32
    %43 = vector.broadcast %cst_26 : f32 to vector<7x7xf32>
    %44 = arith.mulf %42, %43 : vector<7x7xf32>
    %45 = vector.broadcast %33 : vector<1x7xf32> to vector<7x7xf32>
    %46 = arith.addf %44, %45 : vector<7x7xf32>
    %cst_27 = arith.constant dense<0xFF800000> : vector<7xf32>
    %47 = vector.multi_reduction <maximumf>, %46, %cst_27 [1] : vector<7x7xf32> to vector<7xf32>
    %48 = vector.shape_cast %47 : vector<7xf32> to vector<7x1xf32>
    %49 = vector.broadcast %48 : vector<7x1xf32> to vector<7x7xf32>
    %50 = arith.subf %46, %49 : vector<7x7xf32>
    %51 = math.exp %50 : vector<7x7xf32>
    %cst_28 = arith.constant dense<0.000000e+00> : vector<7xf32>
    %52 = vector.multi_reduction <add>, %51, %cst_28 [1] : vector<7x7xf32> to vector<7xf32>
    %53 = vector.shape_cast %52 : vector<7xf32> to vector<7x1xf32>
    %54 = tpu.reciprocal %53 {approx = true} : vector<7x1xf32> -> vector<7x1xf32>
    %55 = vector.broadcast %54 : vector<7x1xf32> to vector<7x7xf32>
    %56 = arith.mulf %51, %55 : vector<7x7xf32>
    %57 = vector.broadcast %35 : vector<1x7xf32> to vector<7x7xf32>
    %58 = arith.mulf %56, %57 : vector<7x7xf32>
    %59 = arith.truncf %58 : vector<7x7xf32> to vector<7x7xbf16>
    %cst_29 = arith.constant dense<0.000000e+00> : vector<7x8xf32>
    %60 = tpu.matmul %59, %41, %cst_29 {dimension_numbers = #tpu.dot_dimension_numbers<[1], [0], [0], [1], [0, 0, 1, 1], [], []>} : vector<7x7xbf16>, vector<7x8xbf16>, vector<7x8xf32> -> vector<7x8xf32>
    %61 = arith.truncf %60 : vector<7x8xf32> to vector<7x8xbf16>
    %62 = vector.extract_strided_slice %31 {offsets = [0, 0], sizes = [8, 32], strides = [1, 1]} : vector<32x32xbf16> to vector<8x32xbf16>
    %cst_30 = arith.constant dense<0.000000e+00> : vector<7x32xf32>
    %63 = tpu.matmul %61, %62, %cst_30 {dimension_numbers = #tpu.dot_dimension_numbers<[1], [0], [0], [1], [0, 0, 1, 1], [], []>} : vector<7x8xbf16>, vector<8x32xbf16>, vector<7x32xf32> -> vector<7x32xf32>
    %64 = arith.addf %38, %63 : vector<7x32xf32>
    %65 = vector.extract_strided_slice %30 {offsets = [0, 8], sizes = [7, 8], strides = [1, 1]} : vector<7x96xbf16> to vector<7x8xbf16>
    %66 = vector.extract_strided_slice %30 {offsets = [0, 40], sizes = [7, 8], strides = [1, 1]} : vector<7x96xbf16> to vector<7x8xbf16>
    %67 = vector.extract_strided_slice %30 {offsets = [0, 72], sizes = [7, 8], strides = [1, 1]} : vector<7x96xbf16> to vector<7x8xbf16>
    %cst_31 = arith.constant dense<0.000000e+00> : vector<7x7xf32>
    %68 = tpu.matmul %65, %66, %cst_31 {dimension_numbers = #tpu.dot_dimension_numbers<[1], [1], [0], [0], [0, 0, 1, 0], [], []>} : vector<7x8xbf16>, vector<7x8xbf16>, vector<7x7xf32> -> vector<7x7xf32>
    %cst_32 = arith.constant 0.353553385 : f32
    %69 = vector.broadcast %cst_32 : f32 to vector<7x7xf32>
    %70 = arith.mulf %68, %69 : vector<7x7xf32>
    %71 = vector.broadcast %33 : vector<1x7xf32> to vector<7x7xf32>
    %72 = arith.addf %70, %71 : vector<7x7xf32>
    %cst_33 = arith.constant dense<0xFF800000> : vector<7xf32>
    %73 = vector.multi_reduction <maximumf>, %72, %cst_33 [1] : vector<7x7xf32> to vector<7xf32>
    %74 = vector.shape_cast %73 : vector<7xf32> to vector<7x1xf32>
    %75 = vector.broadcast %74 : vector<7x1xf32> to vector<7x7xf32>
    %76 = arith.subf %72, %75 : vector<7x7xf32>
    %77 = math.exp %76 : vector<7x7xf32>
    %cst_34 = arith.constant dense<0.000000e+00> : vector<7xf32>
    %78 = vector.multi_reduction <add>, %77, %cst_34 [1] : vector<7x7xf32> to vector<7xf32>
    %79 = vector.shape_cast %78 : vector<7xf32> to vector<7x1xf32>
    %80 = tpu.reciprocal %79 {approx = true} : vector<7x1xf32> -> vector<7x1xf32>
    %81 = vector.broadcast %80 : vector<7x1xf32> to vector<7x7xf32>
    %82 = arith.mulf %77, %81 : vector<7x7xf32>
    %83 = vector.broadcast %35 : vector<1x7xf32> to vector<7x7xf32>
    %84 = arith.mulf %82, %83 : vector<7x7xf32>
    %85 = arith.truncf %84 : vector<7x7xf32> to vector<7x7xbf16>
    %cst_35 = arith.constant dense<0.000000e+00> : vector<7x8xf32>
    %86 = tpu.matmul %85, %67, %cst_35 {dimension_numbers = #tpu.dot_dimension_numbers<[1], [0], [0], [1], [0, 0, 1, 1], [], []>} : vector<7x7xbf16>, vector<7x8xbf16>, vector<7x8xf32> -> vector<7x8xf32>
    %87 = arith.truncf %86 : vector<7x8xf32> to vector<7x8xbf16>
    %88 = vector.extract_strided_slice %31 {offsets = [8, 0], sizes = [8, 32], strides = [1, 1]} : vector<32x32xbf16> to vector<8x32xbf16>
    %cst_36 = arith.constant dense<0.000000e+00> : vector<7x32xf32>
    %89 = tpu.matmul %87, %88, %cst_36 {dimension_numbers = #tpu.dot_dimension_numbers<[1], [0], [0], [1], [0, 0, 1, 1], [], []>} : vector<7x8xbf16>, vector<8x32xbf16>, vector<7x32xf32> -> vector<7x32xf32>
    %90 = arith.addf %64, %89 : vector<7x32xf32>
    %91 = vector.extract_strided_slice %30 {offsets = [0, 16], sizes = [7, 8], strides = [1, 1]} : vector<7x96xbf16> to vector<7x8xbf16>
    %92 = vector.extract_strided_slice %30 {offsets = [0, 48], sizes = [7, 8], strides = [1, 1]} : vector<7x96xbf16> to vector<7x8xbf16>
    %93 = vector.extract_strided_slice %30 {offsets = [0, 80], sizes = [7, 8], strides = [1, 1]} : vector<7x96xbf16> to vector<7x8xbf16>
    %cst_37 = arith.constant dense<0.000000e+00> : vector<7x7xf32>
    %94 = tpu.matmul %91, %92, %cst_37 {dimension_numbers = #tpu.dot_dimension_numbers<[1], [1], [0], [0], [0, 0, 1, 0], [], []>} : vector<7x8xbf16>, vector<7x8xbf16>, vector<7x7xf32> -> vector<7x7xf32>
    %cst_38 = arith.constant 0.353553385 : f32
    %95 = vector.broadcast %cst_38 : f32 to vector<7x7xf32>
    %96 = arith.mulf %94, %95 : vector<7x7xf32>
    %97 = vector.broadcast %33 : vector<1x7xf32> to vector<7x7xf32>
    %98 = arith.addf %96, %97 : vector<7x7xf32>
    %cst_39 = arith.constant dense<0xFF800000> : vector<7xf32>
    %99 = vector.multi_reduction <maximumf>, %98, %cst_39 [1] : vector<7x7xf32> to vector<7xf32>
    %100 = vector.shape_cast %99 : vector<7xf32> to vector<7x1xf32>
    %101 = vector.broadcast %100 : vector<7x1xf32> to vector<7x7xf32>
    %102 = arith.subf %98, %101 : vector<7x7xf32>
    %103 = math.exp %102 : vector<7x7xf32>
    %cst_40 = arith.constant dense<0.000000e+00> : vector<7xf32>
    %104 = vector.multi_reduction <add>, %103, %cst_40 [1] : vector<7x7xf32> to vector<7xf32>
    %105 = vector.shape_cast %104 : vector<7xf32> to vector<7x1xf32>
    %106 = tpu.reciprocal %105 {approx = true} : vector<7x1xf32> -> vector<7x1xf32>
    %107 = vector.broadcast %106 : vector<7x1xf32> to vector<7x7xf32>
    %108 = arith.mulf %103, %107 : vector<7x7xf32>
    %109 = vector.broadcast %35 : vector<1x7xf32> to vector<7x7xf32>
    %110 = arith.mulf %108, %109 : vector<7x7xf32>
    %111 = arith.truncf %110 : vector<7x7xf32> to vector<7x7xbf16>
    %cst_41 = arith.constant dense<0.000000e+00> : vector<7x8xf32>
    %112 = tpu.matmul %111, %93, %cst_41 {dimension_numbers = #tpu.dot_dimension_numbers<[1], [0], [0], [1], [0, 0, 1, 1], [], []>} : vector<7x7xbf16>, vector<7x8xbf16>, vector<7x8xf32> -> vector<7x8xf32>
    %113 = arith.truncf %112 : vector<7x8xf32> to vector<7x8xbf16>
    %114 = vector.extract_strided_slice %31 {offsets = [16, 0], sizes = [8, 32], strides = [1, 1]} : vector<32x32xbf16> to vector<8x32xbf16>
    %cst_42 = arith.constant dense<0.000000e+00> : vector<7x32xf32>
    %115 = tpu.matmul %113, %114, %cst_42 {dimension_numbers = #tpu.dot_dimension_numbers<[1], [0], [0], [1], [0, 0, 1, 1], [], []>} : vector<7x8xbf16>, vector<8x32xbf16>, vector<7x32xf32> -> vector<7x32xf32>
    %116 = arith.addf %90, %115 : vector<7x32xf32>
    %117 = vector.extract_strided_slice %30 {offsets = [0, 24], sizes = [7, 8], strides = [1, 1]} : vector<7x96xbf16> to vector<7x8xbf16>
    %118 = vector.extract_strided_slice %30 {offsets = [0, 56], sizes = [7, 8], strides = [1, 1]} : vector<7x96xbf16> to vector<7x8xbf16>
    %119 = vector.extract_strided_slice %30 {offsets = [0, 88], sizes = [7, 8], strides = [1, 1]} : vector<7x96xbf16> to vector<7x8xbf16>
    %cst_43 = arith.constant dense<0.000000e+00> : vector<7x7xf32>
    %120 = tpu.matmul %117, %118, %cst_43 {dimension_numbers = #tpu.dot_dimension_numbers<[1], [1], [0], [0], [0, 0, 1, 0], [], []>} : vector<7x8xbf16>, vector<7x8xbf16>, vector<7x7xf32> -> vector<7x7xf32>
    %cst_44 = arith.constant 0.353553385 : f32
    %121 = vector.broadcast %cst_44 : f32 to vector<7x7xf32>
    %122 = arith.mulf %120, %121 : vector<7x7xf32>
    %123 = vector.broadcast %33 : vector<1x7xf32> to vector<7x7xf32>
    %124 = arith.addf %122, %123 : vector<7x7xf32>
    %cst_45 = arith.constant dense<0xFF800000> : vector<7xf32>
    %125 = vector.multi_reduction <maximumf>, %124, %cst_45 [1] : vector<7x7xf32> to vector<7xf32>
    %126 = vector.shape_cast %125 : vector<7xf32> to vector<7x1xf32>
    %127 = vector.broadcast %126 : vector<7x1xf32> to vector<7x7xf32>
    %128 = arith.subf %124, %127 : vector<7x7xf32>
    %129 = math.exp %128 : vector<7x7xf32>
    %cst_46 = arith.constant dense<0.000000e+00> : vector<7xf32>
    %130 = vector.multi_reduction <add>, %129, %cst_46 [1] : vector<7x7xf32> to vector<7xf32>
    %131 = vector.shape_cast %130 : vector<7xf32> to vector<7x1xf32>
    %132 = tpu.reciprocal %131 {approx = true} : vector<7x1xf32> -> vector<7x1xf32>
    %133 = vector.broadcast %132 : vector<7x1xf32> to vector<7x7xf32>
    %134 = arith.mulf %129, %133 : vector<7x7xf32>
    %135 = vector.broadcast %35 : vector<1x7xf32> to vector<7x7xf32>
    %136 = arith.mulf %134, %135 : vector<7x7xf32>
    %137 = arith.truncf %136 : vector<7x7xf32> to vector<7x7xbf16>
    %cst_47 = arith.constant dense<0.000000e+00> : vector<7x8xf32>
    %138 = tpu.matmul %137, %119, %cst_47 {dimension_numbers = #tpu.dot_dimension_numbers<[1], [0], [0], [1], [0, 0, 1, 1], [], []>} : vector<7x7xbf16>, vector<7x8xbf16>, vector<7x8xf32> -> vector<7x8xf32>
    %139 = arith.truncf %138 : vector<7x8xf32> to vector<7x8xbf16>
    %140 = vector.extract_strided_slice %31 {offsets = [24, 0], sizes = [8, 32], strides = [1, 1]} : vector<32x32xbf16> to vector<8x32xbf16>
    %cst_48 = arith.constant dense<0.000000e+00> : vector<7x32xf32>
    %141 = tpu.matmul %139, %140, %cst_48 {dimension_numbers = #tpu.dot_dimension_numbers<[1], [0], [0], [1], [0, 0, 1, 1], [], []>} : vector<7x8xbf16>, vector<8x32xbf16>, vector<7x32xf32> -> vector<7x32xf32>
    %142 = arith.addf %116, %141 : vector<7x32xf32>
    %c0_49 = arith.constant 0 : index
    %c0_50 = arith.constant 0 : index
    %c0_51 = arith.constant 0 : index
    %143 = vector.load %arg10[%c0_49, %c0_50, %c0_51] : memref<1x7x32xf32, #tpu.memory_space<vmem>>, vector<1x7x32xf32>
    %144 = vector.shape_cast %143 : vector<1x7x32xf32> to vector<7x32xf32>
    %145 = vector.shape_cast %142 : vector<7x32xf32> to vector<1x7x32xf32>
    tpu.vector_store %arg10[%c0_49, %c0_50, %c0_51], %145 {strides = array<i32>} : memref<1x7x32xf32, #tpu.memory_space<vmem>>, vector<1x7x32xf32>,
    return
  }
  func.func @transform_0(%arg0: i32) -> (i32, i32, i32) {
    %c0_i32 = arith.constant 0 : i32
    %c0_i32_0 = arith.constant 0 : i32
    %c0_i32_1 = arith.constant 0 : i32
    return %arg0, %c0_i32, %c0_i32_0 : i32, i32, i32
  }
  func.func @transform_1(%arg0: i32) -> (i32, i32) {
    %c0_i32 = arith.constant 0 : i32
    %c0_i32_0 = arith.constant 0 : i32
    %c0_i32_1 = arith.constant 0 : i32
    return %c0_i32, %c0_i32_0 : i32, i32
  }
  func.func @transform_2(%arg0: i32) -> (i32, i32) {
    %c0_i32 = arith.constant 0 : i32
    %c0_i32_0 = arith.constant 0 : i32
    %c0_i32_1 = arith.constant 0 : i32
    return %c0_i32, %c0_i32_0 : i32, i32
  }
  func.func @transform_3(%arg0: i32) -> (i32, i32) {
    %c0_i32 = arith.constant 0 : i32
    %c0_i32_0 = arith.constant 0 : i32
    %c0_i32_1 = arith.constant 0 : i32
    return %c0_i32, %c0_i32_0 : i32, i32
  }
  func.func @transform_4(%arg0: i32) -> (i32, i32) {
    %c0_i32 = arith.constant 0 : i32
    %c0_i32_0 = arith.constant 0 : i32
    %c0_i32_1 = arith.constant 0 : i32
    return %c0_i32, %c0_i32_0 : i32, i32
  }
  func.func @transform_5(%arg0: i32) -> (i32, i32) {
    %c0_i32 = arith.constant 0 : i32
    %c0_i32_0 = arith.constant 0 : i32
    %c0_i32_1 = arith.constant 0 : i32
    return %c0_i32, %c0_i32_0 : i32, i32
  }
  func.func @transform_6(%arg0: i32) -> (i32, i32) {
    %c0_i32 = arith.constant 0 : i32
    %c0_i32_0 = arith.constant 0 : i32
    %c0_i32_1 = arith.constant 0 : i32
    return %c0_i32, %c0_i32_0 : i32, i32
  }
  func.func @transform_7(%arg0: i32) -> (i32, i32, i32) {
    %c0_i32 = arith.constant 0 : i32
    %c0_i32_0 = arith.constant 0 : i32
    %c0_i32_1 = arith.constant 0 : i32
    return %arg0, %c0_i32, %c0_i32_0 : i32, i32, i32
  }
  func.func @transform_8(%arg0: i32) -> (i32, i32, i32) {
    %c0_i32 = arith.constant 0 : i32
    %c0_i32_0 = arith.constant 0 : i32
    %c0_i32_1 = arith.constant 0 : i32
    return %arg0, %c0_i32, %c0_i32_0 : i32, i32, i32
  }
  func.func @transform_9(%arg0: i32) -> (i32, i32, i32) {
    %c0_i32 = arith.constant 0 : i32
    %c0_i32_0 = arith.constant 0 : i32
    %c0_i32_1 = arith.constant 0 : i32
    return %arg0, %c0_i32, %c0_i32_0 : i32, i32, i32
  }
}

module attributes {stable_mosaic.version = 11 : i64} {
  func.func @_ffn_kernel(%arg0: i32, %arg1: memref<14x32xf32, #tpu.memory_space<vmem>>, %arg2: memref<1x32xf32, #tpu.memory_space<vmem>>, %arg3: memref<1x32xf32, #tpu.memory_space<vmem>>, %arg4: memref<32x64xbf16, #tpu.memory_space<vmem>>, %arg5: memref<1x64xf32, #tpu.memory_space<vmem>>, %arg6: memref<64x32xbf16, #tpu.memory_space<vmem>>, %arg7: memref<1x32xf32, #tpu.memory_space<vmem>>, %arg8: memref<14x32xf32, #tpu.memory_space<vmem>>) attributes {dimension_semantics = [#tpu.dimension_semantics<parallel>], iteration_bounds = array<i64: 1>, scalar_prefetch = 0 : i64, scratch_operands = 0 : i64, tpu.core_type = #tpu.core_type<tc>, window_params = [{transform_indices = @transform_0, window_bounds = array<i64: 14, 32>}, {pipeline_mode = #tpu.pipeline_mode<synchronous>, transform_indices = @transform_1, window_bounds = array<i64: 1, 32>}, {pipeline_mode = #tpu.pipeline_mode<synchronous>, transform_indices = @transform_2, window_bounds = array<i64: 1, 32>}, {pipeline_mode = #tpu.pipeline_mode<synchronous>, transform_indices = @transform_3, window_bounds = array<i64: 32, 64>}, {pipeline_mode = #tpu.pipeline_mode<synchronous>, transform_indices = @transform_4, window_bounds = array<i64: 1, 64>}, {pipeline_mode = #tpu.pipeline_mode<synchronous>, transform_indices = @transform_5, window_bounds = array<i64: 64, 32>}, {pipeline_mode = #tpu.pipeline_mode<synchronous>, transform_indices = @transform_6, window_bounds = array<i64: 1, 32>}, {transform_indices = @transform_7, window_bounds = array<i64: 14, 32>}]} {
    %c0 = arith.constant 0 : index
    %c0_0 = arith.constant 0 : index
    %0 = vector.load %arg1[%c0, %c0_0] : memref<14x32xf32, #tpu.memory_space<vmem>>, vector<14x32xf32>
    %c0_1 = arith.constant 0 : index
    %c0_2 = arith.constant 0 : index
    %1 = vector.load %arg2[%c0_1, %c0_2] : memref<1x32xf32, #tpu.memory_space<vmem>>, vector<1x32xf32>
    %c0_3 = arith.constant 0 : index
    %c0_4 = arith.constant 0 : index
    %2 = vector.load %arg3[%c0_3, %c0_4] : memref<1x32xf32, #tpu.memory_space<vmem>>, vector<1x32xf32>
    %cst = arith.constant dense<0.000000e+00> : vector<14xf32>
    %3 = vector.multi_reduction <add>, %0, %cst [1] : vector<14x32xf32> to vector<14xf32>
    %4 = vector.shape_cast %3 : vector<14xf32> to vector<14x1xf32>
    %cst_5 = arith.constant 3.200000e+01 : f32
    %5 = vector.broadcast %cst_5 : f32 to vector<14x1xf32>
    %6 = arith.divf %4, %5 : vector<14x1xf32>
    %7 = vector.broadcast %6 : vector<14x1xf32> to vector<14x32xf32>
    %8 = arith.subf %0, %7 : vector<14x32xf32>
    %9 = arith.mulf %8, %8 : vector<14x32xf32>
    %cst_6 = arith.constant dense<0.000000e+00> : vector<14xf32>
    %10 = vector.multi_reduction <add>, %9, %cst_6 [1] : vector<14x32xf32> to vector<14xf32>
    %11 = vector.shape_cast %10 : vector<14xf32> to vector<14x1xf32>
    %cst_7 = arith.constant 3.200000e+01 : f32
    %12 = vector.broadcast %cst_7 : f32 to vector<14x1xf32>
    %13 = arith.divf %11, %12 : vector<14x1xf32>
    %cst_8 = arith.constant 9.99999996E-13 : f32
    %14 = vector.broadcast %cst_8 : f32 to vector<14x1xf32>
    %15 = arith.addf %13, %14 : vector<14x1xf32>
    %16 = math.rsqrt %15 : vector<14x1xf32>
    %17 = vector.broadcast %16 : vector<14x1xf32> to vector<14x32xf32>
    %18 = arith.mulf %8, %17 : vector<14x32xf32>
    %19 = vector.broadcast %1 : vector<1x32xf32> to vector<14x32xf32>
    %20 = arith.mulf %18, %19 : vector<14x32xf32>
    %21 = vector.broadcast %2 : vector<1x32xf32> to vector<14x32xf32>
    %22 = arith.addf %20, %21 : vector<14x32xf32>
    %23 = arith.truncf %22 : vector<14x32xf32> to vector<14x32xbf16>
    %c0_9 = arith.constant 0 : index
    %c0_10 = arith.constant 0 : index
    %24 = vector.load %arg4[%c0_9, %c0_10] : memref<32x64xbf16, #tpu.memory_space<vmem>>, vector<32x64xbf16>
    %cst_11 = arith.constant dense<0.000000e+00> : vector<14x64xf32>
    %25 = tpu.matmul %23, %24, %cst_11 {dimension_numbers = #tpu.dot_dimension_numbers<[1], [0], [0], [1], [0, 0, 1, 1], [], []>} : vector<14x32xbf16>, vector<32x64xbf16>, vector<14x64xf32> -> vector<14x64xf32>
    %c0_12 = arith.constant 0 : index
    %c0_13 = arith.constant 0 : index
    %26 = vector.load %arg5[%c0_12, %c0_13] : memref<1x64xf32, #tpu.memory_space<vmem>>, vector<1x64xf32>
    %27 = vector.broadcast %26 : vector<1x64xf32> to vector<14x64xf32>
    %28 = arith.addf %25, %27 : vector<14x64xf32>
    %29 = arith.negf %28 : vector<14x64xf32>
    %30 = math.exp %29 : vector<14x64xf32>
    %cst_14 = arith.constant 1.000000e+00 : f32
    %31 = vector.broadcast %cst_14 : f32 to vector<14x64xf32>
    %32 = arith.addf %31, %30 : vector<14x64xf32>
    %33 = arith.divf %31, %32 : vector<14x64xf32>
    %34 = arith.mulf %28, %33 : vector<14x64xf32>
    %35 = arith.truncf %34 : vector<14x64xf32> to vector<14x64xbf16>
    %c0_15 = arith.constant 0 : index
    %c0_16 = arith.constant 0 : index
    %36 = vector.load %arg6[%c0_15, %c0_16] : memref<64x32xbf16, #tpu.memory_space<vmem>>, vector<64x32xbf16>
    %cst_17 = arith.constant dense<0.000000e+00> : vector<14x32xf32>
    %37 = tpu.matmul %35, %36, %cst_17 {dimension_numbers = #tpu.dot_dimension_numbers<[1], [0], [0], [1], [0, 0, 1, 1], [], []>} : vector<14x64xbf16>, vector<64x32xbf16>, vector<14x32xf32> -> vector<14x32xf32>
    %c0_18 = arith.constant 0 : index
    %c0_19 = arith.constant 0 : index
    %38 = vector.load %arg7[%c0_18, %c0_19] : memref<1x32xf32, #tpu.memory_space<vmem>>, vector<1x32xf32>
    %39 = vector.broadcast %38 : vector<1x32xf32> to vector<14x32xf32>
    %40 = arith.addf %37, %39 : vector<14x32xf32>
    %41 = arith.addf %0, %40 : vector<14x32xf32>
    %c0_20 = arith.constant 0 : index
    %c0_21 = arith.constant 0 : index
    %42 = vector.load %arg8[%c0_20, %c0_21] : memref<14x32xf32, #tpu.memory_space<vmem>>, vector<14x32xf32>
    tpu.vector_store %arg8[%c0_20, %c0_21], %41 {strides = array<i32>} : memref<14x32xf32, #tpu.memory_space<vmem>>, vector<14x32xf32>,
    return
  }
  func.func @transform_0(%arg0: i32) -> (i32, i32) {
    %c0_i32 = arith.constant 0 : i32
    %c0_i32_0 = arith.constant 0 : i32
    return %arg0, %c0_i32 : i32, i32
  }
  func.func @transform_1(%arg0: i32) -> (i32, i32) {
    %c0_i32 = arith.constant 0 : i32
    %c0_i32_0 = arith.constant 0 : i32
    %c0_i32_1 = arith.constant 0 : i32
    return %c0_i32, %c0_i32_0 : i32, i32
  }
  func.func @transform_2(%arg0: i32) -> (i32, i32) {
    %c0_i32 = arith.constant 0 : i32
    %c0_i32_0 = arith.constant 0 : i32
    %c0_i32_1 = arith.constant 0 : i32
    return %c0_i32, %c0_i32_0 : i32, i32
  }
  func.func @transform_3(%arg0: i32) -> (i32, i32) {
    %c0_i32 = arith.constant 0 : i32
    %c0_i32_0 = arith.constant 0 : i32
    %c0_i32_1 = arith.constant 0 : i32
    return %c0_i32, %c0_i32_0 : i32, i32
  }
  func.func @transform_4(%arg0: i32) -> (i32, i32) {
    %c0_i32 = arith.constant 0 : i32
    %c0_i32_0 = arith.constant 0 : i32
    %c0_i32_1 = arith.constant 0 : i32
    return %c0_i32, %c0_i32_0 : i32, i32
  }
  func.func @transform_5(%arg0: i32) -> (i32, i32) {
    %c0_i32 = arith.constant 0 : i32
    %c0_i32_0 = arith.constant 0 : i32
    %c0_i32_1 = arith.constant 0 : i32
    return %c0_i32, %c0_i32_0 : i32, i32
  }
  func.func @transform_6(%arg0: i32) -> (i32, i32) {
    %c0_i32 = arith.constant 0 : i32
    %c0_i32_0 = arith.constant 0 : i32
    %c0_i32_1 = arith.constant 0 : i32
    return %c0_i32, %c0_i32_0 : i32, i32
  }
  func.func @transform_7(%arg0: i32) -> (i32, i32) {
    %c0_i32 = arith.constant 0 : i32
    %c0_i32_0 = arith.constant 0 : i32
    return %arg0, %c0_i32 : i32, i32
  }
}

module attributes {stable_mosaic.version = 11 : i64} {
  func.func @_layernorm_kernel(%arg0: i32, %arg1: memref<14x32xf32, #tpu.memory_space<vmem>>, %arg2: memref<1x32xf32, #tpu.memory_space<vmem>>, %arg3: memref<1x32xf32, #tpu.memory_space<vmem>>, %arg4: memref<14x32xf32, #tpu.memory_space<vmem>>) attributes {dimension_semantics = [#tpu.dimension_semantics<parallel>], iteration_bounds = array<i64: 1>, scalar_prefetch = 0 : i64, scratch_operands = 0 : i64, tpu.core_type = #tpu.core_type<tc>, window_params = [{transform_indices = @transform_0, window_bounds = array<i64: 14, 32>}, {pipeline_mode = #tpu.pipeline_mode<synchronous>, transform_indices = @transform_1, window_bounds = array<i64: 1, 32>}, {pipeline_mode = #tpu.pipeline_mode<synchronous>, transform_indices = @transform_2, window_bounds = array<i64: 1, 32>}, {transform_indices = @transform_3, window_bounds = array<i64: 14, 32>}]} {
    %c0 = arith.constant 0 : index
    %c0_0 = arith.constant 0 : index
    %0 = vector.load %arg1[%c0, %c0_0] : memref<14x32xf32, #tpu.memory_space<vmem>>, vector<14x32xf32>
    %c0_1 = arith.constant 0 : index
    %c0_2 = arith.constant 0 : index
    %1 = vector.load %arg2[%c0_1, %c0_2] : memref<1x32xf32, #tpu.memory_space<vmem>>, vector<1x32xf32>
    %c0_3 = arith.constant 0 : index
    %c0_4 = arith.constant 0 : index
    %2 = vector.load %arg3[%c0_3, %c0_4] : memref<1x32xf32, #tpu.memory_space<vmem>>, vector<1x32xf32>
    %cst = arith.constant dense<0.000000e+00> : vector<14xf32>
    %3 = vector.multi_reduction <add>, %0, %cst [1] : vector<14x32xf32> to vector<14xf32>
    %4 = vector.shape_cast %3 : vector<14xf32> to vector<14x1xf32>
    %cst_5 = arith.constant 3.200000e+01 : f32
    %5 = vector.broadcast %cst_5 : f32 to vector<14x1xf32>
    %6 = arith.divf %4, %5 : vector<14x1xf32>
    %7 = vector.broadcast %6 : vector<14x1xf32> to vector<14x32xf32>
    %8 = arith.subf %0, %7 : vector<14x32xf32>
    %9 = arith.mulf %8, %8 : vector<14x32xf32>
    %cst_6 = arith.constant dense<0.000000e+00> : vector<14xf32>
    %10 = vector.multi_reduction <add>, %9, %cst_6 [1] : vector<14x32xf32> to vector<14xf32>
    %11 = vector.shape_cast %10 : vector<14xf32> to vector<14x1xf32>
    %cst_7 = arith.constant 3.200000e+01 : f32
    %12 = vector.broadcast %cst_7 : f32 to vector<14x1xf32>
    %13 = arith.divf %11, %12 : vector<14x1xf32>
    %cst_8 = arith.constant 9.99999996E-13 : f32
    %14 = vector.broadcast %cst_8 : f32 to vector<14x1xf32>
    %15 = arith.addf %13, %14 : vector<14x1xf32>
    %16 = math.rsqrt %15 : vector<14x1xf32>
    %17 = vector.broadcast %16 : vector<14x1xf32> to vector<14x32xf32>
    %18 = arith.mulf %8, %17 : vector<14x32xf32>
    %19 = vector.broadcast %1 : vector<1x32xf32> to vector<14x32xf32>
    %20 = arith.mulf %18, %19 : vector<14x32xf32>
    %21 = vector.broadcast %2 : vector<1x32xf32> to vector<14x32xf32>
    %22 = arith.addf %20, %21 : vector<14x32xf32>
    %c0_9 = arith.constant 0 : index
    %c0_10 = arith.constant 0 : index
    %23 = vector.load %arg4[%c0_9, %c0_10] : memref<14x32xf32, #tpu.memory_space<vmem>>, vector<14x32xf32>
    tpu.vector_store %arg4[%c0_9, %c0_10], %22 {strides = array<i32>} : memref<14x32xf32, #tpu.memory_space<vmem>>, vector<14x32xf32>,
    return
  }
  func.func @transform_0(%arg0: i32) -> (i32, i32) {
    %c0_i32 = arith.constant 0 : i32
    %c0_i32_0 = arith.constant 0 : i32
    return %arg0, %c0_i32 : i32, i32
  }
  func.func @transform_1(%arg0: i32) -> (i32, i32) {
    %c0_i32 = arith.constant 0 : i32
    %c0_i32_0 = arith.constant 0 : i32
    %c0_i32_1 = arith.constant 0 : i32
    return %c0_i32, %c0_i32_0 : i32, i32
  }
  func.func @transform_2(%arg0: i32) -> (i32, i32) {
    %c0_i32 = arith.constant 0 : i32
    %c0_i32_0 = arith.constant 0 : i32
    %c0_i32_1 = arith.constant 0 : i32
    return %c0_i32, %c0_i32_0 : i32, i32
  }
  func.func @transform_3(%arg0: i32) -> (i32, i32) {
    %c0_i32 = arith.constant 0 : i32
    %c0_i32_0 = arith.constant 0 : i32
    return %arg0, %c0_i32 : i32, i32
  }
}

</mosaic_0001>

<bundles_post_ra>
// kernel: encoder_forward.7
= control target key start
LH: loop header
LB: loop body
LE: loop exit
PB: predicated region body
PF: predicated region fallthrough
CT: control target
= control target key end

     0   :  { %vm200_vm0 = vcmask 1043456   ;;  %vm201_vm1 = vcmask 1044480   ;;  %v801_v0 = vmov 0.0   ;;  %v802_v2 = vmov 65535   ;;  %s1086_s1 = inlined_call_operand.vmem [shape: bf16[9,32], index: 1, kind: input, shape index: {}]   ;;  %s1087_s0 = inlined_call_operand.vmem [shape: bf16[270,9], index: 0, kind: input, shape index: {}]   ;;  %s1088_s2 = inlined_call_operand.vmem [shape: f32[1,32], index: 2, kind: input, shape index: {}]   ;;  %s1089_s3 = inlined_call_operand.vmem [shape: bf16[270,32], index: 3, kind: output, shape index: {}]  }
   0x1   :  { %708 = vmatprep.subr.bf16.mxu0 %v801_v0  ;;  %v783_v1 = vld [vmem:[%s1086_s1] sm:$0x1f]   ;;  %778 = vmatprep.subr.bf16.mxu1 %v801_v0  ;;  %v202_v3 = vsel %vm200_vm0, 4294967295, %v802_v2  ;;  %vm803_vm2 = vmmov 0   ;;  %v785_v7 = vld [vmem:[%s1087_s0 + $0x48] sm:$0xff]   ;;  %vm148_vm3 = vcmask 72704  }
   0x2   :  { %v203_v4 = vsel %vm201_vm1, %v202_v3, 0  ;;  %710 = vmatprep.mubr.msk.bf16.mxu0 %vm803_vm2, %v801_v0  ;;  %v784_v5 = vld [vmem:[%s1087_s0] sm:$0xff]   ;;  %746 = vmatprep.mubr.msk.bf16.mxu1 %vm803_vm2, %v801_v0  ;;  %v786_v8 = vld [vmem:[%s1087_s0 + $0x8] sm:$0xff]   ;;  %v787_v9 = vld [vmem:[%s1087_s0 + $0x50] sm:$0xff]   ;;  %vm546_vm4 = vcmask 257024   ;;  %vm580_vm5 = vcmask 256000  }
   0x3   :  { %v205_v6 = vand.u32 %v783_v1, %v203_v4  ;;  %v788_v10 = vld [vmem:[%s1087_s0 + $0x10] sm:$0xff]   ;;  %v789_v11 = vld [vmem:[%s1087_s0 + $0x58] sm:$0xff]   ;;  %v791_v13 = vld [vmem:[%s1087_s0 + $0x60] sm:$0xff]  }
   0x4   :  { %v790_v12 = vld [vmem:[%s1087_s0 + $0x18] sm:$0xff]   ;;  %v792_v14 = vld [vmem:[%s1087_s0 + $0x20] sm:$0xff]   ;;  %v793_v15 = vld [vmem:[%s1087_s0 + $0x68] sm:$0xff]  }
   0x5   :  { %709 = vmatpush3.bf16.msra.mxu0 %v205_v6  ;;  %779 = vmatpush3.bf16.msra.mxu1 %v205_v6  ;;  %v794_v16 = vld [vmem:[%s1087_s0 + $0x28] sm:$0xff]   ;;  %v795_v17 = vld [vmem:[%s1087_s0 + $0x70] sm:$0xff]   ;;  %v797_v19 = vld [vmem:[%s1087_s0 + $0x78] sm:$0xff]  }
   0x6   :  { %v796_v18 = vld [vmem:[%s1087_s0 + $0x30] sm:$0xff]   ;;  %v798_v20 = vld [vmem:[%s1087_s0 + $0x38] sm:$0xff]   ;;  %v799_v21 = vld [vmem:[%s1087_s0 + $0x80] sm:$0x7f]  }
   0x7   :  { %v800_v22 = vld [vmem:[%s1087_s0 + $0x40] sm:$0xff]  }
   0x8   :  { %711 = vmatmul.mubr.msk.bf16.vlgmr.msra.gmra.mrb[0].mxu0 %vm148_vm3, %v784_v5  ;;  %747 = vmatmul.mubr.msk.bf16.vlgmr.msra.gmra.mrb[0].mxu1 %vm148_vm3, %v785_v7  ;;  %v915_v23 = vld [vmem:[%s1088_s2] ss:$0 sm:$0xff] }
   0x9   :  { %714 = vmatprep.mubr.msk.bf16.mxu0 %vm803_vm2, %v801_v0  ;;  %750 = vmatprep.mubr.msk.bf16.mxu1 %vm803_vm2, %v801_v0 }
  0x10   :  { %715 = vmatmul.mubr.msk.bf16.gmra.mrb[4].mxu0 %vm148_vm3, %v786_v8  ;;  %751 = vmatmul.mubr.msk.bf16.gmra.mrb[4].mxu1 %vm148_vm3, %v787_v9 }
  0x11   :  { %718 = vmatprep.mubr.msk.bf16.mxu0 %vm803_vm2, %v801_v0  ;;  %754 = vmatprep.mubr.msk.bf16.mxu1 %vm803_vm2, %v801_v0 }
  0x18   :  { %719 = vmatmul.mubr.msk.bf16.gmra.mrb[8].mxu0 %vm148_vm3, %v788_v10  ;;  %755 = vmatmul.mubr.msk.bf16.gmra.mrb[8].mxu1 %vm148_vm3, %v789_v11 }
  0x19   :  { %722 = vmatprep.mubr.msk.bf16.mxu0 %vm803_vm2, %v801_v0  ;;  %758 = vmatprep.mubr.msk.bf16.mxu1 %vm803_vm2, %v801_v0 }
  0x20   :  { %723 = vmatmul.mubr.msk.bf16.gmra.mrb[12].mxu0 %vm148_vm3, %v790_v12  ;;  %759 = vmatmul.mubr.msk.bf16.gmra.mrb[12].mxu1 %vm148_vm3, %v791_v13 }
  0x21   :  { %726 = vmatprep.mubr.msk.bf16.mxu0 %vm803_vm2, %v801_v0  ;;  %762 = vmatprep.mubr.msk.bf16.mxu1 %vm803_vm2, %v801_v0 }
  0x28   :  { %727 = vmatmul.mubr.msk.bf16.gmra.mrb[16].mxu0 %vm148_vm3, %v792_v14  ;;  %763 = vmatmul.mubr.msk.bf16.gmra.mrb[16].mxu1 %vm148_vm3, %v793_v15 }
  0x29   :  { %730 = vmatprep.mubr.msk.bf16.mxu0 %vm803_vm2, %v801_v0  ;;  %766 = vmatprep.mubr.msk.bf16.mxu1 %vm803_vm2, %v801_v0 }
  0x30   :  { %731 = vmatmul.mubr.msk.bf16.gmra.mrb[20].mxu0 %vm148_vm3, %v794_v16  ;;  %767 = vmatmul.mubr.msk.bf16.gmra.mrb[20].mxu1 %vm148_vm3, %v795_v17 }
  0x31   :  { %734 = vmatprep.mubr.msk.bf16.mxu0 %vm803_vm2, %v801_v0  ;;  %770 = vmatprep.mubr.msk.bf16.mxu1 %vm803_vm2, %v801_v0 }
  0x38   :  { %735 = vmatmul.mubr.msk.bf16.gmra.mrb[24].mxu0 %vm148_vm3, %v796_v18  ;;  %771 = vmatmul.mubr.msk.bf16.gmra.mrb[24].mxu1 %vm148_vm3, %v797_v19 }
  0x39   :  { %738 = vmatprep.mubr.msk.bf16.mxu0 %vm803_vm2, %v801_v0  ;;  %774 = vmatprep.mubr.msk.bf16.mxu1 %vm803_vm2, %v801_v0 }
  0x40   :  { %739 = vmatmul.mubr.msk.bf16.gmra.mrb[28].mxu0 %vm148_vm3, %v798_v20  ;;  %775 = vmatmul.mubr.msk.bf16.gmra.mrb[28].mxu1 %vm148_vm3, %v799_v21 }
  0x41   :  { %742 = vmatprep.mubr.msk.bf16.mxu0 %vm803_vm2, %v801_v0 }
  0x48   :  { %743 = vmatmul.mubr.msk.bf16.gmra.mrb[32].mxu0 %vm148_vm3, %v800_v22 }
  0xdb   :  { %v241_v24 = vpop.f32.mrb[0].mxu0  ;;  %v313_v25 = vpop.f32.mrb[0].mxu1 }
  0xdc   :  { %v242_v26 = vadd.f32 %v915_v23, %v241_v24  ;;  %v712_v27 = vpop.f32.mrb[1].mxu0  ;;  %v314_v28 = vadd.f32 %v915_v23, %v313_v25  ;;  %v748_v29 = vpop.f32.mrb[1].mxu1 }
  0xdd   :  { %v244_v30 = vpop.f32.mrb[2].mxu0  ;;  %v316_v31 = vpop.f32.mrb[2].mxu1 }
  0xde   :  { %v376_v32 = vmax.f32 %v242_v26, 0.0  ;;  %v245_v33 = vadd.f32 %v915_v23, %v244_v30  ;;  %v713_v34 = vpop.f32.mrb[3].mxu0  ;;  %v394_v35 = vmax.f32 %v314_v28, 0.0  ;;  %v317_v36 = vadd.f32 %v915_v23, %v316_v31  ;;  %v749_v37 = vpop.f32.mrb[3].mxu1 }
  0xe0   :  { %v656_v38 = vpack.c.bf16 %v376_v32, %v376_v32  ;;  %v377_v39 = vmax.f32 %v245_v33, 0.0  ;;  %v674_v40 = vpack.c.bf16 %v394_v35, %v394_v35  ;;  %v395_v41 = vmax.f32 %v317_v36, 0.0 }
  0xe2   :  { %547 = vst.msk [vmem:[%s1089_s3] sm:$0xf] %vm546_vm4, %v656_v38  ;;  %v657_v42 = vpack.c.bf16 %v377_v39, %v377_v39  ;;  %565 = vst.msk [vmem:[%s1089_s3 + $0x48] sm:$0xf] %vm546_vm4, %v674_v40  ;;  %v675_v43 = vpack.c.bf16 %v395_v41, %v395_v41 }
  0xe3   :  { %v249_v44 = vpop.f32.mrb[4].mxu0  ;;  %v321_v45 = vpop.f32.mrb[4].mxu1 }
  0xe4   :  { %548 = vst.msk [vmem:[%s1089_s3 + $0x4] sm:$0xf] %vm546_vm4, %v657_v42  ;;  %566 = vst.msk [vmem:[%s1089_s3 + $0x4c] sm:$0xf] %vm546_vm4, %v675_v43  ;;  %v250_v46 = vadd.f32 %v915_v23, %v249_v44  ;;  %v716_v47 = vpop.f32.mrb[5].mxu0  ;;  %v322_v48 = vadd.f32 %v915_v23, %v321_v45  ;;  %v752_v49 = vpop.f32.mrb[5].mxu1 }
  0xe5   :  { %v252_v50 = vpop.f32.mrb[6].mxu0  ;;  %v324_v51 = vpop.f32.mrb[6].mxu1 }
  0xe6   :  { %v378_v52 = vmax.f32 %v250_v46, 0.0  ;;  %v253_v53 = vadd.f32 %v915_v23, %v252_v50  ;;  %v717_v54 = vpop.f32.mrb[7].mxu0  ;;  %v396_v55 = vmax.f32 %v322_v48, 0.0  ;;  %v325_v56 = vadd.f32 %v915_v23, %v324_v51  ;;  %v753_v57 = vpop.f32.mrb[7].mxu1 }
  0xe8   :  { %v658_v58 = vpack.c.bf16 %v378_v52, %v378_v52  ;;  %v379_v59 = vmax.f32 %v253_v53, 0.0  ;;  %v676_v60 = vpack.c.bf16 %v396_v55, %v396_v55  ;;  %v397_v61 = vmax.f32 %v325_v56, 0.0 }
  0xea   :  { %549 = vst.msk [vmem:[%s1089_s3 + $0x8] sm:$0xf] %vm546_vm4, %v658_v58  ;;  %v659_v62 = vpack.c.bf16 %v379_v59, %v379_v59  ;;  %567 = vst.msk [vmem:[%s1089_s3 + $0x50] sm:$0xf] %vm546_vm4, %v676_v60  ;;  %v677_v63 = vpack.c.bf16 %v397_v61, %v397_v61 }
  0xeb   :  { %v257_v0 = vpop.f32.mrb[8].mxu0  ;;  %v329_v1 = vpop.f32.mrb[8].mxu1 }
  0xec   :  { %550 = vst.msk [vmem:[%s1089_s3 + $0xc] sm:$0xf] %vm546_vm4, %v659_v62  ;;  %568 = vst.msk [vmem:[%s1089_s3 + $0x54] sm:$0xf] %vm546_vm4, %v677_v63  ;;  %v258_v2 = vadd.f32 %v915_v23, %v257_v0  ;;  %v720_v3 = vpop.f32.mrb[9].mxu0  ;;  %v330_v4 = vadd.f32 %v915_v23, %v329_v1  ;;  %v756_v5 = vpop.f32.mrb[9].mxu1 }
  0xed   :  { %v260_v6 = vpop.f32.mrb[10].mxu0  ;;  %v332_v7 = vpop.f32.mrb[10].mxu1 }
  0xee   :  { %v380_v8 = vmax.f32 %v258_v2, 0.0  ;;  %v261_v9 = vadd.f32 %v915_v23, %v260_v6  ;;  %v721_v10 = vpop.f32.mrb[11].mxu0  ;;  %v398_v11 = vmax.f32 %v330_v4, 0.0  ;;  %v333_v12 = vadd.f32 %v915_v23, %v332_v7  ;;  %v757_v13 = vpop.f32.mrb[11].mxu1 }
  0xf0   :  { %v660_v14 = vpack.c.bf16 %v380_v8, %v380_v8  ;;  %v381_v15 = vmax.f32 %v261_v9, 0.0  ;;  %v678_v16 = vpack.c.bf16 %v398_v11, %v398_v11  ;;  %v399_v17 = vmax.f32 %v333_v12, 0.0 }
  0xf2   :  { %551 = vst.msk [vmem:[%s1089_s3 + $0x10] sm:$0xf] %vm546_vm4, %v660_v14  ;;  %v661_v18 = vpack.c.bf16 %v381_v15, %v381_v15  ;;  %569 = vst.msk [vmem:[%s1089_s3 + $0x58] sm:$0xf] %vm546_vm4, %v678_v16  ;;  %v679_v19 = vpack.c.bf16 %v399_v17, %v399_v17 }
  0xf3   :  { %v265_v20 = vpop.f32.mrb[12].mxu0  ;;  %v337_v21 = vpop.f32.mrb[12].mxu1 }
  0xf4   :  { %552 = vst.msk [vmem:[%s1089_s3 + $0x14] sm:$0xf] %vm546_vm4, %v661_v18  ;;  %570 = vst.msk [vmem:[%s1089_s3 + $0x5c] sm:$0xf] %vm546_vm4, %v679_v19  ;;  %v266_v22 = vadd.f32 %v915_v23, %v265_v20  ;;  %v724_v24 = vpop.f32.mrb[13].mxu0  ;;  %v338_v25 = vadd.f32 %v915_v23, %v337_v21  ;;  %v760_v26 = vpop.f32.mrb[13].mxu1 }
  0xf5   :  { %v268_v27 = vpop.f32.mrb[14].mxu0  ;;  %v340_v28 = vpop.f32.mrb[14].mxu1 }
  0xf6   :  { %v382_v29 = vmax.f32 %v266_v22, 0.0  ;;  %v269_v30 = vadd.f32 %v915_v23, %v268_v27  ;;  %v725_v31 = vpop.f32.mrb[15].mxu0  ;;  %v400_v32 = vmax.f32 %v338_v25, 0.0  ;;  %v341_v33 = vadd.f32 %v915_v23, %v340_v28  ;;  %v761_v34 = vpop.f32.mrb[15].mxu1 }
  0xf8   :  { %v662_v35 = vpack.c.bf16 %v382_v29, %v382_v29  ;;  %v383_v36 = vmax.f32 %v269_v30, 0.0  ;;  %v680_v37 = vpack.c.bf16 %v400_v32, %v400_v32  ;;  %v401_v38 = vmax.f32 %v341_v33, 0.0 }
  0xfa   :  { %553 = vst.msk [vmem:[%s1089_s3 + $0x18] sm:$0xf] %vm546_vm4, %v662_v35  ;;  %v663_v39 = vpack.c.bf16 %v383_v36, %v383_v36  ;;  %571 = vst.msk [vmem:[%s1089_s3 + $0x60] sm:$0xf] %vm546_vm4, %v680_v37  ;;  %v681_v40 = vpack.c.bf16 %v401_v38, %v401_v38 }
  0xfb   :  { %v273_v41 = vpop.f32.mrb[16].mxu0  ;;  %v345_v42 = vpop.f32.mrb[16].mxu1 }
  0xfc   :  { %554 = vst.msk [vmem:[%s1089_s3 + $0x1c] sm:$0xf] %vm546_vm4, %v663_v39  ;;  %572 = vst.msk [vmem:[%s1089_s3 + $0x64] sm:$0xf] %vm546_vm4, %v681_v40  ;;  %v274_v43 = vadd.f32 %v915_v23, %v273_v41  ;;  %v728_v44 = vpop.f32.mrb[17].mxu0  ;;  %v346_v45 = vadd.f32 %v915_v23, %v345_v42  ;;  %v764_v46 = vpop.f32.mrb[17].mxu1 }
  0xfd   :  { %v276_v47 = vpop.f32.mrb[18].mxu0  ;;  %v348_v48 = vpop.f32.mrb[18].mxu1 }
  0xfe   :  { %v384_v49 = vmax.f32 %v274_v43, 0.0  ;;  %v277_v50 = vadd.f32 %v915_v23, %v276_v47  ;;  %v729_v51 = vpop.f32.mrb[19].mxu0  ;;  %v402_v52 = vmax.f32 %v346_v45, 0.0  ;;  %v349_v53 = vadd.f32 %v915_v23, %v348_v48  ;;  %v765_v54 = vpop.f32.mrb[19].mxu1 }
 0x100   :  { %v664_v55 = vpack.c.bf16 %v384_v49, %v384_v49  ;;  %v385_v56 = vmax.f32 %v277_v50, 0.0  ;;  %v682_v57 = vpack.c.bf16 %v402_v52, %v402_v52  ;;  %v403_v58 = vmax.f32 %v349_v53, 0.0 }
 0x102   :  { %555 = vst.msk [vmem:[%s1089_s3 + $0x20] sm:$0xf] %vm546_vm4, %v664_v55  ;;  %v665_v59 = vpack.c.bf16 %v385_v56, %v385_v56  ;;  %573 = vst.msk [vmem:[%s1089_s3 + $0x68] sm:$0xf] %vm546_vm4, %v682_v57  ;;  %v683_v60 = vpack.c.bf16 %v403_v58, %v403_v58 }
 0x103   :  { %v281_v61 = vpop.f32.mrb[20].mxu0  ;;  %v353_v62 = vpop.f32.mrb[20].mxu1 }
 0x104   :  { %556 = vst.msk [vmem:[%s1089_s3 + $0x24] sm:$0xf] %vm546_vm4, %v665_v59  ;;  %574 = vst.msk [vmem:[%s1089_s3 + $0x6c] sm:$0xf] %vm546_vm4, %v683_v60  ;;  %v282_v63 = vadd.f32 %v915_v23, %v281_v61  ;;  %v732_v0 = vpop.f32.mrb[21].mxu0  ;;  %v354_v1 = vadd.f32 %v915_v23, %v353_v62  ;;  %v768_v2 = vpop.f32.mrb[21].mxu1 }
 0x105   :  { %v284_v3 = vpop.f32.mrb[22].mxu0  ;;  %v356_v4 = vpop.f32.mrb[22].mxu1 }
 0x106   :  { %v386_v5 = vmax.f32 %v282_v63, 0.0  ;;  %v285_v6 = vadd.f32 %v915_v23, %v284_v3  ;;  %v733_v7 = vpop.f32.mrb[23].mxu0  ;;  %v404_v8 = vmax.f32 %v354_v1, 0.0  ;;  %v357_v9 = vadd.f32 %v915_v23, %v356_v4  ;;  %v769_v10 = vpop.f32.mrb[23].mxu1 }
 0x108   :  { %v666_v11 = vpack.c.bf16 %v386_v5, %v386_v5  ;;  %v387_v12 = vmax.f32 %v285_v6, 0.0  ;;  %v684_v13 = vpack.c.bf16 %v404_v8, %v404_v8  ;;  %v405_v14 = vmax.f32 %v357_v9, 0.0 }
 0x10a   :  { %557 = vst.msk [vmem:[%s1089_s3 + $0x28] sm:$0xf] %vm546_vm4, %v666_v11  ;;  %v667_v15 = vpack.c.bf16 %v387_v12, %v387_v12  ;;  %575 = vst.msk [vmem:[%s1089_s3 + $0x70] sm:$0xf] %vm546_vm4, %v684_v13  ;;  %v685_v16 = vpack.c.bf16 %v405_v14, %v405_v14 }
 0x10b   :  { %v289_v17 = vpop.f32.mrb[24].mxu0  ;;  %v361_v18 = vpop.f32.mrb[24].mxu1 }
 0x10c   :  { %558 = vst.msk [vmem:[%s1089_s3 + $0x2c] sm:$0xf] %vm546_vm4, %v667_v15  ;;  %576 = vst.msk [vmem:[%s1089_s3 + $0x74] sm:$0xf] %vm546_vm4, %v685_v16  ;;  %v290_v19 = vadd.f32 %v915_v23, %v289_v17  ;;  %v736_v20 = vpop.f32.mrb[25].mxu0  ;;  %v362_v21 = vadd.f32 %v915_v23, %v361_v18  ;;  %v772_v22 = vpop.f32.mrb[25].mxu1 }
 0x10d   :  { %v292_v24 = vpop.f32.mrb[26].mxu0  ;;  %v364_v25 = vpop.f32.mrb[26].mxu1 }
 0x10e   :  { %v388_v26 = vmax.f32 %v290_v19, 0.0  ;;  %v293_v27 = vadd.f32 %v915_v23, %v292_v24  ;;  %v737_v28 = vpop.f32.mrb[27].mxu0  ;;  %v406_v29 = vmax.f32 %v362_v21, 0.0  ;;  %v365_v30 = vadd.f32 %v915_v23, %v364_v25  ;;  %v773_v31 = vpop.f32.mrb[27].mxu1 }
 0x110   :  { %v668_v32 = vpack.c.bf16 %v388_v26, %v388_v26  ;;  %v389_v33 = vmax.f32 %v293_v27, 0.0  ;;  %v686_v34 = vpack.c.bf16 %v406_v29, %v406_v29  ;;  %v407_v35 = vmax.f32 %v365_v30, 0.0 }
 0x112   :  { %559 = vst.msk [vmem:[%s1089_s3 + $0x30] sm:$0xf] %vm546_vm4, %v668_v32  ;;  %v669_v36 = vpack.c.bf16 %v389_v33, %v389_v33  ;;  %577 = vst.msk [vmem:[%s1089_s3 + $0x78] sm:$0xf] %vm546_vm4, %v686_v34  ;;  %v687_v37 = vpack.c.bf16 %v407_v35, %v407_v35 }
 0x113   :  { %v297_v38 = vpop.f32.mrb[28].mxu0  ;;  %v369_v39 = vpop.f32.mrb[28].mxu1 }
 0x114   :  { %560 = vst.msk [vmem:[%s1089_s3 + $0x34] sm:$0xf] %vm546_vm4, %v669_v36  ;;  %578 = vst.msk [vmem:[%s1089_s3 + $0x7c] sm:$0xf] %vm546_vm4, %v687_v37  ;;  %v298_v40 = vadd.f32 %v915_v23, %v297_v38  ;;  %v740_v41 = vpop.f32.mrb[29].mxu0  ;;  %v370_v42 = vadd.f32 %v915_v23, %v369_v39  ;;  %v776_v43 = vpop.f32.mrb[29].mxu1 }
 0x115   :  { %v300_v44 = vpop.f32.mrb[30].mxu0  ;;  %v372_v45 = vpop.f32.mrb[30].mxu1 }
 0x116   :  { %v390_v46 = vmax.f32 %v298_v40, 0.0  ;;  %v301_v47 = vadd.f32 %v915_v23, %v300_v44  ;;  %v741_v48 = vpop.f32.mrb[31].mxu0  ;;  %v408_v49 = vmax.f32 %v370_v42, 0.0  ;;  %v373_v50 = vadd.f32 %v915_v23, %v372_v45  ;;  %v777_v51 = vpop.f32.mrb[31].mxu1 }
 0x118   :  { %v670_v52 = vpack.c.bf16 %v390_v46, %v390_v46  ;;  %v391_v53 = vmax.f32 %v301_v47, 0.0  ;;  %v688_v54 = vpack.c.bf16 %v408_v49, %v408_v49  ;;  %v409_v55 = vmax.f32 %v373_v50, 0.0 }
 0x11a   :  { %561 = vst.msk [vmem:[%s1089_s3 + $0x38] sm:$0xf] %vm546_vm4, %v670_v52  ;;  %v671_v56 = vpack.c.bf16 %v391_v53, %v391_v53  ;;  %579 = vst.msk [vmem:[%s1089_s3 + $0x80] sm:$0xf] %vm546_vm4, %v688_v54  ;;  %v689_v57 = vpack.c.bf16 %v409_v55, %v409_v55 }
 0x11b   :  { %v305_v58 = vpop.f32.mrb[32].mxu0 }
 0x11c   :  { %562 = vst.msk [vmem:[%s1089_s3 + $0x3c] sm:$0xf] %vm546_vm4, %v671_v56  ;;  %v306_v59 = vadd.f32 %v915_v23, %v305_v58  ;;  %v744_v60 = vpop.f32.mrb[33].mxu0 }
 0x11d   :  { %581 = vst.msk [vmem:[%s1089_s3 + $0x84] sm:$0x7] %vm580_vm5, %v689_v57  ;;  %v308_v61 = vpop.f32.mrb[34].mxu0 }
 0x11e   :  { %v392_v62 = vmax.f32 %v306_v59, 0.0  ;;  %v309_v63 = vadd.f32 %v915_v23, %v308_v61  ;;  %v745_v0 = vpop.f32.mrb[35].mxu0 }
 0x120   :  { %v672_v1 = vpack.c.bf16 %v392_v62, %v392_v62  ;;  %v393_v2 = vmax.f32 %v309_v63, 0.0 }
 0x122   :  { %563 = vst.msk [vmem:[%s1089_s3 + $0x40] sm:$0xf] %vm546_vm4, %v672_v1  ;;  %v673_v3 = vpack.c.bf16 %v393_v2, %v393_v2 }
 0x124   :  { %564 = vst.msk [vmem:[%s1089_s3 + $0x44] sm:$0xf] %vm546_vm4, %v673_v3 }

// kernel: encoder_forward.10
= control target key start
LH: loop header
LB: loop body
LE: loop exit
PB: predicated region body
PF: predicated region fallthrough
CT: control target
= control target key end

     0   :  { %vm31_vm0 = vcmask 261120   ;;  %vm35_vm1 = vcmask 259072   ;;  %v313_v15 = vmov 0.0   ;;  %vm314_vm2 = vmmov 0   ;;  %s414_s0 = inlined_call_operand.vmem [shape: f32[14,32], index: 0, kind: input, shape index: {}]   ;;  %s415_s3 = inlined_call_operand.vmem [shape: bf16[32,64], index: 3, kind: input, shape index: {}]   ;;  %s416_s1 = inlined_call_operand.vmem [shape: f32[1,32], index: 1, kind: input, shape index: {}]   ;;  %s417_s2 = inlined_call_operand.vmem [shape: f32[1,32], index: 2, kind: input, shape index: {}]   ;;  %s418_s5 = inlined_call_operand.vmem [shape: bf16[64,32], index: 5, kind: input, shape index: {}]   ;;  %s419_s4 = inlined_call_operand.vmem [shape: f32[1,64], index: 4, kind: input, shape index: {}]   ;;  %s420_s6 = inlined_call_operand.vmem [shape: f32[1,32], index: 6, kind: input, shape index: {}]   ;;  %s421_s7 = inlined_call_operand.vmem [shape: f32[14,32], index: 7, kind: output, shape index: {}]  }
   0x1   :  { %v358_v0 = vld [vmem:[%s414_s0] sm:$0xff]  ;;  %v363_v1 = vld [vmem:[%s414_s0 + $0x8] sm:$0x3f]  ;;  %273 = vmatprep.subr.bf16.mxu0 %v313_v15  ;;  %281 = vmatprep.subr.bf16.mxu1 %v313_v15  ;;  %v299_v36 = vld [vmem:[%s418_s5 + $0x10] sm:$0xff]   ;;  %vm198_vm3 = vcmask 523264  }
   0x2   :  { %v32_v2 = vsel %vm31_vm0, %v358_v0, 0.0  ;;  %v36_v3 = vsel %vm35_vm1, %v363_v1, 0.0  ;;  %v295_v14 = vld [vmem:[%s415_s3] sm:$0xff]   ;;  %v296_v16 = vld [vmem:[%s415_s3 + $0x8] sm:$0xff]   ;;  %277 = vmatprep.mubr.msk.bf16.mxu0 %vm314_vm2, %v313_v15  ;;  %289 = vmatprep.mubr.msk.bf16.mxu1 %vm314_vm2, %v313_v15  ;;  %v300_v37 = vld [vmem:[%s418_s5 + $0x18] sm:$0xff]  }
   0x3   :  { %33 = vadd.xlane.f32.xlu0 %v32_v2  ;;  %274 = vmatpush3.bf16.msra.mxu0 %v295_v14  ;;  %v251_v25 = vld [vmem:[%s416_s1] ss:$0 sm:$0xff]  ;;  %v298_v35 = vld [vmem:[%s418_s5 + $0x8] sm:$0xff]  }
   0x4   :  { %275 = vmatprep.subr.bf16.mxu0 %v313_v15  ;;  %v252_v29 = vld [vmem:[%s417_s2] ss:$0 sm:$0xff] }
   0x5   :  { %v297_v34 = vld [vmem:[%s418_s5] sm:$0xff]  }
   0x6   :  { %282 = vmatpush3.bf16.msra.mxu1 %v297_v34  ;;  %v253_v38 = vld [vmem:[%s419_s4] ss:$0 sm:$0xff] }
   0x7   :  { %37 = vadd.xlane.f32.xlu0 %v36_v3  ;;  %276 = vmatpush3.bf16.msra.mxu0 %v296_v16  ;;  %v259_v56 = vld [vmem:[%s420_s6] ss:$0 sm:$0xff] }
   0x8   :  { %283 = vmatprep.subr.bf16.mxu1 %v313_v15 }
   0xa   :  { %284 = vmatpush3.bf16.msra.mxu1 %v298_v35 }
   0xb   :  { %285 = vmatprep.subr.bf16.mxu1 %v313_v15 }
   0xe   :  { %286 = vmatpush3.bf16.msra.mxu1 %v299_v36 }
   0xf   :  { %287 = vmatprep.subr.bf16.mxu1 %v313_v15 }
  0x12   :  { %288 = vmatpush3.bf16.msra.mxu1 %v300_v37 }
  0x90   :  { %v34_v4 = vpop.xlane.xlu0 %33 }
  0x91   :  { %v40_v5 = vmul.f32 0.03125, %v34_v4 }
  0x93   :  { %v42_v6 = vsub.f32 %v358_v0, %v40_v5 }
  0x94   :  { %v38_v7 = vpop.xlane.xlu0 %37 }
  0x95   :  { %v41_v8 = vmul.f32 0.03125, %v38_v7  ;;  %v44_v9 = vmul.f32 %v42_v6, %v42_v6 }
  0x97   :  { %v43_v10 = vsub.f32 %v363_v1, %v41_v8  ;;  %v46_v11 = vsel %vm31_vm0, %v44_v9, 0.0 }
  0x98   :  { %47 = vadd.xlane.f32.xlu1 %v46_v11 }
  0x99   :  { %v45_v12 = vmul.f32 %v43_v10, %v43_v10 }
  0x9b   :  { %v49_v13 = vsel %vm35_vm1, %v45_v12, 0.0 }
  0x9c   :  { %50 = vadd.xlane.f32.xlu1 %v49_v13 }
 0x125   :  { %v48_v17 = vpop.xlane.xlu1 %47 }
 0x126   :  { %v52_v18 = vmul.f32 0.03125, %v48_v17 }
 0x128   :  { %v54_v19 = vadd.f32 1e-12, %v52_v18 }
 0x129   :  { %v51_v20 = vpop.xlane.xlu1 %50 }
 0x12a   :  { %301 = vrsqrt.f32 %v54_v19  ;;  %v53_v21 = vmul.f32 0.03125, %v51_v20 }
 0x12c   :  { %v55_v22 = vadd.f32 1e-12, %v53_v21 }
 0x12e   :  { %303 = vrsqrt.f32 %v55_v22 }
 0x134   :  { %v302_v23 = vpop.eup %301 }
 0x135   :  { %v58_v24 = vmul.f32 %v302_v23, %v42_v6 }
 0x137   :  { %v66_v28 = vmul.f32 %v251_v25, %v58_v24 }
 0x138   :  { %v304_v26 = vpop.eup %303 }
 0x139   :  { %v59_v27 = vmul.f32 %v304_v26, %v43_v10  ;;  %v74_v31 = vadd.f32 %v252_v29, %v66_v28 }
 0x13b   :  { %v67_v30 = vmul.f32 %v251_v25, %v59_v27 }
 0x13d   :  { %v75_v32 = vadd.f32 %v252_v29, %v67_v30 }
 0x13f   :  { %v76_v33 = vpack.c.bf16 %v75_v32, %v74_v31 }
 0x141   :  { %278 = vmatmul.mubr.msk.bf16.vlgmr.msra.gmra.mrb[0].mxu0 %vm31_vm0, %v76_v33 }
 0x214   :  { %v137_v39 = vpop.f32.mrb[0].mxu0 }
 0x215   :  { %v138_v40 = vadd.f32 %v253_v38, %v137_v39  ;;  %v279_v41 = vpop.f32.mrb[1].mxu0 }
 0x216   :  { %v140_v42 = vpop.f32.mrb[2].mxu0 }
 0x217   :  { %v257_v43 = vmul.f32 -1.442695, %v138_v40  ;;  %v141_v44 = vadd.f32 %v253_v38, %v140_v42  ;;  %v280_v45 = vpop.f32.mrb[3].mxu0 }
 0x219   :  { %305 = vpow2.f32 %v257_v43  ;;  %v258_v46 = vmul.f32 -1.442695, %v141_v44 }
 0x21b   :  { %307 = vpow2.f32 %v258_v46 }
 0x223   :  { %v306_v47 = vpop.eup %305 }
 0x224   :  { %v150_v48 = vadd.f32 1.0, %v306_v47 }
 0x225   :  { %v308_v49 = vpop.eup %307 }
 0x226   :  { %309 = vrcp.f32 %v150_v48  ;;  %v151_v50 = vadd.f32 1.0, %v308_v49 }
 0x228   :  { %311 = vrcp.f32 %v151_v50 }
 0x230   :  { %v310_v51 = vpop.eup %309 }
 0x231   :  { %v156_v53 = vmul.f32 %v310_v51, %v138_v40 }
 0x232   :  { %v312_v52 = vpop.eup %311 }
 0x233   :  { %v157_v54 = vmul.f32 %v312_v52, %v141_v44 }
 0x235   :  { %v158_v55 = vpack.c.bf16 %v157_v54, %v156_v53 }
 0x237   :  { %290 = vmatmul.mubr.msk.bf16.vlgmr.msra.gmra.mrb[0].mxu1 %vm198_vm3, %v158_v55 }
 0x30a   :  { %v236_v57 = vpop.f32.mrb[0].mxu1 }
 0x30b   :  { %v237_v58 = vadd.f32 %v259_v56, %v236_v57  ;;  %v291_v59 = vpop.f32.mrb[1].mxu1 }
 0x30c   :  { %v239_v60 = vpop.f32.mrb[2].mxu1 }
 0x30d   :  { %v243_v61 = vadd.f32 %v237_v58, %v358_v0  ;;  %v240_v62 = vadd.f32 %v259_v56, %v239_v60  ;;  %v292_v63 = vpop.f32.mrb[3].mxu1 }
 0x30f   :  { %245 = vst.msk [vmem:[%s421_s7] sm:$0xff] %vm31_vm0, %v243_v61  ;;  %v244_v2 = vadd.f32 %v240_v62, %v363_v1 }
 0x311   :  { %246 = vst.msk [vmem:[%s421_s7 + $0x8] sm:$0x3f] %vm35_vm1, %v244_v2 }

// kernel: encoder_forward.13
= control target key start
LH: loop header
LB: loop body
LE: loop exit
PB: predicated region body
PF: predicated region fallthrough
CT: control target
= control target key end

     0   :  { %vm18_vm0 = vcmask 261120   ;;  %vm22_vm1 = vcmask 259072   ;;  %s119_s0 = inlined_call_operand.vmem [shape: f32[14,32], index: 0, kind: input, shape index: {}]   ;;  %s120_s1 = inlined_call_operand.vmem [shape: f32[1,32], index: 1, kind: input, shape index: {}]   ;;  %s121_s2 = inlined_call_operand.vmem [shape: f32[1,32], index: 2, kind: input, shape index: {}]   ;;  %s122_s3 = inlined_call_operand.vmem [shape: f32[14,32], index: 3, kind: output, shape index: {}]  }
   0x1   :  { %v14_v0 = vld [vmem:[%s119_s0] sm:$0xff]  ;;  %v15_v1 = vld [vmem:[%s119_s0 + $0x8] sm:$0x3f] }
   0x2   :  { %v19_v2 = vsel %vm18_vm0, %v14_v0, 0.0  ;;  %v23_v3 = vsel %vm22_vm1, %v15_v1, 0.0  ;;  %v69_v21 = vld [vmem:[%s120_s1] ss:$0 sm:$0xff] }
   0x3   :  { %20 = vadd.xlane.f32.xlu0 %v19_v2  ;;  %v70_v23 = vld [vmem:[%s121_s2] ss:$0 sm:$0xff] }
   0x7   :  { %24 = vadd.xlane.f32.xlu0 %v23_v3 }
  0x90   :  { %v21_v4 = vpop.xlane.xlu0 %20 }
  0x91   :  { %v27_v5 = vmul.f32 0.03125, %v21_v4 }
  0x93   :  { %v29_v6 = vsub.f32 %v14_v0, %v27_v5 }
  0x94   :  { %v25_v7 = vpop.xlane.xlu0 %24 }
  0x95   :  { %v28_v8 = vmul.f32 0.03125, %v25_v7  ;;  %v31_v9 = vmul.f32 %v29_v6, %v29_v6 }
  0x97   :  { %v30_v10 = vsub.f32 %v15_v1, %v28_v8  ;;  %v33_v11 = vsel %vm18_vm0, %v31_v9, 0.0 }
  0x98   :  { %34 = vadd.xlane.f32.xlu1 %v33_v11 }
  0x99   :  { %v32_v12 = vmul.f32 %v30_v10, %v30_v10 }
  0x9b   :  { %v36_v13 = vsel %vm22_vm1, %v32_v12, 0.0 }
  0x9c   :  { %37 = vadd.xlane.f32.xlu1 %v36_v13 }
 0x125   :  { %v35_v14 = vpop.xlane.xlu1 %34 }
 0x126   :  { %v39_v15 = vmul.f32 0.03125, %v35_v14 }
 0x128   :  { %v41_v16 = vadd.f32 1e-12, %v39_v15 }
 0x129   :  { %v38_v17 = vpop.xlane.xlu1 %37 }
 0x12a   :  { %71 = vrsqrt.f32 %v41_v16  ;;  %v40_v18 = vmul.f32 0.03125, %v38_v17 }
 0x12c   :  { %v42_v19 = vadd.f32 1e-12, %v40_v18 }
 0x12e   :  { %73 = vrsqrt.f32 %v42_v19 }
 0x134   :  { %v72_v20 = vpop.eup %71 }
 0x135   :  { %v45_v22 = vmul.f32 %v72_v20, %v29_v6 }
 0x137   :  { %v53_v24 = vmul.f32 %v69_v21, %v45_v22 }
 0x138   :  { %v74_v25 = vpop.eup %73 }
 0x139   :  { %v61_v26 = vadd.f32 %v70_v23, %v53_v24  ;;  %v46_v27 = vmul.f32 %v74_v25, %v30_v10 }
 0x13b   :  { %63 = vst.msk [vmem:[%s122_s3] sm:$0xff] %vm18_vm0, %v61_v26  ;;  %v54_v28 = vmul.f32 %v69_v21, %v46_v27 }
 0x13d   :  { %v62_v29 = vadd.f32 %v70_v23, %v54_v28 }
 0x13f   :  { %64 = vst.msk [vmem:[%s122_s3 + $0x8] sm:$0x3f] %vm22_vm1, %v62_v29 }

// kernel: encoder_forward.9
= control target key start
LH: loop header
LB: loop body
LE: loop exit
PB: predicated region body
PF: predicated region fallthrough
CT: control target
= control target key end

     0   :  { %s1470_s30 = smov 0   ;;  %s1641_s0 = inlined_call_operand.vmem [shape: f32[2,7,32], index: 0, kind: input, shape index: {}]   ;;  %s1642_s1 = inlined_call_operand.vmem [shape: f32[1,32], index: 1, kind: input, shape index: {}]   ;;  %s1643_s2 = inlined_call_operand.vmem [shape: f32[1,32], index: 2, kind: input, shape index: {}]   ;;  %s1644_s3 = inlined_call_operand.vmem [shape: bf16[32,96], index: 3, kind: input, shape index: {}]   ;;  %s1645_s4 = inlined_call_operand.vmem [shape: f32[1,96], index: 4, kind: input, shape index: {}]   ;;  %s1646_s5 = inlined_call_operand.vmem [shape: bf16[32,32], index: 5, kind: input, shape index: {}]   ;;  %s1647_s6 = inlined_call_operand.vmem [shape: f32[1,32], index: 6, kind: input, shape index: {}]   ;;  %s1648_s7 = inlined_call_operand.vmem [shape: f32[2,1,7], index: 7, kind: input, shape index: {}]   ;;  %s1649_s8 = inlined_call_operand.vmem [shape: f32[2,1,7], index: 8, kind: input, shape index: {}]   ;;  %s1650_s9 = inlined_call_operand.vmem [shape: f32[2,7,32], index: 9, kind: output, shape index: {}]  }
   0x1 LB: > { %s1206_s10 = sadd.s32 4294967295, %s1404_s30   ;;  %p1210_p0 = scmp.ge.s32.totalorder %s1404_s30, 1  ;;  %s1404_s30 = sphi %s1470_s30, %s19_s30  }
   0x2   : > { %p302_p1 = scmp.lt.s32.totalorder %s1404_s30, 3 }
   0x4   : > { %p303_p2 = pnand %p1210_p0, %p302_p1 }
   0x5   : > { %p342_p3 = scmp.lt.s32.totalorder (!%p303_p2), %s1206_s10, 1  ;;  %vm360_vm0 = vcmask (!%p303_p2), 260096   ;;  %v1378_v7 = vld [vmem:[%s1644_s3] sm:$0xff] (!%p303_p2)   ;;  %v1406_v8 = vmov (!%p303_p2), 0.0   ;;  %vm1407_vm1 = vmmov (!%p303_p2), 0   ;;  %v1379_v9 = vld [vmem:[%s1644_s3 + $0x8] sm:$0xff] (!%p303_p2)  }
   0x6   : > { %306 = sbr.rel (%p303_p2) target bundleno = 2726 (0xaa6), region = 56  ;;  %1263 = vmatprep.subr.bf16.mxu0 (!%p303_p2), %v1406_v8  ;;  %1267 = vmatprep.mubr.msk.bf16.mxu0 (!%p303_p2), %vm1407_vm1, %v1406_v8  ;;  %v1213_v14 = vld [vmem:[%s1642_s1] ss:$0 sm:$0xff] (!%p303_p2)  ;;  %vm413_vm2 = vcmask (!%p303_p2), 261120   ;;  %s1408_s25 = smov (!%p303_p2), 64   ;;  %vm556_vm3 = vcmask (!%p303_p2), 1042432  }
   0x7   : > { %1264 = vmatpush3.bf16.msra.mxu0 (!%p303_p2), %v1378_v7  ;;  %1271 = vmatprep.subr.bf16.mxu1 (!%p303_p2), %v1406_v8  ;;  %v1214_v16 = vld [vmem:[%s1643_s2] ss:$0 sm:$0xff] (!%p303_p2)  ;;  %s1409_s26 = smov (!%p303_p2), 96   ;;  %vm557_vm4 = vcmask (!%p303_p2), 1043456   ;;  %v1410_v27 = vmov (!%p303_p2), 65535   ;;  %vm475_vm5 = vcmask (!%p303_p2), 64512  }
   0x8   : > { %1265 = vmatprep.subr.bf16.mxu0 (!%p303_p2), %v1406_v8  ;;  %1273 = vmatprep.mubr.msk.bf16.mxu1 (!%p303_p2), %vm1407_vm1, %v1406_v8  ;;  %v1215_v20 = vld [vmem:[%s1645_s4] ss:$0 sm:$0xff] (!%p303_p2)  ;;  %v558_v28 = vsel (!%p303_p2), %vm556_vm3, 4294967295, %v1410_v27  ;;  %vm530_vm6 = vcmask (!%p303_p2), 55296   ;;  %s1411_s12 = smov (!%p303_p2), 80   ;;  %s1412_s13 = smov (!%p303_p2), 88  }
   0x9   : > { %v1522_v29 = vsel (!%p303_p2), %vm557_vm4, %v558_v28, 0  ;;  %s1414_s15 = smov (!%p303_p2), 112   ;;  %vm552_vm7 = vcmask (!%p303_p2), 56320   ;;  %v458_v59 = vld [vmem:[%s1646_s5] sm:$0xf] (!%p303_p2)  ;;  %s1415_s21 = smov (!%p303_p2), 48  }
   0xa   : > { %v608_v60 = vsel (!%p303_p2), %vm557_vm4, %v458_v59, 0  ;;  %s1416_s22 = smov (!%p303_p2), 104   ;;  %s1417_s23 = smov (!%p303_p2), 56  }
   0xb   : > { %1266 = vmatpush3.bf16.msra.mxu0 (!%p303_p2), %v1379_v9  ;;  %s1418_s24 = smov (!%p303_p2), 72  }
   0xc   : > { %1277 = vmatprep.subr.bf16.mxu0 (!%p303_p2), %v1406_v8 }
   0xd   : > { %s1652_s10 = smov (!%p342_p3, %s1206_s10), 1 }
   0xe   : > { %s1211_s11 = sshll.u32 %s1652_s10, 3  ;;  %s348_s29 = scalar_lea.vmem %s1648_s7, %s1652_s10 }
   0xf   : > { %s345_s14 = scalar_lea.vmem %s1641_s0, %s1211_s11  ;;  %v1536_v35 = vld [vmem:[%s348_s29] ss:$0 sm:$0xff]  ;;  %s351_s18 = scalar_lea.vmem %s1649_s8, %s1652_s10 }
  0x10   : > { %v1486_v0 = vld [vmem:[%s345_s14] sm:$0x7f]  ;;  %s1413_s14 = smov 120   ;;  %s1419_s29 = smov 40  }
  0x11   : > { %v361_v1 = vsel %vm360_vm0, %v1486_v0, 0.0  ;;  %v1549_v49 = vld [vmem:[%s351_s18] ss:$0 sm:$0xff]  ;;  %s355_s18 = scalar_lea.vmem %s1650_s9, %s1211_s11 }
  0x12   : > { %362 = vadd.xlane.f32.xlu0 %v361_v1 }
  0x9f   : > { %v363_v2 = vpop.xlane.xlu0 %362 }
  0xa0   : > { %v365_v3 = vmul.f32 0.03125, %v363_v2 }
  0xa2   : > { %v366_v4 = vsub.f32 %v1486_v0, %v365_v3 }
  0xa4   : > { %v367_v5 = vmul.f32 %v366_v4, %v366_v4 }
  0xa6   : > { %v368_v6 = vsel %vm360_vm0, %v367_v5, 0.0 }
  0xa7   : > { %369 = vadd.xlane.f32.xlu0 %v368_v6 }
 0x134   : > { %v370_v10 = vpop.xlane.xlu0 %369 }
 0x135   : > { %v371_v11 = vmul.f32 0.03125, %v370_v10 }
 0x137   : > { %v372_v12 = vadd.f32 1e-12, %v371_v11 }
 0x139   : > { %1380 = vrsqrt.f32 %v372_v12 }
 0x143   : > { %v1381_v13 = vpop.eup %1380 }
 0x144   : > { %v374_v15 = vmul.f32 %v1381_v13, %v366_v4 }
 0x146   : > { %v381_v17 = vmul.f32 %v1213_v14, %v374_v15 }
 0x148   : > { %v388_v18 = vadd.f32 %v1214_v16, %v381_v17 }
 0x14a   : > { %v389_v19 = vpack.c.bf16 %v388_v18, %v388_v18 }
 0x14c   : > { %1268 = vmatmul.mubr.msk.bf16.vlgmr.msra.gmra.mrb[0].mxu0 %vm413_vm2, %v389_v19 }
 0x14d   : > { %1279 = vmatprep.mubr.msk.bf16.mxu0 %vm1407_vm1, %v1406_v8 }
 0x21f   : > { %v451_v21 = vpop.f32.mrb[0].mxu0 }
 0x220   : > { %v452_v22 = vadd.f32 %v1215_v20, %v451_v21  ;;  %v1269_v23 = vpop.f32.mrb[1].mxu0 }
 0x221   : > { %v454_v24 = vpop.f32.mrb[2].mxu0 }
 0x222   : > { %v1517_v25 = vpack.c.bf16 %v452_v22, %v452_v22  ;;  %v1270_v26 = vpop.f32.mrb[3].mxu0 }
 0x224   : > { %550 = vrot.lane.b32.xlu0 %v1517_v25, %s1408_s25  ;;  %473 = vrot.lane.b32.xlu1 %v1517_v25, %s1409_s26 }
 0x296   : > { %v551_v30 = vpop.permute.xlu0 %550  ;;  %v474_v31 = vpop.permute.xlu1 %473 }
 0x297   : > { %v561_v32 = vand.u32 %v1522_v29, %v551_v30  ;;  %v480_v33 = vsel %vm475_vm5, %v474_v31, 0 }
 0x298   : > { %1272 = vmatpush3.bf16.xpose.msra.mxu1 %v480_v33 }
 0x299   : > { %1278 = vmatpush3.bf16.msra.mxu0 %v561_v32  ;;  %1283 = vmatprep.subr.bf16.mxu1 %v1406_v8 }
 0x29a   : > { %1289 = vmatprep.subr.bf16.mxu0 %v1406_v8 }
 0x29f   : > { %1274 = vmatmul.mubr.msk.bf16.vlgmr.msra.gmra.mrb[0].mxu1 %vm475_vm5, %v1517_v25 }
 0x2a0   : > { %1285 = vmatprep.mubr.msk.bf16.mxu1 %vm1407_vm1, %v1406_v8  ;;  %1284 = vmatpush3.bf16.msra.mxu1 %v608_v60 }
 0x2a1   : > { %1295 = vmatprep.subr.bf16.mxu1 %v1406_v8 }
 0x372   : > { %v516_v34 = vpop.f32.mrb[0].mxu1 }
 0x373   : > { %v522_v36 = vmul.f32 0.35355338, %v516_v34  ;;  %v1275_v37 = vpop.f32.mrb[1].mxu1 }
 0x374   : > { %v519_v38 = vpop.f32.mrb[2].mxu1 }
 0x375   : > { %v1276_v39 = vpop.f32.mrb[3].mxu1  ;;  %v529_v40 = vadd.f32 %v1536_v35, %v522_v36 }
 0x377   : > { %v531_v41 = vsel %vm530_vm6, %v529_v40, -inf }
 0x378   : > { %532 = vmax.xlane.f32.xlu1 %v531_v41 }
 0x389   : > { %814 = vrot.lane.b32.xlu1 %v1517_v25, %s1411_s12 }
 0x405   : > { %v533_v42 = vpop.xlane.xlu1 %532 }
 0x406   : > { %v534_v43 = vsub.f32 %v529_v40, %v533_v42 }
 0x408   : > { %v535_v44 = vmul.f32 1.442695, %v534_v43 }
 0x409   : > { %v815_v55 = vpop.permute.xlu1 %814 }
 0x40a   : > { %1382 = vpow2.f32 %v535_v44  ;;  %v820_v57 = vsel %vm475_vm5, %v815_v55, 0 }
 0x414   : > { %v1383_v45 = vpop.eup %1382 }
 0x415   : > { %v537_v46 = vsel %vm530_vm6, %v1383_v45, 0.0 }
 0x416   : > { %538 = vadd.xlane.f32.xlu0 %v537_v46 }
 0x42c   : > { %653 = vrot.lane.b32.xlu0 %v1517_v25, %s1412_s13 }
 0x430   : > { %651 = vrot.lane.b32.xlu0 %v1517_v25, %s1413_s14 }
 0x434   : > { %812 = vrot.lane.b32.xlu0 %v1517_v25, %s1414_s15 }
 0x4a3   : > { %v539_v47 = vpop.xlane.xlu0 %538 }
 0x4a4   : > { %1384 = vrcp.f32 %v539_v47 }
 0x4a7   : > { %v654_v52 = vpop.permute.xlu0 %653 }
 0x4a8   : > { %v659_v54 = vsel %vm475_vm5, %v654_v52, 0 }
 0x4ab   : > { %v652_v56 = vpop.permute.xlu0 %651 }
 0x4ae   : > { %v1385_v48 = vpop.eup %1384 }
 0x4af   : > { %v541_v50 = vmul.f32 %v1385_v48, %v1383_v45  ;;  %v813_v58 = vpop.permute.xlu0 %812  ;;  %v459_v48 = vld [vmem:[%s1646_s5 + $0x4] sm:$0xf] }
 0x4b1   : > { %v548_v51 = vmul.f32 %v1549_v49, %v541_v50  ;;  %v769_v50 = vsel %vm557_vm4, %v459_v48, 0 }
 0x4b3   : > { %v549_v53 = vpack.c.bf16 %v548_v51, %v548_v51 }
 0x4b5   : > { %1280 = vmatmul.mubr.msk.bf16.vlgmr.msra.gmra.mrb[4].mxu0 %vm552_vm7, %v549_v53 }
 0x4b6   : > { %1290 = vmatpush3.bf16.xpose.msra.mxu0 %v659_v54  ;;  %1291 = vmatprep.mubr.msk.bf16.mxu0 %vm1407_vm1, %v1406_v8 }
 0x4b7   : > { %1307 = vmatprep.subr.bf16.mxu0 %v1406_v8 }
 0x4bd   : > { %1292 = vmatmul.mubr.msk.bf16.vlgmr.msra.gmra.mrb[8].mxu0 %vm475_vm5, %v652_v56 }
 0x4be   : > { %1308 = vmatpush3.bf16.xpose.msra.mxu0 %v820_v57  ;;  %1309 = vmatprep.mubr.msk.bf16.mxu0 %vm1407_vm1, %v1406_v8 }
 0x4bf   : > { %1313 = vmatprep.subr.bf16.mxu0 %v1406_v8 }
 0x4c5   : > { %1310 = vmatmul.mubr.msk.bf16.vlgmr.msra.gmra.mrb[12].mxu0 %vm475_vm5, %v813_v58 }
 0x4c6   : > { %1315 = vmatprep.mubr.msk.bf16.mxu0 %vm1407_vm1, %v1406_v8 }
 0x588   : > { %v597_v61 = vpop.f32.mrb[4].mxu0 }
 0x589   : > { %v603_v62 = vpack.c.bf16 %v597_v61, %v597_v61  ;;  %v1281_v63 = vpop.f32.mrb[5].mxu0 }
 0x58a   : > { %v600_v1 = vpop.f32.mrb[6].mxu0 }
 0x58b   : > { %v1282_v2 = vpop.f32.mrb[7].mxu0  ;;  %1286 = vmatmul.mubr.msk.bf16.vlgmr.msra.gmra.mrb[4].mxu1 %vm475_vm5, %v603_v62  ;;  %v460_v62 = vld [vmem:[%s1646_s5 + $0x8] sm:$0xf] }
 0x58c   : > { %1297 = vmatprep.mubr.msk.bf16.mxu1 %vm1407_vm1, %v1406_v8 }
 0x590   : > { %v695_v3 = vpop.f32.mrb[8].mxu0 }
 0x591   : > { %v1293_v4 = vpop.f32.mrb[9].mxu0  ;;  %v701_v15 = vmul.f32 0.35355338, %v695_v3  ;;  %v930_v3 = vsel %vm557_vm4, %v460_v62, 0 }
 0x592   : > { %v698_v5 = vpop.f32.mrb[10].mxu0 }
 0x593   : > { %v1294_v6 = vpop.f32.mrb[11].mxu0  ;;  %v702_v16 = vadd.f32 %v1536_v35, %v701_v15 }
 0x595   : > { %v703_v17 = vsel %vm530_vm6, %v702_v16, -inf }
 0x598   : > { %v856_v7 = vpop.f32.mrb[12].mxu0 }
 0x599   : > { %v862_v9 = vmul.f32 0.35355338, %v856_v7  ;;  %v1311_v10 = vpop.f32.mrb[13].mxu0 }
 0x59a   : > { %v859_v11 = vpop.f32.mrb[14].mxu0 }
 0x59b   : > { %v1312_v12 = vpop.f32.mrb[15].mxu0  ;;  %v863_v13 = vadd.f32 %v1536_v35, %v862_v9 }
 0x59d   : > { %v864_v14 = vsel %vm530_vm6, %v863_v13, -inf }
 0x59e   : > { %865 = vmax.xlane.f32.xlu0 %v864_v14 }
 0x5b4   : > { %877 = vrot.lane.b32.xlu0 %v1517_v25, %s1415_s21 }
 0x5b8   : > { %973 = vrot.lane.b32.xlu0 %v1517_v25, %s1416_s22 }
 0x5d7   : > { %704 = vmax.xlane.f32.xlu0 %v703_v17  ;;  %v461_v17 = vld [vmem:[%s1646_s5 + $0xc] sm:$0xf] }
 0x5ed   : > { %716 = vrot.lane.b32.xlu0 %v1517_v25, %s1417_s23 }
 0x62b   : > { %v866_v18 = vpop.xlane.xlu0 %865 }
 0x62c   : > { %v867_v19 = vsub.f32 %v863_v13, %v866_v18 }
 0x62e   : > { %v868_v20 = vmul.f32 1.442695, %v867_v19 }
 0x62f   : > { %v878_v21 = vpop.permute.xlu0 %877 }
 0x630   : > { %1386 = vpow2.f32 %v868_v20  ;;  %v883_v22 = vand.u32 %v878_v21, %v1522_v29 }
 0x632   : > { %1314 = vmatpush3.bf16.msra.mxu0 %v883_v22 }
 0x633   : > { %1325 = vmatprep.subr.bf16.mxu0 %v1406_v8  ;;  %v974_v26 = vpop.permute.xlu0 %973 }
 0x63a   : > { %v1387_v23 = vpop.eup %1386 }
 0x63b   : > { %v870_v24 = vsel %vm530_vm6, %v1387_v23, 0.0 }
 0x63c   : > { %871 = vadd.xlane.f32.xlu1 %v870_v24 }
 0x64d   : > { %975 = vrot.lane.b32.xlu1 %v1517_v25, %s1418_s24 }
 0x664   : > { %v705_v27 = vpop.xlane.xlu0 %704 }
 0x665   : > { %v706_v28 = vsub.f32 %v702_v16, %v705_v27 }
 0x667   : > { %v707_v30 = vmul.f32 1.442695, %v706_v28 }
 0x668   : > { %v717_v31 = vpop.permute.xlu0 %716 }
 0x669   : > { %1388 = vpow2.f32 %v707_v30  ;;  %v722_v32 = vand.u32 %v717_v31, %v1522_v29 }
 0x66b   : > { %1296 = vmatpush3.bf16.msra.mxu1 %v722_v32 }
 0x66c   : > { %1301 = vmatprep.subr.bf16.mxu1 %v1406_v8 }
 0x673   : > { %v1389_v33 = vpop.eup %1388 }
 0x674   : > { %v709_v34 = vsel %vm530_vm6, %v1389_v33, 0.0 }
 0x675   : > { %710 = vadd.xlane.f32.xlu1 %v709_v34 }
 0x6c9   : > { %v872_v36 = vpop.xlane.xlu1 %871 }
 0x6ca   : > { %1390 = vrcp.f32 %v872_v36 }
 0x6cd   : > { %v976_v40 = vpop.permute.xlu1 %975 }
 0x6ce   : > { %v981_v42 = vsel %vm475_vm5, %v976_v40, 0 }
 0x6d4   : > { %v1391_v37 = vpop.eup %1390 }
 0x6d5   : > { %v874_v38 = vmul.f32 %v1391_v37, %v1387_v23 }
 0x6d7   : > { %v875_v39 = vmul.f32 %v1549_v49, %v874_v38 }
 0x6d9   : > { %v876_v41 = vpack.c.bf16 %v875_v39, %v875_v39 }
 0x6db   : > { %1316 = vmatmul.mubr.msk.bf16.vlgmr.msra.gmra.mrb[16].mxu0 %vm552_vm7, %v876_v41 }
 0x6dc   : > { %1326 = vmatpush3.bf16.xpose.msra.mxu0 %v981_v42  ;;  %1327 = vmatprep.mubr.msk.bf16.mxu0 %vm1407_vm1, %v1406_v8 }
 0x6e3   : > { %1328 = vmatmul.mubr.msk.bf16.vlgmr.msra.gmra.mrb[20].mxu0 %vm475_vm5, %v974_v26 }
 0x702   : > { %v711_v43 = vpop.xlane.xlu1 %710 }
 0x703   : > { %1392 = vrcp.f32 %v711_v43 }
 0x70d   : > { %v1393_v44 = vpop.eup %1392 }
 0x70e   : > { %v713_v45 = vmul.f32 %v1393_v44, %v1389_v33 }
 0x710   : > { %v714_v46 = vmul.f32 %v1549_v49, %v713_v45 }
 0x712   : > { %v715_v47 = vpack.c.bf16 %v714_v46, %v714_v46 }
 0x714   : > { %1298 = vmatmul.mubr.msk.bf16.vlgmr.msra.gmra.mrb[8].mxu1 %vm552_vm7, %v715_v47 }
 0x715   : > { %1303 = vmatprep.mubr.msk.bf16.mxu1 %vm1407_vm1, %v1406_v8  ;;  %1302 = vmatpush3.bf16.msra.mxu1 %v769_v50 }
 0x716   : > { %1319 = vmatprep.subr.bf16.mxu1 %v1406_v8 }
 0x7ae   : > { %v919_v51 = vpop.f32.mrb[16].mxu0 }
 0x7af   : > { %v1317_v52 = vpop.f32.mrb[17].mxu0 }
 0x7b0   : > { %v922_v53 = vpop.f32.mrb[18].mxu0 }
 0x7b1   : > { %v1318_v54 = vpop.f32.mrb[19].mxu0 }
 0x7b6   : > { %v1017_v55 = vpop.f32.mrb[20].mxu0 }
 0x7b7   : > { %v1023_v56 = vmul.f32 0.35355338, %v1017_v55  ;;  %v1329_v57 = vpop.f32.mrb[21].mxu0 }
 0x7b8   : > { %v1020_v58 = vpop.f32.mrb[22].mxu0 }
 0x7b9   : > { %v1330_v59 = vpop.f32.mrb[23].mxu0  ;;  %v1024_v60 = vadd.f32 %v1536_v35, %v1023_v56  ;;  %v925_v35 = vpack.c.bf16 %v919_v51, %v919_v51 }
 0x7bb   : > { %v1025_v61 = vsel %vm530_vm6, %v1024_v60, -inf }
 0x7bc   : > { %1026 = vmax.xlane.f32.xlu1 %v1025_v61 }
 0x7e7   : > { %v758_v63 = vpop.f32.mrb[8].mxu1 }
 0x7e8   : > { %v764_v1 = vpack.c.bf16 %v758_v63, %v758_v63  ;;  %v1299_v2 = vpop.f32.mrb[9].mxu1 }
 0x7e9   : > { %v761_v4 = vpop.f32.mrb[10].mxu1 }
 0x7ea   : > { %v1300_v5 = vpop.f32.mrb[11].mxu1  ;;  %1304 = vmatmul.mubr.msk.bf16.vlgmr.msra.gmra.mrb[4].mxu1 %vm475_vm5, %v764_v1 }
 0x7eb   : > { %1320 = vmatpush3.bf16.msra.mxu1 %v930_v3  ;;  %1321 = vmatprep.mubr.msk.bf16.mxu1 %vm1407_vm1, %v1406_v8 }
 0x7ec   : > { %1331 = vmatprep.subr.bf16.mxu1 %v1406_v8 }
 0x7f6   : > { %1322 = vmatmul.mubr.msk.bf16.vlgmr.msra.gmra.mrb[4].mxu1 %vm475_vm5, %v925_v35 }
 0x7f7   : > { %1333 = vmatprep.mubr.msk.bf16.mxu1 %vm1407_vm1, %v1406_v8 }
 0x849   : > { %v1027_v6 = vpop.xlane.xlu1 %1026 }
 0x84a   : > { %v1028_v7 = vsub.f32 %v1024_v60, %v1027_v6 }
 0x84c   : > { %v1029_v9 = vmul.f32 1.442695, %v1028_v7 }
 0x84e   : > { %1394 = vpow2.f32 %v1029_v9 }
 0x858   : > { %v1395_v10 = vpop.eup %1394 }
 0x859   : > { %v1031_v11 = vsel %vm530_vm6, %v1395_v10, 0.0 }
 0x85a   : > { %1032 = vadd.xlane.f32.xlu1 %v1031_v11 }
 0x86b   : > { %1038 = vrot.lane.b32.xlu1 %v1517_v25, %s1419_s29  ;;  %v1091_v25 = vsel %vm557_vm4, %v461_v17, 0 }
 0x8e7   : > { %v1033_v12 = vpop.xlane.xlu1 %1032 }
 0x8e8   : > { %1396 = vrcp.f32 %v1033_v12 }
 0x8eb   : > { %v1039_v13 = vpop.permute.xlu1 %1038 }
 0x8ec   : > { %v1044_v14 = vand.u32 %v1039_v13, %v1522_v29 }
 0x8ee   : > { %1332 = vmatpush3.bf16.msra.mxu1 %v1044_v14 }
 0x8ef   : > { %1337 = vmatprep.subr.bf16.mxu1 %v1406_v8 }
 0x8f2   : > { %v1397_v15 = vpop.eup %1396 }
 0x8f3   : > { %v1035_v16 = vmul.f32 %v1397_v15, %v1395_v10 }
 0x8f5   : > { %v1036_v18 = vmul.f32 %v1549_v49, %v1035_v16  ;;  %v1219_v49 = vld [vmem:[%s1647_s6] ss:$0 sm:$0xff] }
 0x8f6   : > { %v471_v24 = vadd.f32 %v1219_v49, %v1486_v0 }
 0x8f7   : > { %v1037_v19 = vpack.c.bf16 %v1036_v18, %v1036_v18 }
 0x8f9   : > { %1334 = vmatmul.mubr.msk.bf16.vlgmr.msra.gmra.mrb[12].mxu1 %vm552_vm7, %v1037_v19 }
 0x8fa   : > { %1338 = vmatpush3.bf16.msra.mxu1 %v1091_v25  ;;  %1339 = vmatprep.mubr.msk.bf16.mxu1 %vm1407_vm1, %v1406_v8 }
 0x9cc   : > { %v1080_v29 = vpop.f32.mrb[12].mxu1 }
 0x9cd   : > { %v1086_v20 = vpack.c.bf16 %v1080_v29, %v1080_v29  ;;  %v1335_v21 = vpop.f32.mrb[13].mxu1 }
 0x9ce   : > { %v1083_v22 = vpop.f32.mrb[14].mxu1 }
 0x9cf   : > { %v1336_v23 = vpop.f32.mrb[15].mxu1  ;;  %1340 = vmatmul.mubr.msk.bf16.vlgmr.msra.gmra.mrb[4].mxu1 %vm475_vm5, %v1086_v20 }
 0xaa2   : > { %v1127_v26 = vpop.f32.mrb[4].mxu1 }
 0xaa3   : > { %v1343_v8 = vadd.f32 %v1127_v26, %v471_v24  ;;  %v1341_v27 = vpop.f32.mrb[5].mxu1 }
 0xaa4   : > { %v1130_v28 = vpop.f32.mrb[6].mxu1 }
 0xaa5   : > { %1134 = vst.msk [vmem:[%s355_s18] sm:$0x7f] %vm360_vm0, %v1343_v8  ;;  %v1342_v30 = vpop.f32.mrb[7].mxu1 }
 0xaa6 PF: > { %s19_s30 = sadd.s32 1, %s1404_s30  }
 0xaa7   : > { %p16_p4 = scmp.ge.s32.totalorder %s19_s30, 4  }
 0xaa9   :  { %18 = sbr.rel (!%p16_p4) target bundleno = 1 (0x1), region = 92 }

// kernel: encoder_forward.8
= control target key start
LH: loop header
LB: loop body
LE: loop exit
PB: predicated region body
PF: predicated region fallthrough
CT: control target
= control target key end

     0   :  { %s3158_s24 = smov 0   ;;  %s3652_s0 = inlined_call_operand.vmem [shape: bf16[2,8,288], index: 0, kind: input, shape index: {}]   ;;  %s3653_s1 = inlined_call_operand.vmem [shape: bf16[2,7,288], index: 1, kind: input, shape index: {}]   ;;  %s3654_s2 = inlined_call_operand.vmem [shape: bf16[288,32], index: 2, kind: input, shape index: {}]   ;;  %s3655_s3 = inlined_call_operand.vmem [shape: f32[1,32], index: 3, kind: input, shape index: {}]   ;;  %s3656_s4 = inlined_call_operand.vmem [shape: bf16[128,32], index: 4, kind: input, shape index: {}]   ;;  %s3657_s5 = inlined_call_operand.vmem [shape: f32[1,32], index: 5, kind: input, shape index: {}]   ;;  %s3658_s6 = inlined_call_operand.vmem [shape: f32[7,32], index: 6, kind: input, shape index: {}]   ;;  %s3659_s7 = inlined_call_operand.vmem [shape: f32[2,7,32], index: 7, kind: output, shape index: {}]  }
   0x1 LB: > { %s2405_s25 = sadd.s32 4294967295, %s3111_s24   ;;  %p2409_p0 = scmp.ge.s32.totalorder %s3111_s24, 1  ;;  %s3111_s24 = sphi %s3158_s24, %s17_s24  }
   0x2   : > { %p247_p1 = scmp.lt.s32.totalorder %s3111_s24, 3 }
   0x4   : > { %p248_p2 = pnand %p2409_p0, %p247_p1 }
   0x5   : > { %p283_p3 = scmp.lt.s32.totalorder (!%p248_p2), %s2405_s25, 1  ;;  %v3169_v0 = vld [vmem:[%s3654_s2] sm:$0xff] (!%p248_p2)   ;;  %v3113_v1 = vmov (!%p248_p2), 0.0   ;;  %v3180_v2 = vld [vmem:[%s3654_s2 + $0x8] sm:$0xff] (!%p248_p2)   ;;  %vm3114_vm0 = vmmov (!%p248_p2), 0   ;;  %vm374_vm1 = vcmask (!%p248_p2), 261120  }
   0x6   : > { %251 = sbr.rel (%p248_p2) target bundleno = 1314 (0x522), region = 48  ;;  %2680 = vmatprep.subr.bf16.mxu1 (!%p248_p2), %v3113_v1  ;;  %2608 = vmatprep.subr.bf16.mxu0 (!%p248_p2), %v3113_v1  ;;  %v3192_v3 = vld [vmem:[%s3654_s2 + $0x10] sm:$0xff] (!%p248_p2)   ;;  %s3115_s16 = smov (!%p248_p2), 64   ;;  %v3221_v10 = vld [vmem:[%s3654_s2 + $0x18] sm:$0xff] (!%p248_p2)   ;;  %v3268_v22 = vld [vmem:[%s3654_s2 + $0x20] sm:$0xff] (!%p248_p2)   ;;  %vm2338_vm2 = vcmask (!%p248_p2), 260096  }
   0x7   : > { %2681 = vmatpush3.bf16.msra.mxu1 (!%p248_p2), %v3169_v0  ;;  %2609 = vmatpush3.bf16.msra.mxu0 (!%p248_p2), %v3169_v0  ;;  %s3116_s19 = smov (!%p248_p2), 32   ;;  %s3117_s20 = smov (!%p248_p2), 96   ;;  %v3277_v24 = vld [vmem:[%s3654_s2 + $0x28] sm:$0xff] (!%p248_p2)   ;;  %v3292_v25 = vld [vmem:[%s3654_s2 + $0x30] sm:$0xff] (!%p248_p2)   ;;  %v3302_v26 = vld [vmem:[%s3654_s2 + $0x38] sm:$0xff] (!%p248_p2)  }
   0x8   : > { %2682 = vmatprep.subr.bf16.mxu1 (!%p248_p2), %v3113_v1  ;;  %2610 = vmatprep.subr.bf16.mxu0 (!%p248_p2), %v3113_v1  ;;  %v3317_v28 = vld [vmem:[%s3654_s2 + $0x40] sm:$0xff] (!%p248_p2)   ;;  %v3327_v30 = vld [vmem:[%s3654_s2 + $0x48] sm:$0xff] (!%p248_p2)   ;;  %v3342_v33 = vld [vmem:[%s3654_s2 + $0x50] sm:$0xff] (!%p248_p2)  }
   0x9   : > { %2612 = vmatprep.mubr.msk.bf16.mxu0 (!%p248_p2), %vm3114_vm0, %v3113_v1  ;;  %2684 = vmatprep.mubr.msk.bf16.mxu1 (!%p248_p2), %vm3114_vm0, %v3113_v1  ;;  %v3351_v34 = vld [vmem:[%s3654_s2 + $0x58] sm:$0xff] (!%p248_p2)   ;;  %v3366_v35 = vld [vmem:[%s3654_s2 + $0x60] sm:$0xff] (!%p248_p2)   ;;  %v3376_v36 = vld [vmem:[%s3654_s2 + $0x68] sm:$0xff] (!%p248_p2)  }
   0xa   : > { %v3391_v37 = vld [vmem:[%s3654_s2 + $0x70] sm:$0xff] (!%p248_p2)   ;;  %v3402_v38 = vld [vmem:[%s3654_s2 + $0x78] sm:$0xff] (!%p248_p2)   ;;  %v3417_v40 = vld [vmem:[%s3654_s2 + $0x80] sm:$0xff] (!%p248_p2)  }
   0xb   : > { %2683 = vmatpush3.bf16.msra.mxu1 (!%p248_p2), %v3180_v2  ;;  %2611 = vmatpush3.bf16.msra.mxu0 (!%p248_p2), %v3180_v2  ;;  %v3426_v41 = vld [vmem:[%s3654_s2 + $0x88] sm:$0xff] (!%p248_p2)   ;;  %v3096_v42 = vld [vmem:[%s3656_s4 + $0x10] sm:$0xff] (!%p248_p2)   ;;  %v3097_v43 = vld [vmem:[%s3656_s4] sm:$0xff] (!%p248_p2)  }
   0xc   : > { %2688 = vmatprep.subr.bf16.mxu1 (!%p248_p2), %v3113_v1  ;;  %2616 = vmatprep.subr.bf16.mxu0 (!%p248_p2), %v3113_v1  ;;  %v3098_v44 = vld [vmem:[%s3656_s4 + $0x18] sm:$0xff] (!%p248_p2)   ;;  %v3099_v45 = vld [vmem:[%s3656_s4 + $0x8] sm:$0xff] (!%p248_p2)   ;;  %v3465_v46 = vld [vmem:[%s3655_s3] ss:$0 sm:$0xff] (!%p248_p2) }
   0xd   : > { %s3661_s25 = smov (!%p283_p3, %s2405_s25), 1 }
   0xe   : > { %s3060_s30 = smul.u32 12, %s3661_s25  ;;  %s2412_s8 = sshll.u32 %s3661_s25, 3 }
   0xf   : > { %s296_s14 = scalar_lea.vmem %s3659_s7, %s2412_s8 }
  0x10   : > { %s3197_s12 = scalar_lea.vmem %s3652_s0, %s3060_s30  ;;  %s3202_s15 = scalar_lea.vmem %s3653_s1, %s3060_s30 }
  0x11   : > { %v298_v4 = vld [vmem:[%s3197_s12] sm:$0xff] }
  0x12   : > { %v3208_v5 = vld [vmem:[%s3202_s15] sm:$0xff]  ;;  %v2417_v6 = vcombine.low %v298_v4, %v298_v4  ;;  %2613 = vmatmul.mubr.msk.bf16.vlgmr.msra.gmra.mrb[0].mxu0 %vm374_vm1, %v298_v4  ;;  %v3233_v13 = vcombine.high %v298_v4, %v298_v4 }
  0x13   : > { %v2427_v7 = vcombine.low %v3208_v5, %v3208_v5  ;;  %2617 = vmatpush3.bf16.msra.mxu0 %v3192_v3  ;;  %2620 = vmatprep.mubr.msk.bf16.mxu0 %vm3114_vm0, %v3113_v1  ;;  %v3239_v14 = vcombine.high %v3208_v5, %v3208_v5 }
  0x14   : > { %480 = vrot.lane.b32.xlu0 %v2417_v6, %s3115_s16  ;;  %v714_v8 = vshrl.u32 %v2417_v6, 16  ;;  %v716_v9 = vshll.u32 %v2417_v6, 16  ;;  %2618 = vmatprep.subr.bf16.mxu0 %v3113_v1  ;;  %v1249_v15 = vshll.u32 %v3233_v13, 16  ;;  %v1247_v16 = vshrl.u32 %v3233_v13, 16 }
  0x15   : > { %655 = vrot.lane.b32.xlu1 %v2427_v7, %s3115_s16 }
  0x16   : > { %v718_v11 = vrot.slane %v716_v9, 1  ;;  %v1251_v17 = vrot.slane %v1249_v15, 1 }
  0x17   : > { %2619 = vmatpush3.bf16.msra.mxu0 %v3221_v10 }
  0x18   : > { %935 = vrot.lane.b32.xlu0 %v2417_v6, %s3116_s19  ;;  %v3226_v12 = vor.u32 %v718_v11, %v714_v8  ;;  %2624 = vmatprep.subr.bf16.mxu0 %v3113_v1  ;;  %v3248_v18 = vor.u32 %v1251_v17, %v1247_v16  ;;  %v3101_v8 = vld [vmem:[%s3656_s4 + $0x28] sm:$0xff]  }
  0x19   : > { %1068 = vrot.lane.b32.xlu1 %v2427_v7, %s3116_s19 }
  0x1c   : > { %834 = vrot.lane.b32.xlu0 %v3226_v12, %s3115_s16 }
  0x1d   : > { %1201 = vrot.lane.b32.xlu1 %v3226_v12, %s3116_s19 }
  0x20   : > { %422 = vrot.lane.b32.xlu0 %v2417_v6, %s3117_s20 }
  0x21   : > { %597 = vrot.lane.b32.xlu1 %v2427_v7, %s3117_s20 }
  0x24   : > { %776 = vrot.lane.b32.xlu0 %v3226_v12, %s3117_s20 }
  0x25   : > { %1450 = vrot.lane.b32.xlu1 %v3233_v13, %s3117_s20 }
  0x28   : > { %1496 = vrot.lane.b32.xlu0 %v3233_v13, %s3115_s16 }
  0x29   : > { %1583 = vrot.lane.b32.xlu1 %v3239_v14, %s3117_s20 }
  0x2c   : > { %1629 = vrot.lane.b32.xlu0 %v3239_v14, %s3115_s16 }
  0x2d   : > { %1716 = vrot.lane.b32.xlu1 %v3248_v18, %s3117_s20 }
  0x30   : > { %1762 = vrot.lane.b32.xlu0 %v3248_v18, %s3115_s16 }
  0x31   : > { %1907 = vrot.lane.b32.xlu1 %v3233_v13, %s3116_s19 }
  0x34   : > { %2038 = vrot.lane.b32.xlu0 %v3239_v14, %s3116_s19 }
  0x35   : > { %2169 = vrot.lane.b32.xlu1 %v3248_v18, %s3116_s19 }
  0x86   : > { %v481_v19 = vpop.permute.xlu0 %480 }
  0x87   : > { %2685 = vmatmul.mubr.msk.bf16.vlgmr.msra.gmra.mrb[0].mxu1 %vm374_vm1, %v481_v19  ;;  %v656_v27 = vpop.permute.xlu1 %655 }
  0x88   : > { %2689 = vmatpush3.bf16.msra.mxu1 %v3192_v3  ;;  %2692 = vmatprep.mubr.msk.bf16.mxu1 %vm3114_vm0, %v3113_v1 }
  0x89   : > { %2690 = vmatprep.subr.bf16.mxu1 %v3113_v1 }
  0x8a   : > { %v936_v20 = vpop.permute.xlu0 %935 }
  0x8b   : > { %v1069_v29 = vpop.permute.xlu1 %1068 }
  0x8c   : > { %2691 = vmatpush3.bf16.msra.mxu1 %v3221_v10 }
  0x8d   : > { %2696 = vmatprep.subr.bf16.mxu1 %v3113_v1 }
  0x8e   : > { %v3263_v21 = vpop.permute.xlu0 %834 }
  0x8f   : > { %v1202_v31 = vpop.permute.xlu1 %1201 }
  0x92   : > { %v423_v23 = vpop.permute.xlu0 %422 }
  0x93   : > { %2621 = vmatmul.mubr.msk.bf16.vlgmr.msra.gmra.mrb[0].mxu0 %vm374_vm1, %v423_v23  ;;  %2693 = vmatmul.mubr.msk.bf16.vlgmr.msra.gmra.mrb[0].mxu1 %vm374_vm1, %v936_v20  ;;  %v598_v32 = vpop.permute.xlu1 %597 }
  0x94   : > { %2697 = vmatpush3.bf16.msra.mxu1 %v3268_v22  ;;  %2625 = vmatpush3.bf16.msra.mxu0 %v3268_v22 }
  0x95   : > { %2698 = vmatprep.subr.bf16.mxu1 %v3113_v1  ;;  %2626 = vmatprep.subr.bf16.mxu0 %v3113_v1 }
  0x96   : > { %2628 = vmatprep.mubr.msk.bf16.mxu0 %vm3114_vm0, %v3113_v1  ;;  %2700 = vmatprep.mubr.msk.bf16.mxu1 %vm3114_vm0, %v3113_v1  ;;  %v777_v39 = vpop.permute.xlu0 %776 }
  0x97   : > { %v1451_v61 = vpop.permute.xlu1 %1450 }
  0x98   : > { %2699 = vmatpush3.bf16.msra.mxu1 %v3277_v24  ;;  %2627 = vmatpush3.bf16.msra.mxu0 %v3277_v24 }
  0x99   : > { %2704 = vmatprep.subr.bf16.mxu1 %v3113_v1  ;;  %2632 = vmatprep.subr.bf16.mxu0 %v3113_v1 }
  0x9a   : > { %v3494_v62 = vpop.permute.xlu0 %1496 }
  0x9b   : > { %v1584_v63 = vpop.permute.xlu1 %1583 }
  0x9e   : > { %v3519_v4 = vpop.permute.xlu0 %1629 }
  0x9f   : > { %2629 = vmatmul.mubr.msk.bf16.vlgmr.msra.gmra.mrb[0].mxu0 %vm374_vm1, %v481_v19  ;;  %2701 = vmatmul.mubr.msk.bf16.vlgmr.msra.gmra.mrb[0].mxu1 %vm374_vm1, %v3233_v13  ;;  %v1717_v6 = vpop.permute.xlu1 %1716 }
  0xa0   : > { %2705 = vmatpush3.bf16.msra.mxu1 %v3292_v25  ;;  %2633 = vmatpush3.bf16.msra.mxu0 %v3292_v25 }
  0xa1   : > { %2706 = vmatprep.subr.bf16.mxu1 %v3113_v1  ;;  %2634 = vmatprep.subr.bf16.mxu0 %v3113_v1 }
  0xa2   : > { %2636 = vmatprep.mubr.msk.bf16.mxu0 %vm3114_vm0, %v3113_v1  ;;  %2708 = vmatprep.mubr.msk.bf16.mxu1 %vm3114_vm0, %v3113_v1  ;;  %v3548_v7 = vpop.permute.xlu0 %1762 }
  0xa4   : > { %2707 = vmatpush3.bf16.msra.mxu1 %v3302_v26  ;;  %2635 = vmatpush3.bf16.msra.mxu0 %v3302_v26 }
  0xa5   : > { %2712 = vmatprep.subr.bf16.mxu1 %v3113_v1  ;;  %2640 = vmatprep.subr.bf16.mxu0 %v3113_v1 }
  0xab   : > { %2637 = vmatmul.mubr.msk.bf16.vlgmr.msra.gmra.mrb[0].mxu0 %vm374_vm1, %v3208_v5  ;;  %2709 = vmatmul.mubr.msk.bf16.vlgmr.msra.gmra.mrb[0].mxu1 %vm374_vm1, %v656_v27  ;;  %v3100_v5 = vld [vmem:[%s3656_s4 + $0x20] sm:$0xff]  }
  0xac   : > { %2713 = vmatpush3.bf16.msra.mxu1 %v3317_v28  ;;  %2641 = vmatpush3.bf16.msra.mxu0 %v3317_v28 }
  0xad   : > { %2714 = vmatprep.subr.bf16.mxu1 %v3113_v1  ;;  %2642 = vmatprep.subr.bf16.mxu0 %v3113_v1 }
  0xae   : > { %2716 = vmatprep.mubr.msk.bf16.mxu1 %vm3114_vm0, %v3113_v1  ;;  %2644 = vmatprep.mubr.msk.bf16.mxu0 %vm3114_vm0, %v3113_v1 }
  0xb0   : > { %2715 = vmatpush3.bf16.msra.mxu1 %v3327_v30  ;;  %2643 = vmatpush3.bf16.msra.mxu0 %v3327_v30 }
  0xb1   : > { %2720 = vmatprep.subr.bf16.mxu1 %v3113_v1  ;;  %2648 = vmatprep.subr.bf16.mxu0 %v3113_v1 }
  0xb7   : > { %2645 = vmatmul.mubr.msk.bf16.vlgmr.msra.gmra.mrb[0].mxu0 %vm374_vm1, %v598_v32  ;;  %2717 = vmatmul.mubr.msk.bf16.vlgmr.msra.gmra.mrb[0].mxu1 %vm374_vm1, %v1069_v29 }
  0xb8   : > { %2721 = vmatpush3.bf16.msra.mxu1 %v3342_v33  ;;  %2649 = vmatpush3.bf16.msra.mxu0 %v3342_v33 }
  0xb9   : > { %2722 = vmatprep.subr.bf16.mxu1 %v3113_v1  ;;  %2650 = vmatprep.subr.bf16.mxu0 %v3113_v1 }
  0xba   : > { %2652 = vmatprep.mubr.msk.bf16.mxu0 %vm3114_vm0, %v3113_v1  ;;  %2724 = vmatprep.mubr.msk.bf16.mxu1 %vm3114_vm0, %v3113_v1 }
  0xbc   : > { %2723 = vmatpush3.bf16.msra.mxu1 %v3351_v34  ;;  %2651 = vmatpush3.bf16.msra.mxu0 %v3351_v34 }
  0xbd   : > { %2728 = vmatprep.subr.bf16.mxu1 %v3113_v1  ;;  %2656 = vmatprep.subr.bf16.mxu0 %v3113_v1 }
  0xc3   : > { %2653 = vmatmul.mubr.msk.bf16.vlgmr.msra.gmra.mrb[0].mxu0 %vm374_vm1, %v656_v27  ;;  %2725 = vmatmul.mubr.msk.bf16.vlgmr.msra.gmra.mrb[0].mxu1 %vm374_vm1, %v3239_v14 }
  0xc4   : > { %2729 = vmatpush3.bf16.msra.mxu1 %v3366_v35  ;;  %2657 = vmatpush3.bf16.msra.mxu0 %v3366_v35 }
  0xc5   : > { %2730 = vmatprep.subr.bf16.mxu1 %v3113_v1  ;;  %2658 = vmatprep.subr.bf16.mxu0 %v3113_v1 }
  0xc6   : > { %2660 = vmatprep.mubr.msk.bf16.mxu0 %vm3114_vm0, %v3113_v1  ;;  %2732 = vmatprep.mubr.msk.bf16.mxu1 %vm3114_vm0, %v3113_v1 }
  0xc8   : > { %2731 = vmatpush3.bf16.msra.mxu1 %v3376_v36  ;;  %2659 = vmatpush3.bf16.msra.mxu0 %v3376_v36 }
  0xc9   : > { %2736 = vmatprep.subr.bf16.mxu1 %v3113_v1  ;;  %2664 = vmatprep.subr.bf16.mxu0 %v3113_v1 }
  0xcf   : > { %2661 = vmatmul.mubr.msk.bf16.vlgmr.msra.gmra.mrb[0].mxu0 %vm374_vm1, %v3226_v12  ;;  %2733 = vmatmul.mubr.msk.bf16.vlgmr.msra.gmra.mrb[0].mxu1 %vm374_vm1, %v3263_v21 }
  0xd0   : > { %2737 = vmatpush3.bf16.msra.mxu1 %v3391_v37  ;;  %2665 = vmatpush3.bf16.msra.mxu0 %v3391_v37 }
  0xd1   : > { %2738 = vmatprep.subr.bf16.mxu1 %v3113_v1  ;;  %2666 = vmatprep.subr.bf16.mxu0 %v3113_v1 }
  0xd2   : > { %2740 = vmatprep.mubr.msk.bf16.mxu1 %vm3114_vm0, %v3113_v1  ;;  %2668 = vmatprep.mubr.msk.bf16.mxu0 %vm3114_vm0, %v3113_v1 }
  0xd4   : > { %2739 = vmatpush3.bf16.msra.mxu1 %v3402_v38  ;;  %2667 = vmatpush3.bf16.msra.mxu0 %v3402_v38 }
  0xd5   : > { %2744 = vmatprep.subr.bf16.mxu1 %v3113_v1  ;;  %2672 = vmatprep.subr.bf16.mxu0 %v3113_v1 }
  0xdb   : > { %2669 = vmatmul.mubr.msk.bf16.vlgmr.msra.gmra.mrb[0].mxu0 %vm374_vm1, %v777_v39  ;;  %2741 = vmatmul.mubr.msk.bf16.vlgmr.msra.gmra.mrb[0].mxu1 %vm374_vm1, %v1202_v31 }
  0xdc   : > { %2745 = vmatpush3.bf16.msra.mxu1 %v3417_v40  ;;  %2673 = vmatpush3.bf16.msra.mxu0 %v3417_v40 }
  0xdd   : > { %2746 = vmatprep.subr.bf16.mxu1 %v3113_v1  ;;  %2674 = vmatprep.subr.bf16.mxu0 %v3113_v1 }
  0xde   : > { %2676 = vmatprep.mubr.msk.bf16.mxu0 %vm3114_vm0, %v3113_v1  ;;  %2748 = vmatprep.mubr.msk.bf16.mxu1 %vm3114_vm0, %v3113_v1 }
  0xe0   : > { %2747 = vmatpush3.bf16.msra.mxu1 %v3426_v41  ;;  %2675 = vmatpush3.bf16.msra.mxu0 %v3426_v41 }
  0xe1   : > { %2752 = vmatprep.subr.bf16.mxu0 %v3113_v1  ;;  %2760 = vmatprep.subr.bf16.mxu1 %v3113_v1 }
  0xe7   : > { %2677 = vmatmul.mubr.msk.bf16.vlgmr.msra.gmra.mrb[0].mxu0 %vm374_vm1, %v3263_v21  ;;  %2749 = vmatmul.mubr.msk.bf16.vlgmr.msra.gmra.mrb[0].mxu1 %vm374_vm1, %v3248_v18 }
  0xe8   : > { %2753 = vmatpush3.bf16.msra.mxu0 %v3096_v42  ;;  %2756 = vmatprep.mubr.msk.bf16.mxu0 %vm3114_vm0, %v3113_v1 }
  0xe9   : > { %2754 = vmatprep.subr.bf16.mxu0 %v3113_v1  ;;  %2764 = vmatprep.mubr.msk.bf16.mxu1 %vm3114_vm0, %v3113_v1 }
  0xea   : > { %2761 = vmatpush3.bf16.msra.mxu1 %v3097_v43 }
  0xeb   : > { %2762 = vmatprep.subr.bf16.mxu1 %v3113_v1 }
  0xec   : > { %2755 = vmatpush3.bf16.msra.mxu0 %v3098_v44 }
  0xed   : > { %2768 = vmatprep.subr.bf16.mxu0 %v3113_v1 }
  0xee   : > { %2763 = vmatpush3.bf16.msra.mxu1 %v3099_v45 }
  0xef   : > { %2840 = vmatprep.subr.bf16.mxu1 %v3113_v1 }
 0x1ba   : > { %v885_v47 = vpop.f32.mrb[0].mxu0  ;;  %v1290_v48 = vpop.f32.mrb[0].mxu1 }
 0x1bb   : > { %v2928_v49 = vadd.f32 %v3465_v46, %v885_v47  ;;  %v2929_v50 = vadd.f32 %v3465_v46, %v1290_v48  ;;  %v2678_v51 = vpop.f32.mrb[1].mxu0  ;;  %v2750_v52 = vpop.f32.mrb[1].mxu1  ;;  %v2485_v47 = vld [vmem:[%s3657_s5] ss:$0 sm:$0xff] }
 0x1bc   : > { %v888_v53 = vpop.f32.mrb[2].mxu0  ;;  %v1293_v54 = vpop.f32.mrb[2].mxu1 }
 0x1bd   : > { %v892_v55 = vmax.f32 %v2928_v49, 0.0  ;;  %v1297_v56 = vmax.f32 %v2929_v50, 0.0  ;;  %v2679_v57 = vpop.f32.mrb[3].mxu0  ;;  %v2751_v58 = vpop.f32.mrb[3].mxu1 }
 0x1bf   : > { %v893_v59 = vpack.c.bf16 %v892_v55, %v892_v55  ;;  %v1298_v60 = vpack.c.bf16 %v1297_v56, %v1297_v56 }
 0x1c1   : > { %2757 = vmatmul.mubr.msk.bf16.vlgmr.msra.gmra.mrb[4].mxu0 %vm374_vm1, %v1298_v60  ;;  %2765 = vmatmul.mubr.msk.bf16.vlgmr.msra.gmra.mrb[4].mxu1 %vm374_vm1, %v893_v59 }
 0x1c2   : > { %2769 = vmatpush3.bf16.msra.mxu0 %v3169_v0  ;;  %2772 = vmatprep.mubr.msk.bf16.mxu0 %vm3114_vm0, %v3113_v1 }
 0x1c3   : > { %2770 = vmatprep.subr.bf16.mxu0 %v3113_v1  ;;  %2844 = vmatprep.mubr.msk.bf16.mxu1 %vm3114_vm0, %v3113_v1 }
 0x1c4   : > { %2841 = vmatpush3.bf16.msra.mxu1 %v3100_v5 }
 0x1c5   : > { %2842 = vmatprep.subr.bf16.mxu1 %v3113_v1 }
 0x1c6   : > { %2771 = vmatpush3.bf16.msra.mxu0 %v3180_v2 }
 0x1c7   : > { %2776 = vmatprep.subr.bf16.mxu0 %v3113_v1 }
 0x1c8   : > { %2843 = vmatpush3.bf16.msra.mxu1 %v3101_v8 }
 0x1c9   : > { %2773 = vmatmul.mubr.msk.bf16.vlgmr.msra.gmra.mrb[8].mxu0 %vm374_vm1, %v3233_v13  ;;  %2848 = vmatprep.subr.bf16.mxu1 %v3113_v1 }
 0x1ca   : > { %2777 = vmatpush3.bf16.msra.mxu0 %v3192_v3  ;;  %2780 = vmatprep.mubr.msk.bf16.mxu0 %vm3114_vm0, %v3113_v1 }
 0x1cb   : > { %2778 = vmatprep.subr.bf16.mxu0 %v3113_v1 }
 0x1ce   : > { %2779 = vmatpush3.bf16.msra.mxu0 %v3221_v10 }
 0x1cf   : > { %2784 = vmatprep.subr.bf16.mxu0 %v3113_v1 }
 0x1d5   : > { %2781 = vmatmul.mubr.msk.bf16.vlgmr.msra.gmra.mrb[8].mxu0 %vm374_vm1, %v1451_v61 }
 0x1d6   : > { %2785 = vmatpush3.bf16.msra.mxu0 %v3268_v22  ;;  %2788 = vmatprep.mubr.msk.bf16.mxu0 %vm3114_vm0, %v3113_v1 }
 0x1d7   : > { %2786 = vmatprep.subr.bf16.mxu0 %v3113_v1 }
 0x1da   : > { %2787 = vmatpush3.bf16.msra.mxu0 %v3277_v24 }
 0x1db   : > { %2792 = vmatprep.subr.bf16.mxu0 %v3113_v1 }
 0x1e1   : > { %2789 = vmatmul.mubr.msk.bf16.vlgmr.msra.gmra.mrb[8].mxu0 %vm374_vm1, %v3494_v62 }
 0x1e2   : > { %2793 = vmatpush3.bf16.msra.mxu0 %v3292_v25  ;;  %2796 = vmatprep.mubr.msk.bf16.mxu0 %vm3114_vm0, %v3113_v1 }
 0x1e3   : > { %2794 = vmatprep.subr.bf16.mxu0 %v3113_v1 }
 0x1e6   : > { %2795 = vmatpush3.bf16.msra.mxu0 %v3302_v26 }
 0x1e7   : > { %2800 = vmatprep.subr.bf16.mxu0 %v3113_v1 }
 0x1ed   : > { %2797 = vmatmul.mubr.msk.bf16.vlgmr.msra.gmra.mrb[8].mxu0 %vm374_vm1, %v3239_v14 }
 0x1ee   : > { %2801 = vmatpush3.bf16.msra.mxu0 %v3317_v28  ;;  %2804 = vmatprep.mubr.msk.bf16.mxu0 %vm3114_vm0, %v3113_v1 }
 0x1ef   : > { %2802 = vmatprep.subr.bf16.mxu0 %v3113_v1 }
 0x1f2   : > { %2803 = vmatpush3.bf16.msra.mxu0 %v3327_v30 }
 0x1f3   : > { %2808 = vmatprep.subr.bf16.mxu0 %v3113_v1 }
 0x1f9   : > { %2805 = vmatmul.mubr.msk.bf16.vlgmr.msra.gmra.mrb[8].mxu0 %vm374_vm1, %v1584_v63 }
 0x1fa   : > { %2809 = vmatpush3.bf16.msra.mxu0 %v3342_v33  ;;  %2812 = vmatprep.mubr.msk.bf16.mxu0 %vm3114_vm0, %v3113_v1 }
 0x1fb   : > { %2810 = vmatprep.subr.bf16.mxu0 %v3113_v1 }
 0x1fe   : > { %2811 = vmatpush3.bf16.msra.mxu0 %v3351_v34 }
 0x1ff   : > { %2816 = vmatprep.subr.bf16.mxu0 %v3113_v1 }
 0x205   : > { %2813 = vmatmul.mubr.msk.bf16.vlgmr.msra.gmra.mrb[8].mxu0 %vm374_vm1, %v3519_v4 }
 0x206   : > { %2817 = vmatpush3.bf16.msra.mxu0 %v3366_v35  ;;  %2820 = vmatprep.mubr.msk.bf16.mxu0 %vm3114_vm0, %v3113_v1 }
 0x207   : > { %2818 = vmatprep.subr.bf16.mxu0 %v3113_v1 }
 0x20a   : > { %2819 = vmatpush3.bf16.msra.mxu0 %v3376_v36 }
 0x20b   : > { %2824 = vmatprep.subr.bf16.mxu0 %v3113_v1 }
 0x211   : > { %2821 = vmatmul.mubr.msk.bf16.vlgmr.msra.gmra.mrb[8].mxu0 %vm374_vm1, %v3248_v18 }
 0x212   : > { %2825 = vmatpush3.bf16.msra.mxu0 %v3391_v37  ;;  %2828 = vmatprep.mubr.msk.bf16.mxu0 %vm3114_vm0, %v3113_v1 }
 0x213   : > { %2826 = vmatprep.subr.bf16.mxu0 %v3113_v1 }
 0x216   : > { %2827 = vmatpush3.bf16.msra.mxu0 %v3402_v38 }
 0x217   : > { %2832 = vmatprep.subr.bf16.mxu0 %v3113_v1 }
 0x21d   : > { %2829 = vmatmul.mubr.msk.bf16.vlgmr.msra.gmra.mrb[8].mxu0 %vm374_vm1, %v1717_v6 }
 0x21e   : > { %2833 = vmatpush3.bf16.msra.mxu0 %v3417_v40  ;;  %2836 = vmatprep.mubr.msk.bf16.mxu0 %vm3114_vm0, %v3113_v1 }
 0x21f   : > { %2834 = vmatprep.subr.bf16.mxu0 %v3113_v1 }
 0x222   : > { %2835 = vmatpush3.bf16.msra.mxu0 %v3426_v41 }
 0x223   : > { %2920 = vmatprep.subr.bf16.mxu0 %v3113_v1 }
 0x229   : > { %2837 = vmatmul.mubr.msk.bf16.vlgmr.msra.gmra.mrb[8].mxu0 %vm374_vm1, %v3548_v7 }
 0x22a   : > { %2924 = vmatprep.mubr.msk.bf16.mxu0 %vm3114_vm0, %v3113_v1 }
 0x294   : > { %v1348_v9 = vpop.f32.mrb[4].mxu0  ;;  %v1403_v11 = vpop.f32.mrb[4].mxu1 }
 0x295   : > { %v3558_v12 = vadd.f32 %v1403_v11, %v1348_v9  ;;  %v2758_v13 = vpop.f32.mrb[5].mxu0  ;;  %v2766_v14 = vpop.f32.mrb[5].mxu1 }
 0x296   : > { %v1351_v15 = vpop.f32.mrb[6].mxu0  ;;  %v1406_v16 = vpop.f32.mrb[6].mxu1 }
 0x297   : > { %v2759_v17 = vpop.f32.mrb[7].mxu0  ;;  %v2767_v18 = vpop.f32.mrb[7].mxu1 }
 0x2fc   : > { %v1801_v19 = vpop.f32.mrb[8].mxu0 }
 0x2fd   : > { %v2930_v20 = vadd.f32 %v3465_v46, %v1801_v19  ;;  %v2838_v21 = vpop.f32.mrb[9].mxu0 }
 0x2fe   : > { %v1804_v23 = vpop.f32.mrb[10].mxu0 }
 0x2ff   : > { %v1808_v27 = vmax.f32 %v2930_v20, 0.0  ;;  %v2839_v29 = vpop.f32.mrb[11].mxu0 }
 0x301   : > { %v1809_v31 = vpack.c.bf16 %v1808_v27, %v1808_v27 }
 0x303   : > { %2845 = vmatmul.mubr.msk.bf16.vlgmr.msra.gmra.mrb[8].mxu1 %vm374_vm1, %v1809_v31 }
 0x304   : > { %2849 = vmatpush3.bf16.msra.mxu1 %v3169_v0  ;;  %2852 = vmatprep.mubr.msk.bf16.mxu1 %vm3114_vm0, %v3113_v1  ;;  %v1908_v0 = vpop.permute.xlu1 %1907 }
 0x305   : > { %2850 = vmatprep.subr.bf16.mxu1 %v3113_v1 }
 0x308   : > { %2851 = vmatpush3.bf16.msra.mxu1 %v3180_v2  ;;  %v299_v2 = vld [vmem:[%s3197_s12 + $0x8] sm:$0xf] }
 0x309   : > { %2856 = vmatprep.subr.bf16.mxu1 %v3113_v1 }
 0x30b   : > { %2853 = vmatmul.mubr.msk.bf16.vlgmr.msra.gmra.mrb[12].mxu1 %vm374_vm1, %v3494_v62 }
 0x30c   : > { %2857 = vmatpush3.bf16.msra.mxu1 %v3192_v3  ;;  %2860 = vmatprep.mubr.msk.bf16.mxu1 %vm3114_vm0, %v3113_v1  ;;  %v2039_v3 = vpop.permute.xlu0 %2038 }
 0x30d   : > { %2858 = vmatprep.subr.bf16.mxu1 %v3113_v1 }
 0x310   : > { %2859 = vmatpush3.bf16.msra.mxu1 %v3221_v10  ;;  %v301_v10 = vld [vmem:[%s3202_s15 + $0x8] sm:$0xf] }
 0x311   : > { %2864 = vmatprep.subr.bf16.mxu1 %v3113_v1 }
 0x317   : > { %2861 = vmatmul.mubr.msk.bf16.vlgmr.msra.gmra.mrb[12].mxu1 %vm374_vm1, %v1908_v0 }
 0x318   : > { %2865 = vmatpush3.bf16.msra.mxu1 %v3268_v22  ;;  %2868 = vmatprep.mubr.msk.bf16.mxu1 %vm3114_vm0, %v3113_v1  ;;  %v3103_v22 = vld [vmem:[%s3656_s4 + $0x30] sm:$0xff]  }
 0x319   : > { %2866 = vmatprep.subr.bf16.mxu1 %v3113_v1  ;;  %2921 = vmatpush3.bf16.msra.mxu0 %v3103_v22 }
 0x31a   : > { %2922 = vmatprep.subr.bf16.mxu0 %v3113_v1 }
 0x31c   : > { %2867 = vmatpush3.bf16.msra.mxu1 %v3277_v24  ;;  %v2480_v24 = vcombine.low %v299_v2, %v299_v2 }
 0x31d   : > { %2872 = vmatprep.subr.bf16.mxu1 %v3113_v1 }
 0x323   : > { %2869 = vmatmul.mubr.msk.bf16.vlgmr.msra.gmra.mrb[12].mxu1 %vm374_vm1, %v299_v2 }
 0x324   : > { %2873 = vmatpush3.bf16.msra.mxu1 %v3292_v25  ;;  %2876 = vmatprep.mubr.msk.bf16.mxu1 %vm3114_vm0, %v3113_v1  ;;  %v2170_v25 = vpop.permute.xlu1 %2169 }
 0x325   : > { %2874 = vmatprep.subr.bf16.mxu1 %v3113_v1 }
 0x328   : > { %2875 = vmatpush3.bf16.msra.mxu1 %v3302_v26  ;;  %v2221_v26 = vshll.u32 %v2480_v24, 16 }
 0x329   : > { %2880 = vmatprep.subr.bf16.mxu1 %v3113_v1 }
 0x32f   : > { %2877 = vmatmul.mubr.msk.bf16.vlgmr.msra.gmra.mrb[12].mxu1 %vm374_vm1, %v3519_v4 }
 0x330   : > { %2881 = vmatpush3.bf16.msra.mxu1 %v3317_v28  ;;  %2884 = vmatprep.mubr.msk.bf16.mxu1 %vm3114_vm0, %v3113_v1  ;;  %v2219_v28 = vshrl.u32 %v2480_v24, 16 }
 0x331   : > { %2882 = vmatprep.subr.bf16.mxu1 %v3113_v1 }
 0x334   : > { %2883 = vmatpush3.bf16.msra.mxu1 %v3327_v30  ;;  %v2223_v30 = vrot.slane %v2221_v26, 1 }
 0x335   : > { %2888 = vmatprep.subr.bf16.mxu1 %v3113_v1 }
 0x336   : > { %v2224_v32 = vor.u32 %v2223_v30, %v2219_v28 }
 0x33b   : > { %2885 = vmatmul.mubr.msk.bf16.vlgmr.msra.gmra.mrb[12].mxu1 %vm374_vm1, %v2039_v3 }
 0x33c   : > { %2889 = vmatpush3.bf16.msra.mxu1 %v3342_v33  ;;  %2892 = vmatprep.mubr.msk.bf16.mxu1 %vm3114_vm0, %v3113_v1  ;;  %v3104_v33 = vld [vmem:[%s3656_s4 + $0x38] sm:$0xff]  }
 0x33d   : > { %2890 = vmatprep.subr.bf16.mxu1 %v3113_v1  ;;  %2923 = vmatpush3.bf16.msra.mxu0 %v3104_v33 }
 0x340   : > { %2891 = vmatpush3.bf16.msra.mxu1 %v3351_v34 }
 0x341   : > { %2896 = vmatprep.subr.bf16.mxu1 %v3113_v1 }
 0x347   : > { %2893 = vmatmul.mubr.msk.bf16.vlgmr.msra.gmra.mrb[12].mxu1 %vm374_vm1, %v301_v10 }
 0x348   : > { %2897 = vmatpush3.bf16.msra.mxu1 %v3366_v35  ;;  %2900 = vmatprep.mubr.msk.bf16.mxu1 %vm3114_vm0, %v3113_v1 }
 0x349   : > { %2898 = vmatprep.subr.bf16.mxu1 %v3113_v1 }
 0x34c   : > { %2899 = vmatpush3.bf16.msra.mxu1 %v3376_v36 }
 0x34d   : > { %2904 = vmatprep.subr.bf16.mxu1 %v3113_v1 }
 0x353   : > { %2901 = vmatmul.mubr.msk.bf16.vlgmr.msra.gmra.mrb[12].mxu1 %vm374_vm1, %v3548_v7 }
 0x354   : > { %2905 = vmatpush3.bf16.msra.mxu1 %v3391_v37  ;;  %2908 = vmatprep.mubr.msk.bf16.mxu1 %vm3114_vm0, %v3113_v1 }
 0x355   : > { %2906 = vmatprep.subr.bf16.mxu1 %v3113_v1 }
 0x358   : > { %2907 = vmatpush3.bf16.msra.mxu1 %v3402_v38 }
 0x359   : > { %2912 = vmatprep.subr.bf16.mxu1 %v3113_v1 }
 0x35f   : > { %2909 = vmatmul.mubr.msk.bf16.vlgmr.msra.gmra.mrb[12].mxu1 %vm374_vm1, %v2170_v25 }
 0x360   : > { %2913 = vmatpush3.bf16.msra.mxu1 %v3417_v40  ;;  %2916 = vmatprep.mubr.msk.bf16.mxu1 %vm3114_vm0, %v3113_v1 }
 0x361   : > { %2914 = vmatprep.subr.bf16.mxu1 %v3113_v1 }
 0x364   : > { %2915 = vmatpush3.bf16.msra.mxu1 %v3426_v41 }
 0x36b   : > { %2917 = vmatmul.mubr.msk.bf16.vlgmr.msra.gmra.mrb[12].mxu1 %vm374_vm1, %v2224_v32 }
 0x3d6   : > { %v1859_v34 = vpop.f32.mrb[8].mxu1 }
 0x3d7   : > { %v1865_v35 = vadd.f32 %v1859_v34, %v3558_v12  ;;  %v2846_v36 = vpop.f32.mrb[9].mxu1 }
 0x3d8   : > { %v1862_v37 = vpop.f32.mrb[10].mxu1 }
 0x3d9   : > { %v2847_v38 = vpop.f32.mrb[11].mxu1 }
 0x43e   : > { %v2262_v1 = vpop.f32.mrb[12].mxu1 }
 0x43f   : > { %v2931_v39 = vadd.f32 %v3465_v46, %v2262_v1  ;;  %v2918_v40 = vpop.f32.mrb[13].mxu1  ;;  %v2336_v46 = vld [vmem:[%s3658_s6] sm:$0x7f] }
 0x440   : > { %v2265_v41 = vpop.f32.mrb[14].mxu1 }
 0x441   : > { %v2269_v42 = vmax.f32 %v2931_v39, 0.0  ;;  %v2919_v43 = vpop.f32.mrb[15].mxu1 }
 0x443   : > { %v2270_v44 = vpack.c.bf16 %v2269_v42, %v2269_v42 }
 0x445   : > { %2925 = vmatmul.mubr.msk.bf16.vlgmr.msra.gmra.mrb[12].mxu0 %vm374_vm1, %v2270_v44 }
 0x518   : > { %v2320_v45 = vpop.f32.mrb[12].mxu0 }
 0x519   : > { %v2326_v48 = vadd.f32 %v2320_v45, %v1865_v35  ;;  %v2926_v49 = vpop.f32.mrb[13].mxu0 }
 0x51a   : > { %v2323_v50 = vpop.f32.mrb[14].mxu0 }
 0x51b   : > { %v2334_v51 = vadd.f32 %v2485_v47, %v2326_v48  ;;  %v2927_v52 = vpop.f32.mrb[15].mxu0 }
 0x51d   : > { %v2335_v53 = vmul.f32 5.656854, %v2334_v51 }
 0x51f   : > { %v2337_v54 = vadd.f32 %v2336_v46, %v2335_v53 }
 0x521   : > { %2339 = vst.msk [vmem:[%s296_s14] sm:$0x7f] %vm2338_vm2, %v2337_v54 }
 0x522 PF: > { %s17_s24 = sadd.s32 1, %s3111_s24  }
 0x523   : > { %p14_p4 = scmp.ge.s32.totalorder %s17_s24, 4  }
 0x525   :  { %16 = sbr.rel (!%p14_p4) target bundleno = 1 (0x1), region = 81 }

</bundles_post_ra>
